<compile_context>
chip_gen: v7x
topology: tpu7x:2x2x1
jax: 0.10.0
libtpu: 0.0.40
codegen_flags: <defaults>
</compile_context>

<pallas_src>
import functools

import jax
import jax.numpy as jnp
from jax.experimental import pallas as pl
from jax.experimental.pallas import tpu as pltpu

C_FEATURES = 256
XFORMER_D_MODEL = 128
XFORMER_N_HEADS = 4
NUM_CLASSES = 80
BN_EPS = 1e-3      # ultralytics Conv BatchNorm eps
LN_EPS = 1e-5      # nn.LayerNorm default eps
NEG_INF = -1e30

_VMEM_LIMIT = 48 * 1024 * 1024   # explicit, v7x-safe (64 MiB physical)


def _round_up(x, m):
    return (x + m - 1) // m * m


def _pad2(x, rows, cols):
    r, c = x.shape
    if r == rows and c == cols:
        return x
    return jnp.pad(x, ((0, rows - r), (0, cols - c)))


# --------------------------------------------------------------------------
# Kernel 1: tiled matmul + bias (+ SiLU), bf16 in, f32 accumulate
# --------------------------------------------------------------------------
def _mm_kernel(x_ref, w_ref, b_ref, o_ref, acc_ref, *, act):
    @pl.when(pl.program_id(2) == 0)
    def _():
        acc_ref[...] = jnp.zeros_like(acc_ref)

    acc_ref[...] += jnp.dot(x_ref[...], w_ref[...],
                            preferred_element_type=jnp.float32)

    @pl.when(pl.program_id(2) == pl.num_programs(2) - 1)
    def _():
        r = acc_ref[...] + b_ref[...]
        if act:  # SiLU
            r = r * jax.nn.sigmoid(r)
        o_ref[...] = r.astype(o_ref.dtype)


def matmul_bias_act(x, w, b, act=False, out_dtype=jnp.bfloat16):
    """(M,K) @ (K,N) + b[N], optional SiLU.  Tiled + double-buffered."""
    M, K = x.shape
    K2, N = w.shape
    assert K == K2
    tm = min(512, _round_up(M, 16))
    tn = _round_up(N, 128) if N <= 512 else 256
    tk = _round_up(K, 128) if K <= 1024 else 512
    Mp, Np, Kp = _round_up(M, tm), _round_up(N, tn), _round_up(K, tk)

    xb = _pad2(x.astype(jnp.bfloat16), Mp, Kp)
    wb = _pad2(w.astype(jnp.bfloat16), Kp, Np)
    bb = _pad2(b.astype(jnp.float32).reshape(1, N), 1, Np)

    out = pl.pallas_call(
        functools.partial(_mm_kernel, act=act),
        out_shape=jax.ShapeDtypeStruct((Mp, Np), out_dtype),
        grid_spec=pltpu.PrefetchScalarGridSpec(
            num_scalar_prefetch=0,
            grid=(Mp // tm, Np // tn, Kp // tk),
            in_specs=[pl.BlockSpec((tm, tk), lambda i, j, k: (i, k)),
                      pl.BlockSpec((tk, tn), lambda i, j, k: (k, j)),
                      pl.BlockSpec((1, tn), lambda i, j, k: (0, j))],
            out_specs=pl.BlockSpec((tm, tn), lambda i, j, k: (i, j)),
            scratch_shapes=[pltpu.VMEM((tm, tn), jnp.float32)]),
        compiler_params=pltpu.CompilerParams(
            dimension_semantics=("parallel", "parallel", "arbitrary"),
            vmem_limit_bytes=_VMEM_LIMIT),
    )(xb, wb, bb)
    return out[:M, :N]


# --------------------------------------------------------------------------
# Kernel 2: flash-style cross attention (online softmax, tiled over q and kv)
# --------------------------------------------------------------------------
def _flash_kernel(q_ref, k_ref, v_ref, o_ref, m_sc, l_sc, acc_sc, *,
                  kv_len, blk_kv, need_mask):
    kv_i = pl.program_id(2)

    @pl.when(kv_i == 0)
    def _():
        m_sc[...] = jnp.full_like(m_sc[...], NEG_INF)
        l_sc[...] = jnp.zeros_like(l_sc)
        acc_sc[...] = jnp.zeros_like(acc_sc)

    q = q_ref[0]                       # (tq, hd)  bf16; softmax scale pre-folded
    k = k_ref[0]                       # (tk, hd)
    s = jax.lax.dot_general(q, k, (((1,), (1,)), ((), ())),
                            preferred_element_type=jnp.float32)   # (tq, tk)
    if need_mask:
        col = jax.lax.broadcasted_iota(jnp.int32, s.shape, 1) + kv_i * blk_kv
        s = jnp.where(col < kv_len, s, NEG_INF)

    m_prev = m_sc[...]
    m_new = jnp.maximum(m_prev, jnp.max(s, axis=-1, keepdims=True))
    alpha = jnp.exp(m_prev - m_new)
    p = jnp.exp(s - m_new)
    l_sc[...] = alpha * l_sc[...] + jnp.sum(p, axis=-1, keepdims=True)
    acc_sc[...] = alpha * acc_sc[...] + jnp.dot(
        p.astype(jnp.bfloat16), v_ref[0], preferred_element_type=jnp.float32)
    m_sc[...] = m_new

    @pl.when(kv_i == pl.num_programs(2) - 1)
    def _():
        inv = pl.reciprocal(l_sc[...], approx=True)
        o_ref[0] = (acc_sc[...] * inv).astype(o_ref.dtype)


def flash_cross_attention(q, k, v):
    """q,k,v: (B*heads, L, head_dim) bf16 -> softmax(q k^T) v, O(tq*tk) VMEM."""
    BH, L, hd = q.shape
    blk = min(256, _round_up(L, 16))
    Lp = _round_up(L, blk)

    def padL(x):
        x = x.astype(jnp.bfloat16)
        if Lp == L:
            return x
        return jnp.pad(x, ((0, 0), (0, Lp - L), (0, 0)))

    qp, kp, vp = padL(q), padL(k), padL(v)

    out = pl.pallas_call(
        functools.partial(_flash_kernel, kv_len=L, blk_kv=blk,
                          need_mask=(Lp != L)),
        out_shape=jax.ShapeDtypeStruct((BH, Lp, hd), jnp.bfloat16),
        grid_spec=pltpu.PrefetchScalarGridSpec(
            num_scalar_prefetch=0,
            grid=(BH, Lp // blk, Lp // blk),
            in_specs=[pl.BlockSpec((1, blk, hd), lambda b, qi, ki: (b, qi, 0)),
                      pl.BlockSpec((1, blk, hd), lambda b, qi, ki: (b, ki, 0)),
                      pl.BlockSpec((1, blk, hd), lambda b, qi, ki: (b, ki, 0))],
            out_specs=pl.BlockSpec((1, blk, hd), lambda b, qi, ki: (b, qi, 0)),
            scratch_shapes=[pltpu.VMEM((blk, 1), jnp.float32),
                            pltpu.VMEM((blk, 1), jnp.float32),
                            pltpu.VMEM((blk, hd), jnp.float32)]),
        compiler_params=pltpu.CompilerParams(
            dimension_semantics=("parallel", "parallel", "arbitrary"),
            vmem_limit_bytes=_VMEM_LIMIT),
    )(qp, kp, vp)
    return out[:, :L, :]


# --------------------------------------------------------------------------
# Kernel 3: fused phi projection  out = x1 @ w1 + x2 @ w2 + b   (no concat)
# --------------------------------------------------------------------------
def _phi_kernel(x1_ref, x2_ref, w1_ref, w2_ref, b_ref, o_ref):
    acc = jnp.dot(x1_ref[...], w1_ref[...], preferred_element_type=jnp.float32)
    acc = acc + jnp.dot(x2_ref[...], w2_ref[...],
                        preferred_element_type=jnp.float32)
    o_ref[...] = (acc + b_ref[...]).astype(o_ref.dtype)


def phi_projection(x1, x2, w, bias):
    """Equivalent to concat([x1, x2], -1) @ w + bias, without the HBM concat."""
    M, C1 = x1.shape
    _, C2 = x2.shape
    Ct, N = w.shape
    assert Ct == C1 + C2
    tm = min(512, _round_up(M, 16))
    Mp = _round_up(M, tm)
    x1p = _pad2(x1.astype(jnp.bfloat16), Mp, C1)
    x2p = _pad2(x2.astype(jnp.bfloat16), Mp, C2)
    w1 = w[:C1].astype(jnp.bfloat16)
    w2 = w[C1:].astype(jnp.bfloat16)
    b2 = bias.astype(jnp.float32).reshape(1, N)

    out = pl.pallas_call(
        _phi_kernel,
        out_shape=jax.ShapeDtypeStruct((Mp, N), jnp.float32),
        grid_spec=pltpu.PrefetchScalarGridSpec(
            num_scalar_prefetch=0,
            grid=(Mp // tm,),
            in_specs=[pl.BlockSpec((tm, C1), lambda i: (i, 0)),
                      pl.BlockSpec((tm, C2), lambda i: (i, 0)),
                      pl.BlockSpec((C1, N), lambda i: (0, 0)),
                      pl.BlockSpec((C2, N), lambda i: (0, 0)),
                      pl.BlockSpec((1, N), lambda i: (0, 0))],
            out_specs=pl.BlockSpec((tm, N), lambda i: (i, 0))),
        compiler_params=pltpu.CompilerParams(
            dimension_semantics=("parallel",),
            vmem_limit_bytes=_VMEM_LIMIT),
    )(x1p, x2p, w1, w2, b2)
    return out[:M]


# --------------------------------------------------------------------------
# Kernel 4: fused LayerNorm(a) + LayerNorm(b) -> add -> seg-head matmul
# --------------------------------------------------------------------------
def _ln_head_kernel(a_ref, b_ref, ga_ref, ba_ref, gb_ref, bb_ref,
                    w_ref, hb_ref, o_ref, *, eps):
    def ln(x, g, b):
        mu = jnp.mean(x, axis=-1, keepdims=True)
        xc = x - mu
        var = jnp.mean(xc * xc, axis=-1, keepdims=True)
        return xc * jax.lax.rsqrt(var + eps) * g + b

    fused = (ln(a_ref[...], ga_ref[...], ba_ref[...]) +
             ln(b_ref[...], gb_ref[...], bb_ref[...]))
    logits = jnp.dot(fused.astype(jnp.bfloat16), w_ref[...],
                     preferred_element_type=jnp.float32) + hb_ref[...]
    o_ref[...] = logits.astype(o_ref.dtype)


def layernorm_add_head(a, b, ga, ba, gb, bb, head_w, head_b):
    """LN(a)+LN(b), then (.) @ head_w + head_b, all while the tile is in VMEM."""
    M, C = a.shape
    Cw, NC = head_w.shape
    assert Cw == C
    Np = _round_up(NC, 128)            # lane-dense head output (80 -> 128)
    tm = min(512, _round_up(M, 8))
    Mp = _round_up(M, tm)

    ap = _pad2(a.astype(jnp.float32), Mp, C)
    bp = _pad2(b.astype(jnp.float32), Mp, C)
    r = lambda v: v.astype(jnp.float32).reshape(1, C)
    wp = _pad2(head_w.astype(jnp.bfloat16), C, Np)
    hbp = _pad2(head_b.astype(jnp.float32).reshape(1, NC), 1, Np)

    out = pl.pallas_call(
        functools.partial(_ln_head_kernel, eps=LN_EPS),
        out_shape=jax.ShapeDtypeStruct((Mp, Np), jnp.float32),
        grid_spec=pltpu.PrefetchScalarGridSpec(
            num_scalar_prefetch=0,
            grid=(Mp // tm,),
            in_specs=[pl.BlockSpec((tm, C), lambda i: (i, 0)),
                      pl.BlockSpec((tm, C), lambda i: (i, 0)),
                      pl.BlockSpec((1, C), lambda i: (0, 0)),
                      pl.BlockSpec((1, C), lambda i: (0, 0)),
                      pl.BlockSpec((1, C), lambda i: (0, 0)),
                      pl.BlockSpec((1, C), lambda i: (0, 0)),
                      pl.BlockSpec((C, Np), lambda i: (0, 0)),
                      pl.BlockSpec((1, Np), lambda i: (0, 0))],
            out_specs=pl.BlockSpec((tm, Np), lambda i: (i, 0))),
        compiler_params=pltpu.CompilerParams(
            dimension_semantics=("parallel",),
            vmem_limit_bytes=_VMEM_LIMIT),
    )(ap, bp, r(ga), r(ba), r(gb), r(bb), wp, hbp)
    return out[:M, :NC]


# --------------------------------------------------------------------------
# Model building blocks
# --------------------------------------------------------------------------
def conv3x3_s2_bn_silu(x_nhwc, w, bn_scale, bn_bias):
    """ultralytics Conv(c1,c2,k=3,s=2): conv(bias=False) + folded BN + SiLU.

    im2col is built in bf16 and fed to the tiled Pallas matmul.
    # TODO(synk): fold the 9 taps into one pallas_call as accumulating shifted
    # matmuls (needs manual strided DMA) to remove the 9x im2col HBM slab.
    """
    N, H, W, Cin = x_nhwc.shape
    k, s, p = 3, 2, 1
    Ho = (H + 2 * p - k) // s + 1
    Wo = (W + 2 * p - k) // s + 1
    Cout = w.shape[-1]
    xp = jnp.pad(x_nhwc.astype(jnp.bfloat16), ((0, 0), (p, p), (p, p), (0, 0)))
    cols = []
    for ki in range(k):
        for kj in range(k):
            cols.append(xp[:, ki:ki + s * (Ho - 1) + 1:s,
                           kj:kj + s * (Wo - 1) + 1:s, :])
    patches = jnp.concatenate(cols, axis=-1).reshape(N * Ho * Wo, k * k * Cin)
    w2 = w.reshape(k * k * Cin, Cout) * bn_scale[None, :]   # fold BN scale (f32)
    y = matmul_bias_act(patches, w2, bn_bias, act=True, out_dtype=jnp.bfloat16)
    return y.reshape(N, Ho, Wo, Cout)


def backbone_p3(x_nhwc, p):
    """YOLOv11Backbone up to the P3 feature (stem -> layer1 -> p3_out_conv)."""
    x = conv3x3_s2_bn_silu(x_nhwc, p['stem_w'], p['stem_s'], p['stem_b'])
    x = conv3x3_s2_bn_silu(x, p['l1_w'], p['l1_s'], p['l1_b'])
    return conv3x3_s2_bn_silu(x, p['p3_w'], p['p3_s'], p['p3_b'])


def xformer_fusion_head(f_b, f_w, p, head_w, head_b):
    """XFormerFusion (cross attention) + fused LN/add/seg-head.  NHWC in."""
    N, H, W, C = f_b.shape
    d, nh = XFORMER_D_MODEL, XFORMER_N_HEADS
    hd = d // nh
    L = H * W
    scale = hd ** (-0.5)
    fb2 = f_b.reshape(N * L, C)
    fw2 = f_w.reshape(N * L, C)

    zero3d = jnp.zeros((3 * d,), jnp.float32)

    def scale_q(wqkv):  # fold softmax scale into the q columns (zero runtime cost)
        return jnp.concatenate([wqkv[:, :d] * scale, wqkv[:, d:]], axis=1)

    qkv_b = matmul_bias_act(fb2, scale_q(p['wqkv_b']), zero3d, act=False,
                            out_dtype=jnp.bfloat16)
    qkv_w = matmul_bias_act(fw2, scale_q(p['wqkv_w']), zero3d, act=False,
                            out_dtype=jnp.bfloat16)

    def split(qkv):
        # channel order [q|k|v], each d = nh*hd -> (N*nh, L, hd)
        t = qkv.reshape(N, L, 3, nh, hd).transpose(2, 0, 3, 1, 4)
        return (t[0].reshape(N * nh, L, hd),
                t[1].reshape(N * nh, L, hd),
                t[2].reshape(N * nh, L, hd))

    q_b, k_b, v_b = split(qkv_b)
    q_w, k_w, v_w = split(qkv_w)

    f_b_arrow_w = flash_cross_attention(q_b, k_w, v_w)
    # NOTE: matches the torch code, where f_w_arrow_b is finally attn_w_b @ v_b
    f_w_arrow_b = flash_cross_attention(q_w, k_b, v_b)

    def merge(x):  # (N*nh, L, hd) -> (N*L, d), channel = head*hd + dim
        return x.reshape(N, nh, L, hd).transpose(0, 2, 1, 3).reshape(N * L, d)

    out_b = phi_projection(fb2, merge(f_b_arrow_w), p['wphi_b'], p['bphi_b'])
    out_w = phi_projection(fw2, merge(f_w_arrow_b), p['wphi_w'], p['bphi_w'])

    logits = layernorm_add_head(out_b, out_w,
                                p['ln_b_g'], p['ln_b_b'],
                                p['ln_w_g'], p['ln_w_b'],
                                head_w, head_b)
    return logits.reshape(N, H, W, NUM_CLASSES)


def dual_yolo_forward(x_blue, x_white, params):
    """x_blue/x_white: NCHW (B,3,H,W) -> logits NCHW (B,80,H/8,W/8), float32."""
    xb = jnp.transpose(x_blue, (0, 2, 3, 1)).astype(jnp.bfloat16)
    xw = jnp.transpose(x_white, (0, 2, 3, 1)).astype(jnp.bfloat16)

    f_b_p3 = backbone_p3(xb, params['backbone_b'])
    f_w_p3 = backbone_p3(xw, params['backbone_w'])
    # TODO(synk): p4/p5 features, their fusions, and the neck/proto/seg
    # placeholders are dead code w.r.t. the returned tensor (forward returns
    # only the p3 seg-head logits), so they are not computed here.

    logits = xformer_fusion_head(f_b_p3, f_w_p3, params['fusion_p3'],
                                 params['head_w'], params['head_b'])
    return jnp.transpose(logits, (0, 3, 1, 2))   # NHWC -> NCHW


# --------------------------------------------------------------------------
# Deterministic synthetic parameters
# --------------------------------------------------------------------------
def _bn_fold(key, c):
    k1, k2, k3, k4 = jax.random.split(key, 4)
    gamma = 1.0 + 0.1 * jax.random.normal(k1, (c,), jnp.float32)
    beta = 0.1 * jax.random.normal(k2, (c,), jnp.float32)
    mean = 0.1 * jax.random.normal(k3, (c,), jnp.float32)
    var = 1.0 + 0.1 * jnp.abs(jax.random.normal(k4, (c,), jnp.float32))
    scale = gamma / jnp.sqrt(var + BN_EPS)
    bias = beta - mean * scale
    return scale, bias


def _make_backbone_params(key):
    ks = jax.random.split(key, 6)
    c8, c4, c = C_FEATURES // 8, C_FEATURES // 4, C_FEATURES
    stem_s, stem_b = _bn_fold(ks[1], c8)
    l1_s, l1_b = _bn_fold(ks[3], c4)
    p3_s, p3_b = _bn_fold(ks[5], c)
    return dict(
        stem_w=0.05 * jax.random.normal(ks[0], (3, 3, 3, c8), jnp.float32),
        stem_s=stem_s, stem_b=stem_b,
        l1_w=0.05 * jax.random.normal(ks[2], (3, 3, c8, c4), jnp.float32),
        l1_s=l1_s, l1_b=l1_b,
        p3_w=0.05 * jax.random.normal(ks[4], (3, 3, c4, c), jnp.float32),
        p3_s=p3_s, p3_b=p3_b,
    )


def _make_fusion_params(key):
    ks = jax.random.split(key, 8)
    c, d = C_FEATURES, XFORMER_D_MODEL
    return dict(
        wqkv_b=0.05 * jax.random.normal(ks[0], (c, 3 * d), jnp.float32),
        wqkv_w=0.05 * jax.random.normal(ks[1], (c, 3 * d), jnp.float32),
        wphi_b=0.05 * jax.random.normal(ks[2], (c + d, c), jnp.float32),
        bphi_b=0.05 * jax.random.normal(ks[3], (c,), jnp.float32),
        wphi_w=0.05 * jax.random.normal(ks[4], (c + d, c), jnp.float32),
        bphi_w=0.05 * jax.random.normal(ks[5], (c,), jnp.float32),
        ln_b_g=1.0 + 0.1 * jax.random.normal(ks[6], (c,), jnp.float32),
        ln_b_b=jnp.zeros((c,), jnp.float32),
        ln_w_g=1.0 + 0.1 * jax.random.normal(ks[7], (c,), jnp.float32),
        ln_w_b=jnp.zeros((c,), jnp.float32),
    )


def make_params(key):
    k1, k2, k3, k4, k5 = jax.random.split(key, 5)
    return dict(
        backbone_b=_make_backbone_params(k1),
        backbone_w=_make_backbone_params(k2),
        fusion_p3=_make_fusion_params(k3),
        head_w=0.05 * jax.random.normal(k4, (C_FEATURES, NUM_CLASSES), jnp.float32),
        head_b=0.05 * jax.random.normal(k5, (NUM_CLASSES,), jnp.float32),
    )


# --------------------------------------------------------------------------
if __name__ == "__main__":
    key = jax.random.PRNGKey(0)
    kp, kb, kw = jax.random.split(key, 3)
    params = make_params(kp)

    # Small input consistent with the module: NCHW, 3 channels, 32x32 -> P3 4x4
    x_blue = jax.random.normal(kb, (2, 3, 32, 32), jnp.float32)
    x_white = jax.random.normal(kw, (2, 3, 32, 32), jnp.float32)

    fwd = jax.jit(dual_yolo_forward)
    out = fwd(x_blue, x_white, params)
    out = jax.block_until_ready(out)
    assert out.shape == (2, NUM_CLASSES, 4, 4), out.shape
    assert out.dtype == jnp.float32
    print("KERNEL_OK")
</pallas_src>

<mosaic_0001>
module attributes {stable_mosaic.version = 11 : i64} {
  func.func @_mm_kernel(%arg0: i32, %arg1: i32, %arg2: i32, %arg3: memref<512x128xbf16, #tpu.memory_space<vmem>>, %arg4: memref<128x128xbf16, #tpu.memory_space<vmem>>, %arg5: memref<1x128xf32, #tpu.memory_space<vmem>>, %arg6: memref<512x128xbf16, #tpu.memory_space<vmem>>, %arg7: memref<512x128xf32, #tpu.memory_space<vmem>>) attributes {dimension_semantics = [#tpu.dimension_semantics<parallel>, #tpu.dimension_semantics<parallel>, #tpu.dimension_semantics<arbitrary>], iteration_bounds = array<i64: 1, 1, 1>, scalar_prefetch = 0 : i64, scratch_operands = 1 : i64, tpu.core_type = #tpu.core_type<tc>, window_params = [{transform_indices = @transform_0, window_bounds = array<i64: 512, 128>}, {transform_indices = @transform_1, window_bounds = array<i64: 128, 128>}, {transform_indices = @transform_2, window_bounds = array<i64: 1, 128>}, {transform_indices = @transform_3, window_bounds = array<i64: 512, 128>}]} {
    %c0_i32 = arith.constant 0 : i32
    %0 = arith.cmpi eq, %arg2, %c0_i32 : i32
    %1 = arith.extui %0 : i1 to i32
    %c0_i32_0 = arith.constant 0 : i32
    %2 = arith.cmpi ne, %1, %c0_i32_0 : i32
    scf.if %2 {
      %cst_10 = arith.constant 0.000000e+00 : f32
      %12 = vector.broadcast %cst_10 : f32 to vector<512x128xf32>
      %c0_11 = arith.constant 0 : index
      %c0_12 = arith.constant 0 : index
      %13 = vector.load %arg7[%c0_11, %c0_12] : memref<512x128xf32, #tpu.memory_space<vmem>>, vector<512x128xf32>
      tpu.vector_store %arg7[%c0_11, %c0_12], %12 {strides = array<i32>} : memref<512x128xf32, #tpu.memory_space<vmem>>, vector<512x128xf32>,
    } else {
    }
    %c0 = arith.constant 0 : index
    %c0_1 = arith.constant 0 : index
    %3 = vector.load %arg7[%c0, %c0_1] : memref<512x128xf32, #tpu.memory_space<vmem>>, vector<512x128xf32>
    %c0_2 = arith.constant 0 : index
    %c0_3 = arith.constant 0 : index
    %4 = vector.load %arg3[%c0_2, %c0_3] : memref<512x128xbf16, #tpu.memory_space<vmem>>, vector<512x128xbf16>
    %c0_4 = arith.constant 0 : index
    %c0_5 = arith.constant 0 : index
    %5 = vector.load %arg4[%c0_4, %c0_5] : memref<128x128xbf16, #tpu.memory_space<vmem>>, vector<128x128xbf16>
    %cst = arith.constant dense<0.000000e+00> : vector<512x128xf32>
    %6 = tpu.matmul %4, %5, %cst {dimension_numbers = #tpu.dot_dimension_numbers<[1], [0], [0], [1], [0, 0, 1, 1], [], []>} : vector<512x128xbf16>, vector<128x128xbf16>, vector<512x128xf32> -> vector<512x128xf32>
    %7 = arith.addf %3, %6 : vector<512x128xf32>
    %c0_6 = arith.constant 0 : index
    %c0_7 = arith.constant 0 : index
    %8 = vector.load %arg7[%c0_6, %c0_7] : memref<512x128xf32, #tpu.memory_space<vmem>>, vector<512x128xf32>
    tpu.vector_store %arg7[%c0_6, %c0_7], %7 {strides = array<i32>} : memref<512x128xf32, #tpu.memory_space<vmem>>, vector<512x128xf32>,
    %c0_i32_8 = arith.constant 0 : i32
    %9 = arith.cmpi eq, %arg2, %c0_i32_8 : i32
    %10 = arith.extui %9 : i1 to i32
    %c0_i32_9 = arith.constant 0 : i32
    %11 = arith.cmpi ne, %10, %c0_i32_9 : i32
    scf.if %11 {
      %c0_10 = arith.constant 0 : index
      %c0_11 = arith.constant 0 : index
      %12 = vector.load %arg7[%c0_10, %c0_11] : memref<512x128xf32, #tpu.memory_space<vmem>>, vector<512x128xf32>
      %c0_12 = arith.constant 0 : index
      %c0_13 = arith.constant 0 : index
      %13 = vector.load %arg5[%c0_12, %c0_13] : memref<1x128xf32, #tpu.memory_space<vmem>>, vector<1x128xf32>
      %14 = vector.broadcast %13 : vector<1x128xf32> to vector<512x128xf32>
      %15 = arith.addf %12, %14 : vector<512x128xf32>
      %16 = arith.negf %15 : vector<512x128xf32>
      %17 = math.exp %16 : vector<512x128xf32>
      %cst_14 = arith.constant 1.000000e+00 : f32
      %18 = vector.broadcast %cst_14 : f32 to vector<512x128xf32>
      %19 = arith.addf %18, %17 : vector<512x128xf32>
      %20 = arith.divf %18, %19 : vector<512x128xf32>
      %21 = arith.mulf %15, %20 : vector<512x128xf32>
      %22 = arith.truncf %21 : vector<512x128xf32> to vector<512x128xbf16>
      %c0_15 = arith.constant 0 : index
      %c0_16 = arith.constant 0 : index
      %23 = vector.load %arg6[%c0_15, %c0_16] : memref<512x128xbf16, #tpu.memory_space<vmem>>, vector<512x128xbf16>
      tpu.vector_store %arg6[%c0_15, %c0_16], %22 {strides = array<i32>} : memref<512x128xbf16, #tpu.memory_space<vmem>>, vector<512x128xbf16>,
    } else {
    }
    return
  }
  func.func @transform_0(%arg0: i32, %arg1: i32, %arg2: i32) -> (i32, i32) {
    %c0_i32 = arith.constant 0 : i32
    return %arg0, %arg2 : i32, i32
  }
  func.func @transform_1(%arg0: i32, %arg1: i32, %arg2: i32) -> (i32, i32) {
    %c0_i32 = arith.constant 0 : i32
    return %arg2, %arg1 : i32, i32
  }
  func.func @transform_2(%arg0: i32, %arg1: i32, %arg2: i32) -> (i32, i32) {
    %c0_i32 = arith.constant 0 : i32
    %c0_i32_0 = arith.constant 0 : i32
    return %c0_i32, %arg1 : i32, i32
  }
  func.func @transform_3(%arg0: i32, %arg1: i32, %arg2: i32) -> (i32, i32) {
    %c0_i32 = arith.constant 0 : i32
    return %arg0, %arg1 : i32, i32
  }
}

module attributes {stable_mosaic.version = 11 : i64} {
  func.func @_mm_kernel(%arg0: i32, %arg1: i32, %arg2: i32, %arg3: memref<128x384xbf16, #tpu.memory_space<vmem>>, %arg4: memref<384x128xbf16, #tpu.memory_space<vmem>>, %arg5: memref<1x128xf32, #tpu.memory_space<vmem>>, %arg6: memref<128x128xbf16, #tpu.memory_space<vmem>>, %arg7: memref<128x128xf32, #tpu.memory_space<vmem>>) attributes {dimension_semantics = [#tpu.dimension_semantics<parallel>, #tpu.dimension_semantics<parallel>, #tpu.dimension_semantics<arbitrary>], iteration_bounds = array<i64: 1, 1, 1>, scalar_prefetch = 0 : i64, scratch_operands = 1 : i64, tpu.core_type = #tpu.core_type<tc>, window_params = [{transform_indices = @transform_0, window_bounds = array<i64: 128, 384>}, {transform_indices = @transform_1, window_bounds = array<i64: 384, 128>}, {transform_indices = @transform_2, window_bounds = array<i64: 1, 128>}, {transform_indices = @transform_3, window_bounds = array<i64: 128, 128>}]} {
    %c0_i32 = arith.constant 0 : i32
    %0 = arith.cmpi eq, %arg2, %c0_i32 : i32
    %1 = arith.extui %0 : i1 to i32
    %c0_i32_0 = arith.constant 0 : i32
    %2 = arith.cmpi ne, %1, %c0_i32_0 : i32
    scf.if %2 {
      %cst_10 = arith.constant 0.000000e+00 : f32
      %12 = vector.broadcast %cst_10 : f32 to vector<128x128xf32>
      %c0_11 = arith.constant 0 : index
      %c0_12 = arith.constant 0 : index
      %13 = vector.load %arg7[%c0_11, %c0_12] : memref<128x128xf32, #tpu.memory_space<vmem>>, vector<128x128xf32>
      tpu.vector_store %arg7[%c0_11, %c0_12], %12 {strides = array<i32>} : memref<128x128xf32, #tpu.memory_space<vmem>>, vector<128x128xf32>,
    } else {
    }
    %c0 = arith.constant 0 : index
    %c0_1 = arith.constant 0 : index
    %3 = vector.load %arg7[%c0, %c0_1] : memref<128x128xf32, #tpu.memory_space<vmem>>, vector<128x128xf32>
    %c0_2 = arith.constant 0 : index
    %c0_3 = arith.constant 0 : index
    %4 = vector.load %arg3[%c0_2, %c0_3] : memref<128x384xbf16, #tpu.memory_space<vmem>>, vector<128x384xbf16>
    %c0_4 = arith.constant 0 : index
    %c0_5 = arith.constant 0 : index
    %5 = vector.load %arg4[%c0_4, %c0_5] : memref<384x128xbf16, #tpu.memory_space<vmem>>, vector<384x128xbf16>
    %cst = arith.constant dense<0.000000e+00> : vector<128x128xf32>
    %6 = tpu.matmul %4, %5, %cst {dimension_numbers = #tpu.dot_dimension_numbers<[1], [0], [0], [1], [0, 0, 1, 1], [], []>} : vector<128x384xbf16>, vector<384x128xbf16>, vector<128x128xf32> -> vector<128x128xf32>
    %7 = arith.addf %3, %6 : vector<128x128xf32>
    %c0_6 = arith.constant 0 : index
    %c0_7 = arith.constant 0 : index
    %8 = vector.load %arg7[%c0_6, %c0_7] : memref<128x128xf32, #tpu.memory_space<vmem>>, vector<128x128xf32>
    tpu.vector_store %arg7[%c0_6, %c0_7], %7 {strides = array<i32>} : memref<128x128xf32, #tpu.memory_space<vmem>>, vector<128x128xf32>,
    %c0_i32_8 = arith.constant 0 : i32
    %9 = arith.cmpi eq, %arg2, %c0_i32_8 : i32
    %10 = arith.extui %9 : i1 to i32
    %c0_i32_9 = arith.constant 0 : i32
    %11 = arith.cmpi ne, %10, %c0_i32_9 : i32
    scf.if %11 {
      %c0_10 = arith.constant 0 : index
      %c0_11 = arith.constant 0 : index
      %12 = vector.load %arg7[%c0_10, %c0_11] : memref<128x128xf32, #tpu.memory_space<vmem>>, vector<128x128xf32>
      %c0_12 = arith.constant 0 : index
      %c0_13 = arith.constant 0 : index
      %13 = vector.load %arg5[%c0_12, %c0_13] : memref<1x128xf32, #tpu.memory_space<vmem>>, vector<1x128xf32>
      %14 = vector.broadcast %13 : vector<1x128xf32> to vector<128x128xf32>
      %15 = arith.addf %12, %14 : vector<128x128xf32>
      %16 = arith.negf %15 : vector<128x128xf32>
      %17 = math.exp %16 : vector<128x128xf32>
      %cst_14 = arith.constant 1.000000e+00 : f32
      %18 = vector.broadcast %cst_14 : f32 to vector<128x128xf32>
      %19 = arith.addf %18, %17 : vector<128x128xf32>
      %20 = arith.divf %18, %19 : vector<128x128xf32>
      %21 = arith.mulf %15, %20 : vector<128x128xf32>
      %22 = arith.truncf %21 : vector<128x128xf32> to vector<128x128xbf16>
      %c0_15 = arith.constant 0 : index
      %c0_16 = arith.constant 0 : index
      %23 = vector.load %arg6[%c0_15, %c0_16] : memref<128x128xbf16, #tpu.memory_space<vmem>>, vector<128x128xbf16>
      tpu.vector_store %arg6[%c0_15, %c0_16], %22 {strides = array<i32>} : memref<128x128xbf16, #tpu.memory_space<vmem>>, vector<128x128xbf16>,
    } else {
    }
    return
  }
  func.func @transform_0(%arg0: i32, %arg1: i32, %arg2: i32) -> (i32, i32) {
    %c0_i32 = arith.constant 0 : i32
    return %arg0, %arg2 : i32, i32
  }
  func.func @transform_1(%arg0: i32, %arg1: i32, %arg2: i32) -> (i32, i32) {
    %c0_i32 = arith.constant 0 : i32
    return %arg2, %arg1 : i32, i32
  }
  func.func @transform_2(%arg0: i32, %arg1: i32, %arg2: i32) -> (i32, i32) {
    %c0_i32 = arith.constant 0 : i32
    %c0_i32_0 = arith.constant 0 : i32
    return %c0_i32, %arg1 : i32, i32
  }
  func.func @transform_3(%arg0: i32, %arg1: i32, %arg2: i32) -> (i32, i32) {
    %c0_i32 = arith.constant 0 : i32
    return %arg0, %arg1 : i32, i32
  }
}

module attributes {stable_mosaic.version = 11 : i64} {
  func.func @_mm_kernel(%arg0: i32, %arg1: i32, %arg2: i32, %arg3: memref<32x640xbf16, #tpu.memory_space<vmem>>, %arg4: memref<640x256xbf16, #tpu.memory_space<vmem>>, %arg5: memref<1x256xf32, #tpu.memory_space<vmem>>, %arg6: memref<32x256xbf16, #tpu.memory_space<vmem>>, %arg7: memref<32x256xf32, #tpu.memory_space<vmem>>) attributes {dimension_semantics = [#tpu.dimension_semantics<parallel>, #tpu.dimension_semantics<parallel>, #tpu.dimension_semantics<arbitrary>], iteration_bounds = array<i64: 1, 1, 1>, scalar_prefetch = 0 : i64, scratch_operands = 1 : i64, tpu.core_type = #tpu.core_type<tc>, window_params = [{transform_indices = @transform_0, window_bounds = array<i64: 32, 640>}, {transform_indices = @transform_1, window_bounds = array<i64: 640, 256>}, {transform_indices = @transform_2, window_bounds = array<i64: 1, 256>}, {transform_indices = @transform_3, window_bounds = array<i64: 32, 256>}]} {
    %c0_i32 = arith.constant 0 : i32
    %0 = arith.cmpi eq, %arg2, %c0_i32 : i32
    %1 = arith.extui %0 : i1 to i32
    %c0_i32_0 = arith.constant 0 : i32
    %2 = arith.cmpi ne, %1, %c0_i32_0 : i32
    scf.if %2 {
      %cst_10 = arith.constant 0.000000e+00 : f32
      %12 = vector.broadcast %cst_10 : f32 to vector<32x256xf32>
      %c0_11 = arith.constant 0 : index
      %c0_12 = arith.constant 0 : index
      %13 = vector.load %arg7[%c0_11, %c0_12] : memref<32x256xf32, #tpu.memory_space<vmem>>, vector<32x256xf32>
      tpu.vector_store %arg7[%c0_11, %c0_12], %12 {strides = array<i32>} : memref<32x256xf32, #tpu.memory_space<vmem>>, vector<32x256xf32>,
    } else {
    }
    %c0 = arith.constant 0 : index
    %c0_1 = arith.constant 0 : index
    %3 = vector.load %arg7[%c0, %c0_1] : memref<32x256xf32, #tpu.memory_space<vmem>>, vector<32x256xf32>
    %c0_2 = arith.constant 0 : index
    %c0_3 = arith.constant 0 : index
    %4 = vector.load %arg3[%c0_2, %c0_3] : memref<32x640xbf16, #tpu.memory_space<vmem>>, vector<32x640xbf16>
    %c0_4 = arith.constant 0 : index
    %c0_5 = arith.constant 0 : index
    %5 = vector.load %arg4[%c0_4, %c0_5] : memref<640x256xbf16, #tpu.memory_space<vmem>>, vector<640x256xbf16>
    %cst = arith.constant dense<0.000000e+00> : vector<32x256xf32>
    %6 = tpu.matmul %4, %5, %cst {dimension_numbers = #tpu.dot_dimension_numbers<[1], [0], [0], [1], [0, 0, 1, 1], [], []>} : vector<32x640xbf16>, vector<640x256xbf16>, vector<32x256xf32> -> vector<32x256xf32>
    %7 = arith.addf %3, %6 : vector<32x256xf32>
    %c0_6 = arith.constant 0 : index
    %c0_7 = arith.constant 0 : index
    %8 = vector.load %arg7[%c0_6, %c0_7] : memref<32x256xf32, #tpu.memory_space<vmem>>, vector<32x256xf32>
    tpu.vector_store %arg7[%c0_6, %c0_7], %7 {strides = array<i32>} : memref<32x256xf32, #tpu.memory_space<vmem>>, vector<32x256xf32>,
    %c0_i32_8 = arith.constant 0 : i32
    %9 = arith.cmpi eq, %arg2, %c0_i32_8 : i32
    %10 = arith.extui %9 : i1 to i32
    %c0_i32_9 = arith.constant 0 : i32
    %11 = arith.cmpi ne, %10, %c0_i32_9 : i32
    scf.if %11 {
      %c0_10 = arith.constant 0 : index
      %c0_11 = arith.constant 0 : index
      %12 = vector.load %arg7[%c0_10, %c0_11] : memref<32x256xf32, #tpu.memory_space<vmem>>, vector<32x256xf32>
      %c0_12 = arith.constant 0 : index
      %c0_13 = arith.constant 0 : index
      %13 = vector.load %arg5[%c0_12, %c0_13] : memref<1x256xf32, #tpu.memory_space<vmem>>, vector<1x256xf32>
      %14 = vector.broadcast %13 : vector<1x256xf32> to vector<32x256xf32>
      %15 = arith.addf %12, %14 : vector<32x256xf32>
      %16 = arith.negf %15 : vector<32x256xf32>
      %17 = math.exp %16 : vector<32x256xf32>
      %cst_14 = arith.constant 1.000000e+00 : f32
      %18 = vector.broadcast %cst_14 : f32 to vector<32x256xf32>
      %19 = arith.addf %18, %17 : vector<32x256xf32>
      %20 = arith.divf %18, %19 : vector<32x256xf32>
      %21 = arith.mulf %15, %20 : vector<32x256xf32>
      %22 = arith.truncf %21 : vector<32x256xf32> to vector<32x256xbf16>
      %c0_15 = arith.constant 0 : index
      %c0_16 = arith.constant 0 : index
      %23 = vector.load %arg6[%c0_15, %c0_16] : memref<32x256xbf16, #tpu.memory_space<vmem>>, vector<32x256xbf16>
      tpu.vector_store %arg6[%c0_15, %c0_16], %22 {strides = array<i32>} : memref<32x256xbf16, #tpu.memory_space<vmem>>, vector<32x256xbf16>,
    } else {
    }
    return
  }
  func.func @transform_0(%arg0: i32, %arg1: i32, %arg2: i32) -> (i32, i32) {
    %c0_i32 = arith.constant 0 : i32
    return %arg0, %arg2 : i32, i32
  }
  func.func @transform_1(%arg0: i32, %arg1: i32, %arg2: i32) -> (i32, i32) {
    %c0_i32 = arith.constant 0 : i32
    return %arg2, %arg1 : i32, i32
  }
  func.func @transform_2(%arg0: i32, %arg1: i32, %arg2: i32) -> (i32, i32) {
    %c0_i32 = arith.constant 0 : i32
    %c0_i32_0 = arith.constant 0 : i32
    return %c0_i32, %arg1 : i32, i32
  }
  func.func @transform_3(%arg0: i32, %arg1: i32, %arg2: i32) -> (i32, i32) {
    %c0_i32 = arith.constant 0 : i32
    return %arg0, %arg1 : i32, i32
  }
}

module attributes {stable_mosaic.version = 11 : i64} {
  func.func @_mm_kernel(%arg0: i32, %arg1: i32, %arg2: i32, %arg3: memref<32x256xbf16, #tpu.memory_space<vmem>>, %arg4: memref<256x384xbf16, #tpu.memory_space<vmem>>, %arg5: memref<1x384xf32, #tpu.memory_space<vmem>>, %arg6: memref<32x384xbf16, #tpu.memory_space<vmem>>, %arg7: memref<32x384xf32, #tpu.memory_space<vmem>>) attributes {dimension_semantics = [#tpu.dimension_semantics<parallel>, #tpu.dimension_semantics<parallel>, #tpu.dimension_semantics<arbitrary>], iteration_bounds = array<i64: 1, 1, 1>, scalar_prefetch = 0 : i64, scratch_operands = 1 : i64, tpu.core_type = #tpu.core_type<tc>, window_params = [{transform_indices = @transform_0, window_bounds = array<i64: 32, 256>}, {transform_indices = @transform_1, window_bounds = array<i64: 256, 384>}, {transform_indices = @transform_2, window_bounds = array<i64: 1, 384>}, {transform_indices = @transform_3, window_bounds = array<i64: 32, 384>}]} {
    %c0_i32 = arith.constant 0 : i32
    %0 = arith.cmpi eq, %arg2, %c0_i32 : i32
    %1 = arith.extui %0 : i1 to i32
    %c0_i32_0 = arith.constant 0 : i32
    %2 = arith.cmpi ne, %1, %c0_i32_0 : i32
    scf.if %2 {
      %cst_10 = arith.constant 0.000000e+00 : f32
      %12 = vector.broadcast %cst_10 : f32 to vector<32x384xf32>
      %c0_11 = arith.constant 0 : index
      %c0_12 = arith.constant 0 : index
      %13 = vector.load %arg7[%c0_11, %c0_12] : memref<32x384xf32, #tpu.memory_space<vmem>>, vector<32x384xf32>
      tpu.vector_store %arg7[%c0_11, %c0_12], %12 {strides = array<i32>} : memref<32x384xf32, #tpu.memory_space<vmem>>, vector<32x384xf32>,
    } else {
    }
    %c0 = arith.constant 0 : index
    %c0_1 = arith.constant 0 : index
    %3 = vector.load %arg7[%c0, %c0_1] : memref<32x384xf32, #tpu.memory_space<vmem>>, vector<32x384xf32>
    %c0_2 = arith.constant 0 : index
    %c0_3 = arith.constant 0 : index
    %4 = vector.load %arg3[%c0_2, %c0_3] : memref<32x256xbf16, #tpu.memory_space<vmem>>, vector<32x256xbf16>
    %c0_4 = arith.constant 0 : index
    %c0_5 = arith.constant 0 : index
    %5 = vector.load %arg4[%c0_4, %c0_5] : memref<256x384xbf16, #tpu.memory_space<vmem>>, vector<256x384xbf16>
    %cst = arith.constant dense<0.000000e+00> : vector<32x384xf32>
    %6 = tpu.matmul %4, %5, %cst {dimension_numbers = #tpu.dot_dimension_numbers<[1], [0], [0], [1], [0, 0, 1, 1], [], []>} : vector<32x256xbf16>, vector<256x384xbf16>, vector<32x384xf32> -> vector<32x384xf32>
    %7 = arith.addf %3, %6 : vector<32x384xf32>
    %c0_6 = arith.constant 0 : index
    %c0_7 = arith.constant 0 : index
    %8 = vector.load %arg7[%c0_6, %c0_7] : memref<32x384xf32, #tpu.memory_space<vmem>>, vector<32x384xf32>
    tpu.vector_store %arg7[%c0_6, %c0_7], %7 {strides = array<i32>} : memref<32x384xf32, #tpu.memory_space<vmem>>, vector<32x384xf32>,
    %c0_i32_8 = arith.constant 0 : i32
    %9 = arith.cmpi eq, %arg2, %c0_i32_8 : i32
    %10 = arith.extui %9 : i1 to i32
    %c0_i32_9 = arith.constant 0 : i32
    %11 = arith.cmpi ne, %10, %c0_i32_9 : i32
    scf.if %11 {
      %c0_10 = arith.constant 0 : index
      %c0_11 = arith.constant 0 : index
      %12 = vector.load %arg7[%c0_10, %c0_11] : memref<32x384xf32, #tpu.memory_space<vmem>>, vector<32x384xf32>
      %c0_12 = arith.constant 0 : index
      %c0_13 = arith.constant 0 : index
      %13 = vector.load %arg5[%c0_12, %c0_13] : memref<1x384xf32, #tpu.memory_space<vmem>>, vector<1x384xf32>
      %14 = vector.broadcast %13 : vector<1x384xf32> to vector<32x384xf32>
      %15 = arith.addf %12, %14 : vector<32x384xf32>
      %16 = arith.truncf %15 : vector<32x384xf32> to vector<32x384xbf16>
      %c0_14 = arith.constant 0 : index
      %c0_15 = arith.constant 0 : index
      %17 = vector.load %arg6[%c0_14, %c0_15] : memref<32x384xbf16, #tpu.memory_space<vmem>>, vector<32x384xbf16>
      tpu.vector_store %arg6[%c0_14, %c0_15], %16 {strides = array<i32>} : memref<32x384xbf16, #tpu.memory_space<vmem>>, vector<32x384xbf16>,
    } else {
    }
    return
  }
  func.func @transform_0(%arg0: i32, %arg1: i32, %arg2: i32) -> (i32, i32) {
    %c0_i32 = arith.constant 0 : i32
    return %arg0, %arg2 : i32, i32
  }
  func.func @transform_1(%arg0: i32, %arg1: i32, %arg2: i32) -> (i32, i32) {
    %c0_i32 = arith.constant 0 : i32
    return %arg2, %arg1 : i32, i32
  }
  func.func @transform_2(%arg0: i32, %arg1: i32, %arg2: i32) -> (i32, i32) {
    %c0_i32 = arith.constant 0 : i32
    %c0_i32_0 = arith.constant 0 : i32
    return %c0_i32, %arg1 : i32, i32
  }
  func.func @transform_3(%arg0: i32, %arg1: i32, %arg2: i32) -> (i32, i32) {
    %c0_i32 = arith.constant 0 : i32
    return %arg0, %arg1 : i32, i32
  }
}

module attributes {stable_mosaic.version = 11 : i64} {
  func.func @_flash_kernel(%arg0: i32, %arg1: i32, %arg2: i32, %arg3: memref<1x16x32xbf16, #tpu.memory_space<vmem>>, %arg4: memref<1x16x32xbf16, #tpu.memory_space<vmem>>, %arg5: memref<1x16x32xbf16, #tpu.memory_space<vmem>>, %arg6: memref<1x16x32xbf16, #tpu.memory_space<vmem>>, %arg7: memref<16x1xf32, #tpu.memory_space<vmem>>, %arg8: memref<16x1xf32, #tpu.memory_space<vmem>>, %arg9: memref<16x32xf32, #tpu.memory_space<vmem>>) attributes {dimension_semantics = [#tpu.dimension_semantics<parallel>, #tpu.dimension_semantics<parallel>, #tpu.dimension_semantics<arbitrary>], iteration_bounds = array<i64: 8, 1, 1>, scalar_prefetch = 0 : i64, scratch_operands = 3 : i64, tpu.core_type = #tpu.core_type<tc>, window_params = [{transform_indices = @transform_0, window_bounds = array<i64: 1, 16, 32>}, {transform_indices = @transform_1, window_bounds = array<i64: 1, 16, 32>}, {transform_indices = @transform_2, window_bounds = array<i64: 1, 16, 32>}, {transform_indices = @transform_3, window_bounds = array<i64: 1, 16, 32>}]} {
    %c0_i32 = arith.constant 0 : i32
    %0 = arith.cmpi eq, %arg2, %c0_i32 : i32
    %1 = arith.extui %0 : i1 to i32
    %c0_i32_0 = arith.constant 0 : i32
    %2 = arith.cmpi ne, %1, %c0_i32_0 : i32
    scf.if %2 {
      %cst_26 = arith.constant -1.000000e+30 : f32
      %36 = vector.broadcast %cst_26 : f32 to vector<16x1xf32>
      %c0_27 = arith.constant 0 : index
      %c0_28 = arith.constant 0 : index
      %37 = vector.load %arg7[%c0_27, %c0_28] : memref<16x1xf32, #tpu.memory_space<vmem>>, vector<16x1xf32>
      tpu.vector_store %arg7[%c0_27, %c0_28], %36 {strides = array<i32>} : memref<16x1xf32, #tpu.memory_space<vmem>>, vector<16x1xf32>,
      %cst_29 = arith.constant 0.000000e+00 : f32
      %38 = vector.broadcast %cst_29 : f32 to vector<16x1xf32>
      %c0_30 = arith.constant 0 : index
      %c0_31 = arith.constant 0 : index
      %39 = vector.load %arg8[%c0_30, %c0_31] : memref<16x1xf32, #tpu.memory_space<vmem>>, vector<16x1xf32>
      tpu.vector_store %arg8[%c0_30, %c0_31], %38 {strides = array<i32>} : memref<16x1xf32, #tpu.memory_space<vmem>>, vector<16x1xf32>,
      %cst_32 = arith.constant 0.000000e+00 : f32
      %40 = vector.broadcast %cst_32 : f32 to vector<16x32xf32>
      %c0_33 = arith.constant 0 : index
      %c0_34 = arith.constant 0 : index
      %41 = vector.load %arg9[%c0_33, %c0_34] : memref<16x32xf32, #tpu.memory_space<vmem>>, vector<16x32xf32>
      tpu.vector_store %arg9[%c0_33, %c0_34], %40 {strides = array<i32>} : memref<16x32xf32, #tpu.memory_space<vmem>>, vector<16x32xf32>,
    } else {
    }
    %c0 = arith.constant 0 : index
    %c0_1 = arith.constant 0 : index
    %c0_2 = arith.constant 0 : index
    %3 = vector.load %arg3[%c0, %c0_1, %c0_2] : memref<1x16x32xbf16, #tpu.memory_space<vmem>>, vector<1x16x32xbf16>
    %4 = vector.shape_cast %3 : vector<1x16x32xbf16> to vector<16x32xbf16>
    %c0_3 = arith.constant 0 : index
    %c0_4 = arith.constant 0 : index
    %c0_5 = arith.constant 0 : index
    %5 = vector.load %arg4[%c0_3, %c0_4, %c0_5] : memref<1x16x32xbf16, #tpu.memory_space<vmem>>, vector<1x16x32xbf16>
    %6 = vector.shape_cast %5 : vector<1x16x32xbf16> to vector<16x32xbf16>
    %cst = arith.constant dense<0.000000e+00> : vector<16x16xf32>
    %7 = tpu.matmul %4, %6, %cst {dimension_numbers = #tpu.dot_dimension_numbers<[1], [1], [0], [0], [0, 0, 1, 0], [], []>} : vector<16x32xbf16>, vector<16x32xbf16>, vector<16x16xf32> -> vector<16x16xf32>
    %c0_6 = arith.constant 0 : index
    %c0_7 = arith.constant 0 : index
    %8 = vector.load %arg7[%c0_6, %c0_7] : memref<16x1xf32, #tpu.memory_space<vmem>>, vector<16x1xf32>
    %cst_8 = arith.constant dense<0xFF800000> : vector<16xf32>
    %9 = vector.multi_reduction <maximumf>, %7, %cst_8 [1] : vector<16x16xf32> to vector<16xf32>
    %10 = vector.shape_cast %9 : vector<16xf32> to vector<16x1xf32>
    %11 = arith.maximumf %8, %10 : vector<16x1xf32>
    %12 = arith.subf %8, %11 : vector<16x1xf32>
    %13 = math.exp %12 : vector<16x1xf32>
    %14 = vector.broadcast %11 : vector<16x1xf32> to vector<16x16xf32>
    %15 = arith.subf %7, %14 : vector<16x16xf32>
    %16 = math.exp %15 : vector<16x16xf32>
    %c0_9 = arith.constant 0 : index
    %c0_10 = arith.constant 0 : index
    %17 = vector.load %arg8[%c0_9, %c0_10] : memref<16x1xf32, #tpu.memory_space<vmem>>, vector<16x1xf32>
    %18 = arith.mulf %13, %17 : vector<16x1xf32>
    %cst_11 = arith.constant dense<0.000000e+00> : vector<16xf32>
    %19 = vector.multi_reduction <add>, %16, %cst_11 [1] : vector<16x16xf32> to vector<16xf32>
    %20 = vector.shape_cast %19 : vector<16xf32> to vector<16x1xf32>
    %21 = arith.addf %18, %20 : vector<16x1xf32>
    %c0_12 = arith.constant 0 : index
    %c0_13 = arith.constant 0 : index
    %22 = vector.load %arg8[%c0_12, %c0_13] : memref<16x1xf32, #tpu.memory_space<vmem>>, vector<16x1xf32>
    tpu.vector_store %arg8[%c0_12, %c0_13], %21 {strides = array<i32>} : memref<16x1xf32, #tpu.memory_space<vmem>>, vector<16x1xf32>,
    %c0_14 = arith.constant 0 : index
    %c0_15 = arith.constant 0 : index
    %23 = vector.load %arg9[%c0_14, %c0_15] : memref<16x32xf32, #tpu.memory_space<vmem>>, vector<16x32xf32>
    %24 = vector.broadcast %13 : vector<16x1xf32> to vector<16x32xf32>
    %25 = arith.mulf %24, %23 : vector<16x32xf32>
    %26 = arith.truncf %16 : vector<16x16xf32> to vector<16x16xbf16>
    %c0_16 = arith.constant 0 : index
    %c0_17 = arith.constant 0 : index
    %c0_18 = arith.constant 0 : index
    %27 = vector.load %arg5[%c0_16, %c0_17, %c0_18] : memref<1x16x32xbf16, #tpu.memory_space<vmem>>, vector<1x16x32xbf16>
    %28 = vector.shape_cast %27 : vector<1x16x32xbf16> to vector<16x32xbf16>
    %cst_19 = arith.constant dense<0.000000e+00> : vector<16x32xf32>
    %29 = tpu.matmul %26, %28, %cst_19 {dimension_numbers = #tpu.dot_dimension_numbers<[1], [0], [0], [1], [0, 0, 1, 1], [], []>} : vector<16x16xbf16>, vector<16x32xbf16>, vector<16x32xf32> -> vector<16x32xf32>
    %30 = arith.addf %25, %29 : vector<16x32xf32>
    %c0_20 = arith.constant 0 : index
    %c0_21 = arith.constant 0 : index
    %31 = vector.load %arg9[%c0_20, %c0_21] : memref<16x32xf32, #tpu.memory_space<vmem>>, vector<16x32xf32>
    tpu.vector_store %arg9[%c0_20, %c0_21], %30 {strides = array<i32>} : memref<16x32xf32, #tpu.memory_space<vmem>>, vector<16x32xf32>,
    %c0_22 = arith.constant 0 : index
    %c0_23 = arith.constant 0 : index
    %32 = vector.load %arg7[%c0_22, %c0_23] : memref<16x1xf32, #tpu.memory_space<vmem>>, vector<16x1xf32>
    tpu.vector_store %arg7[%c0_22, %c0_23], %11 {strides = array<i32>} : memref<16x1xf32, #tpu.memory_space<vmem>>, vector<16x1xf32>,
    %c0_i32_24 = arith.constant 0 : i32
    %33 = arith.cmpi eq, %arg2, %c0_i32_24 : i32
    %34 = arith.extui %33 : i1 to i32
    %c0_i32_25 = arith.constant 0 : i32
    %35 = arith.cmpi ne, %34, %c0_i32_25 : i32
    scf.if %35 {
      %c0_26 = arith.constant 0 : index
      %c0_27 = arith.constant 0 : index
      %36 = vector.load %arg8[%c0_26, %c0_27] : memref<16x1xf32, #tpu.memory_space<vmem>>, vector<16x1xf32>
      %37 = tpu.reciprocal %36 {approx = true} : vector<16x1xf32> -> vector<16x1xf32>
      %c0_28 = arith.constant 0 : index
      %c0_29 = arith.constant 0 : index
      %38 = vector.load %arg9[%c0_28, %c0_29] : memref<16x32xf32, #tpu.memory_space<vmem>>, vector<16x32xf32>
      %39 = vector.broadcast %37 : vector<16x1xf32> to vector<16x32xf32>
      %40 = arith.mulf %38, %39 : vector<16x32xf32>
      %41 = arith.truncf %40 : vector<16x32xf32> to vector<16x32xbf16>
      %c0_30 = arith.constant 0 : index
      %c0_31 = arith.constant 0 : index
      %c0_32 = arith.constant 0 : index
      %42 = vector.load %arg6[%c0_30, %c0_31, %c0_32] : memref<1x16x32xbf16, #tpu.memory_space<vmem>>, vector<1x16x32xbf16>
      %43 = vector.shape_cast %42 : vector<1x16x32xbf16> to vector<16x32xbf16>
      %44 = vector.shape_cast %41 : vector<16x32xbf16> to vector<1x16x32xbf16>
      tpu.vector_store %arg6[%c0_30, %c0_31, %c0_32], %44 {strides = array<i32>} : memref<1x16x32xbf16, #tpu.memory_space<vmem>>, vector<1x16x32xbf16>,
    } else {
    }
    return
  }
  func.func @transform_0(%arg0: i32, %arg1: i32, %arg2: i32) -> (i32, i32, i32) {
    %c0_i32 = arith.constant 0 : i32
    %c0_i32_0 = arith.constant 0 : i32
    return %arg0, %arg1, %c0_i32 : i32, i32, i32
  }
  func.func @transform_1(%arg0: i32, %arg1: i32, %arg2: i32) -> (i32, i32, i32) {
    %c0_i32 = arith.constant 0 : i32
    %c0_i32_0 = arith.constant 0 : i32
    return %arg0, %arg2, %c0_i32 : i32, i32, i32
  }
  func.func @transform_2(%arg0: i32, %arg1: i32, %arg2: i32) -> (i32, i32, i32) {
    %c0_i32 = arith.constant 0 : i32
    %c0_i32_0 = arith.constant 0 : i32
    return %arg0, %arg2, %c0_i32 : i32, i32, i32
  }
  func.func @transform_3(%arg0: i32, %arg1: i32, %arg2: i32) -> (i32, i32, i32) {
    %c0_i32 = arith.constant 0 : i32
    %c0_i32_0 = arith.constant 0 : i32
    return %arg0, %arg1, %c0_i32 : i32, i32, i32
  }
}

module attributes {stable_mosaic.version = 11 : i64} {
  func.func @_phi_kernel(%arg0: i32, %arg1: memref<32x256xbf16, #tpu.memory_space<vmem>>, %arg2: memref<32x128xbf16, #tpu.memory_space<vmem>>, %arg3: memref<256x256xbf16, #tpu.memory_space<vmem>>, %arg4: memref<128x256xbf16, #tpu.memory_space<vmem>>, %arg5: memref<1x256xf32, #tpu.memory_space<vmem>>, %arg6: memref<32x256xf32, #tpu.memory_space<vmem>>) attributes {dimension_semantics = [#tpu.dimension_semantics<parallel>], iteration_bounds = array<i64: 1>, scalar_prefetch = 0 : i64, scratch_operands = 0 : i64, tpu.core_type = #tpu.core_type<tc>, window_params = [{transform_indices = @transform_0, window_bounds = array<i64: 32, 256>}, {transform_indices = @transform_1, window_bounds = array<i64: 32, 128>}, {pipeline_mode = #tpu.pipeline_mode<synchronous>, transform_indices = @transform_2, window_bounds = array<i64: 256, 256>}, {pipeline_mode = #tpu.pipeline_mode<synchronous>, transform_indices = @transform_3, window_bounds = array<i64: 128, 256>}, {pipeline_mode = #tpu.pipeline_mode<synchronous>, transform_indices = @transform_4, window_bounds = array<i64: 1, 256>}, {transform_indices = @transform_5, window_bounds = array<i64: 32, 256>}]} {
    %c0 = arith.constant 0 : index
    %c0_0 = arith.constant 0 : index
    %0 = vector.load %arg1[%c0, %c0_0] : memref<32x256xbf16, #tpu.memory_space<vmem>>, vector<32x256xbf16>
    %c0_1 = arith.constant 0 : index
    %c0_2 = arith.constant 0 : index
    %1 = vector.load %arg3[%c0_1, %c0_2] : memref<256x256xbf16, #tpu.memory_space<vmem>>, vector<256x256xbf16>
    %cst = arith.constant dense<0.000000e+00> : vector<32x256xf32>
    %2 = tpu.matmul %0, %1, %cst {dimension_numbers = #tpu.dot_dimension_numbers<[1], [0], [0], [1], [0, 0, 1, 1], [], []>} : vector<32x256xbf16>, vector<256x256xbf16>, vector<32x256xf32> -> vector<32x256xf32>
    %c0_3 = arith.constant 0 : index
    %c0_4 = arith.constant 0 : index
    %3 = vector.load %arg2[%c0_3, %c0_4] : memref<32x128xbf16, #tpu.memory_space<vmem>>, vector<32x128xbf16>
    %c0_5 = arith.constant 0 : index
    %c0_6 = arith.constant 0 : index
    %4 = vector.load %arg4[%c0_5, %c0_6] : memref<128x256xbf16, #tpu.memory_space<vmem>>, vector<128x256xbf16>
    %cst_7 = arith.constant dense<0.000000e+00> : vector<32x256xf32>
    %5 = tpu.matmul %3, %4, %cst_7 {dimension_numbers = #tpu.dot_dimension_numbers<[1], [0], [0], [1], [0, 0, 1, 1], [], []>} : vector<32x128xbf16>, vector<128x256xbf16>, vector<32x256xf32> -> vector<32x256xf32>
    %6 = arith.addf %2, %5 : vector<32x256xf32>
    %c0_8 = arith.constant 0 : index
    %c0_9 = arith.constant 0 : index
    %7 = vector.load %arg5[%c0_8, %c0_9] : memref<1x256xf32, #tpu.memory_space<vmem>>, vector<1x256xf32>
    %8 = vector.broadcast %7 : vector<1x256xf32> to vector<32x256xf32>
    %9 = arith.addf %6, %8 : vector<32x256xf32>
    %c0_10 = arith.constant 0 : index
    %c0_11 = arith.constant 0 : index
    %10 = vector.load %arg6[%c0_10, %c0_11] : memref<32x256xf32, #tpu.memory_space<vmem>>, vector<32x256xf32>
    tpu.vector_store %arg6[%c0_10, %c0_11], %9 {strides = array<i32>} : memref<32x256xf32, #tpu.memory_space<vmem>>, vector<32x256xf32>,
    return
  }
  func.func @transform_0(%arg0: i32) -> (i32, i32) {
    %c0_i32 = arith.constant 0 : i32
    %c0_i32_0 = arith.constant 0 : i32
    return %arg0, %c0_i32 : i32, i32
  }
  func.func @transform_1(%arg0: i32) -> (i32, i32) {
    %c0_i32 = arith.constant 0 : i32
    %c0_i32_0 = arith.constant 0 : i32
    return %arg0, %c0_i32 : i32, i32
  }
  func.func @transform_2(%arg0: i32) -> (i32, i32) {
    %c0_i32 = arith.constant 0 : i32
    %c0_i32_0 = arith.constant 0 : i32
    %c0_i32_1 = arith.constant 0 : i32
    return %c0_i32, %c0_i32_0 : i32, i32
  }
  func.func @transform_3(%arg0: i32) -> (i32, i32) {
    %c0_i32 = arith.constant 0 : i32
    %c0_i32_0 = arith.constant 0 : i32
    %c0_i32_1 = arith.constant 0 : i32
    return %c0_i32, %c0_i32_0 : i32, i32
  }
  func.func @transform_4(%arg0: i32) -> (i32, i32) {
    %c0_i32 = arith.constant 0 : i32
    %c0_i32_0 = arith.constant 0 : i32
    %c0_i32_1 = arith.constant 0 : i32
    return %c0_i32, %c0_i32_0 : i32, i32
  }
  func.func @transform_5(%arg0: i32) -> (i32, i32) {
    %c0_i32 = arith.constant 0 : i32
    %c0_i32_0 = arith.constant 0 : i32
    return %arg0, %c0_i32 : i32, i32
  }
}

module attributes {stable_mosaic.version = 11 : i64} {
  func.func @_ln_head_kernel(%arg0: i32, %arg1: memref<32x256xf32, #tpu.memory_space<vmem>>, %arg2: memref<32x256xf32, #tpu.memory_space<vmem>>, %arg3: memref<1x256xf32, #tpu.memory_space<vmem>>, %arg4: memref<1x256xf32, #tpu.memory_space<vmem>>, %arg5: memref<1x256xf32, #tpu.memory_space<vmem>>, %arg6: memref<1x256xf32, #tpu.memory_space<vmem>>, %arg7: memref<256x128xbf16, #tpu.memory_space<vmem>>, %arg8: memref<1x128xf32, #tpu.memory_space<vmem>>, %arg9: memref<32x128xf32, #tpu.memory_space<vmem>>) attributes {dimension_semantics = [#tpu.dimension_semantics<parallel>], iteration_bounds = array<i64: 1>, scalar_prefetch = 0 : i64, scratch_operands = 0 : i64, tpu.core_type = #tpu.core_type<tc>, window_params = [{transform_indices = @transform_0, window_bounds = array<i64: 32, 256>}, {transform_indices = @transform_1, window_bounds = array<i64: 32, 256>}, {pipeline_mode = #tpu.pipeline_mode<synchronous>, transform_indices = @transform_2, window_bounds = array<i64: 1, 256>}, {pipeline_mode = #tpu.pipeline_mode<synchronous>, transform_indices = @transform_3, window_bounds = array<i64: 1, 256>}, {pipeline_mode = #tpu.pipeline_mode<synchronous>, transform_indices = @transform_4, window_bounds = array<i64: 1, 256>}, {pipeline_mode = #tpu.pipeline_mode<synchronous>, transform_indices = @transform_5, window_bounds = array<i64: 1, 256>}, {pipeline_mode = #tpu.pipeline_mode<synchronous>, transform_indices = @transform_6, window_bounds = array<i64: 256, 128>}, {pipeline_mode = #tpu.pipeline_mode<synchronous>, transform_indices = @transform_7, window_bounds = array<i64: 1, 128>}, {transform_indices = @transform_8, window_bounds = array<i64: 32, 128>}]} {
    %c0 = arith.constant 0 : index
    %c0_0 = arith.constant 0 : index
    %0 = vector.load %arg1[%c0, %c0_0] : memref<32x256xf32, #tpu.memory_space<vmem>>, vector<32x256xf32>
    %c0_1 = arith.constant 0 : index
    %c0_2 = arith.constant 0 : index
    %1 = vector.load %arg3[%c0_1, %c0_2] : memref<1x256xf32, #tpu.memory_space<vmem>>, vector<1x256xf32>
    %c0_3 = arith.constant 0 : index
    %c0_4 = arith.constant 0 : index
    %2 = vector.load %arg4[%c0_3, %c0_4] : memref<1x256xf32, #tpu.memory_space<vmem>>, vector<1x256xf32>
    %cst = arith.constant dense<0.000000e+00> : vector<32xf32>
    %3 = vector.multi_reduction <add>, %0, %cst [1] : vector<32x256xf32> to vector<32xf32>
    %4 = vector.shape_cast %3 : vector<32xf32> to vector<32x1xf32>
    %cst_5 = arith.constant 2.560000e+02 : f32
    %5 = vector.broadcast %cst_5 : f32 to vector<32x1xf32>
    %6 = arith.divf %4, %5 : vector<32x1xf32>
    %7 = vector.broadcast %6 : vector<32x1xf32> to vector<32x256xf32>
    %8 = arith.subf %0, %7 : vector<32x256xf32>
    %9 = arith.mulf %8, %8 : vector<32x256xf32>
    %cst_6 = arith.constant dense<0.000000e+00> : vector<32xf32>
    %10 = vector.multi_reduction <add>, %9, %cst_6 [1] : vector<32x256xf32> to vector<32xf32>
    %11 = vector.shape_cast %10 : vector<32xf32> to vector<32x1xf32>
    %cst_7 = arith.constant 2.560000e+02 : f32
    %12 = vector.broadcast %cst_7 : f32 to vector<32x1xf32>
    %13 = arith.divf %11, %12 : vector<32x1xf32>
    %cst_8 = arith.constant 9.99999974E-6 : f32
    %14 = vector.broadcast %cst_8 : f32 to vector<32x1xf32>
    %15 = arith.addf %13, %14 : vector<32x1xf32>
    %16 = math.rsqrt %15 : vector<32x1xf32>
    %17 = vector.broadcast %16 : vector<32x1xf32> to vector<32x256xf32>
    %18 = arith.mulf %8, %17 : vector<32x256xf32>
    %19 = vector.broadcast %1 : vector<1x256xf32> to vector<32x256xf32>
    %20 = arith.mulf %18, %19 : vector<32x256xf32>
    %21 = vector.broadcast %2 : vector<1x256xf32> to vector<32x256xf32>
    %22 = arith.addf %20, %21 : vector<32x256xf32>
    %c0_9 = arith.constant 0 : index
    %c0_10 = arith.constant 0 : index
    %23 = vector.load %arg2[%c0_9, %c0_10] : memref<32x256xf32, #tpu.memory_space<vmem>>, vector<32x256xf32>
    %c0_11 = arith.constant 0 : index
    %c0_12 = arith.constant 0 : index
    %24 = vector.load %arg5[%c0_11, %c0_12] : memref<1x256xf32, #tpu.memory_space<vmem>>, vector<1x256xf32>
    %c0_13 = arith.constant 0 : index
    %c0_14 = arith.constant 0 : index
    %25 = vector.load %arg6[%c0_13, %c0_14] : memref<1x256xf32, #tpu.memory_space<vmem>>, vector<1x256xf32>
    %cst_15 = arith.constant dense<0.000000e+00> : vector<32xf32>
    %26 = vector.multi_reduction <add>, %23, %cst_15 [1] : vector<32x256xf32> to vector<32xf32>
    %27 = vector.shape_cast %26 : vector<32xf32> to vector<32x1xf32>
    %cst_16 = arith.constant 2.560000e+02 : f32
    %28 = vector.broadcast %cst_16 : f32 to vector<32x1xf32>
    %29 = arith.divf %27, %28 : vector<32x1xf32>
    %30 = vector.broadcast %29 : vector<32x1xf32> to vector<32x256xf32>
    %31 = arith.subf %23, %30 : vector<32x256xf32>
    %32 = arith.mulf %31, %31 : vector<32x256xf32>
    %cst_17 = arith.constant dense<0.000000e+00> : vector<32xf32>
    %33 = vector.multi_reduction <add>, %32, %cst_17 [1] : vector<32x256xf32> to vector<32xf32>
    %34 = vector.shape_cast %33 : vector<32xf32> to vector<32x1xf32>
    %cst_18 = arith.constant 2.560000e+02 : f32
    %35 = vector.broadcast %cst_18 : f32 to vector<32x1xf32>
    %36 = arith.divf %34, %35 : vector<32x1xf32>
    %cst_19 = arith.constant 9.99999974E-6 : f32
    %37 = vector.broadcast %cst_19 : f32 to vector<32x1xf32>
    %38 = arith.addf %36, %37 : vector<32x1xf32>
    %39 = math.rsqrt %38 : vector<32x1xf32>
    %40 = vector.broadcast %39 : vector<32x1xf32> to vector<32x256xf32>
    %41 = arith.mulf %31, %40 : vector<32x256xf32>
    %42 = vector.broadcast %24 : vector<1x256xf32> to vector<32x256xf32>
    %43 = arith.mulf %41, %42 : vector<32x256xf32>
    %44 = vector.broadcast %25 : vector<1x256xf32> to vector<32x256xf32>
    %45 = arith.addf %43, %44 : vector<32x256xf32>
    %46 = arith.addf %22, %45 : vector<32x256xf32>
    %47 = arith.truncf %46 : vector<32x256xf32> to vector<32x256xbf16>
    %c0_20 = arith.constant 0 : index
    %c0_21 = arith.constant 0 : index
    %48 = vector.load %arg7[%c0_20, %c0_21] : memref<256x128xbf16, #tpu.memory_space<vmem>>, vector<256x128xbf16>
    %cst_22 = arith.constant dense<0.000000e+00> : vector<32x128xf32>
    %49 = tpu.matmul %47, %48, %cst_22 {dimension_numbers = #tpu.dot_dimension_numbers<[1], [0], [0], [1], [0, 0, 1, 1], [], []>} : vector<32x256xbf16>, vector<256x128xbf16>, vector<32x128xf32> -> vector<32x128xf32>
    %c0_23 = arith.constant 0 : index
    %c0_24 = arith.constant 0 : index
    %50 = vector.load %arg8[%c0_23, %c0_24] : memref<1x128xf32, #tpu.memory_space<vmem>>, vector<1x128xf32>
    %51 = vector.broadcast %50 : vector<1x128xf32> to vector<32x128xf32>
    %52 = arith.addf %49, %51 : vector<32x128xf32>
    %c0_25 = arith.constant 0 : index
    %c0_26 = arith.constant 0 : index
    %53 = vector.load %arg9[%c0_25, %c0_26] : memref<32x128xf32, #tpu.memory_space<vmem>>, vector<32x128xf32>
    tpu.vector_store %arg9[%c0_25, %c0_26], %52 {strides = array<i32>} : memref<32x128xf32, #tpu.memory_space<vmem>>, vector<32x128xf32>,
    return
  }
  func.func @transform_0(%arg0: i32) -> (i32, i32) {
    %c0_i32 = arith.constant 0 : i32
    %c0_i32_0 = arith.constant 0 : i32
    return %arg0, %c0_i32 : i32, i32
  }
  func.func @transform_1(%arg0: i32) -> (i32, i32) {
    %c0_i32 = arith.constant 0 : i32
    %c0_i32_0 = arith.constant 0 : i32
    return %arg0, %c0_i32 : i32, i32
  }
  func.func @transform_2(%arg0: i32) -> (i32, i32) {
    %c0_i32 = arith.constant 0 : i32
    %c0_i32_0 = arith.constant 0 : i32
    %c0_i32_1 = arith.constant 0 : i32
    return %c0_i32, %c0_i32_0 : i32, i32
  }
  func.func @transform_3(%arg0: i32) -> (i32, i32) {
    %c0_i32 = arith.constant 0 : i32
    %c0_i32_0 = arith.constant 0 : i32
    %c0_i32_1 = arith.constant 0 : i32
    return %c0_i32, %c0_i32_0 : i32, i32
  }
  func.func @transform_4(%arg0: i32) -> (i32, i32) {
    %c0_i32 = arith.constant 0 : i32
    %c0_i32_0 = arith.constant 0 : i32
    %c0_i32_1 = arith.constant 0 : i32
    return %c0_i32, %c0_i32_0 : i32, i32
  }
  func.func @transform_5(%arg0: i32) -> (i32, i32) {
    %c0_i32 = arith.constant 0 : i32
    %c0_i32_0 = arith.constant 0 : i32
    %c0_i32_1 = arith.constant 0 : i32
    return %c0_i32, %c0_i32_0 : i32, i32
  }
  func.func @transform_6(%arg0: i32) -> (i32, i32) {
    %c0_i32 = arith.constant 0 : i32
    %c0_i32_0 = arith.constant 0 : i32
    %c0_i32_1 = arith.constant 0 : i32
    return %c0_i32, %c0_i32_0 : i32, i32
  }
  func.func @transform_7(%arg0: i32) -> (i32, i32) {
    %c0_i32 = arith.constant 0 : i32
    %c0_i32_0 = arith.constant 0 : i32
    %c0_i32_1 = arith.constant 0 : i32
    return %c0_i32, %c0_i32_0 : i32, i32
  }
  func.func @transform_8(%arg0: i32) -> (i32, i32) {
    %c0_i32 = arith.constant 0 : i32
    %c0_i32_0 = arith.constant 0 : i32
    return %arg0, %c0_i32 : i32, i32
  }
}

</mosaic_0001>

<bundles_post_ra>
// kernel: dual_yolo_forward.16
= control target key start
LH: loop header
LB: loop body
LE: loop exit
PB: predicated region body
PF: predicated region fallthrough
CT: control target
= control target key end

     0   :  { %s3345_s1 = inlined_call_operand.vmem [shape: bf16[128,128], index: 1, kind: input, shape index: {}]   ;;  %s3346_s0 = inlined_call_operand.vmem [shape: bf16[512,128], index: 0, kind: input, shape index: {}]   ;;  %s3347_s2 = inlined_call_operand.vmem [shape: f32[1,128], index: 2, kind: input, shape index: {}]   ;;  %s3348_s3 = inlined_call_operand.vmem [shape: bf16[512,128], index: 3, kind: output, shape index: {}]  }
   0x1   :  { %v2354_v0 = vld [vmem:[%s3345_s1] sm:$0xff]   ;;  %v2355_v1 = vld [vmem:[%s3345_s1 + $0x8] sm:$0xff]   ;;  %v2356_v2 = vld [vmem:[%s3345_s1 + $0x10] sm:$0xff]  }
   0x2   :  { %2258 = vmatprep.subr.bf16.mxu0 %v2354_v0  ;;  %2338 = vmatprep.subr.bf16.mxu1 %v2354_v0  ;;  %v2357_v3 = vld [vmem:[%s3345_s1 + $0x18] sm:$0xff]   ;;  %v2362_v4 = vld [vmem:[%s3346_s0] sm:$0xff]   ;;  %v2359_v7 = vld [vmem:[%s3345_s1 + $0x28] sm:$0xff]  }
   0x3   :  { %2259 = vmatpush3.bf16.msra.mxu0 %v2354_v0  ;;  %2346 = vmatpush3.bf16.msra.mxu1 %v2354_v0  ;;  %v2363_v5 = vld [vmem:[%s3346_s0 + $0x80] sm:$0xff]   ;;  %v2360_v8 = vld [vmem:[%s3345_s1 + $0x30] sm:$0xff]   ;;  %v2361_v9 = vld [vmem:[%s3345_s1 + $0x38] sm:$0xff]  }
   0x4   :  { %2260 = vmatprep.subr.bf16.mxu0 %v2355_v1  ;;  %2339 = vmatprep.subr.bf16.mxu1 %v2355_v1  ;;  %v2358_v6 = vld [vmem:[%s3345_s1 + $0x20] sm:$0xff]   ;;  %v2364_v10 = vld [vmem:[%s3346_s0 + $0x8] sm:$0xff]   ;;  %v2366_v12 = vld [vmem:[%s3346_s0 + $0x10] sm:$0xff]  }
   0x5   :  { %2274 = vmatprep.mubr.bf16.mxu0 %v2362_v4  ;;  %2306 = vmatprep.mubr.bf16.mxu1 %v2363_v5  ;;  %v2365_v11 = vld [vmem:[%s3346_s0 + $0x88] sm:$0xff]   ;;  %v2367_v13 = vld [vmem:[%s3346_s0 + $0x90] sm:$0xff]   ;;  %v2368_v14 = vld [vmem:[%s3346_s0 + $0x18] sm:$0xff]  }
   0x6   :  { %v2369_v15 = vld [vmem:[%s3346_s0 + $0x98] sm:$0xff]   ;;  %v2370_v16 = vld [vmem:[%s3346_s0 + $0x20] sm:$0xff]   ;;  %v2372_v18 = vld [vmem:[%s3346_s0 + $0x28] sm:$0xff]  }
   0x7   :  { %2261 = vmatpush3.bf16.msra.mxu0 %v2355_v1  ;;  %2347 = vmatpush3.bf16.msra.mxu1 %v2355_v1  ;;  %v2371_v17 = vld [vmem:[%s3346_s0 + $0xa0] sm:$0xff]   ;;  %v2373_v19 = vld [vmem:[%s3346_s0 + $0xa8] sm:$0xff]   ;;  %v2374_v20 = vld [vmem:[%s3346_s0 + $0x30] sm:$0xff]  }
   0x8   :  { %2262 = vmatprep.subr.bf16.mxu0 %v2356_v2  ;;  %2340 = vmatprep.subr.bf16.mxu1 %v2356_v2  ;;  %v2375_v21 = vld [vmem:[%s3346_s0 + $0xb0] sm:$0xff]   ;;  %v2376_v22 = vld [vmem:[%s3346_s0 + $0x38] sm:$0xff]   ;;  %v2378_v24 = vld [vmem:[%s3346_s0 + $0x40] sm:$0xff]  }
   0x9   :  { %v2377_v23 = vld [vmem:[%s3346_s0 + $0xb8] sm:$0xff]   ;;  %v2379_v25 = vld [vmem:[%s3346_s0 + $0xc0] sm:$0xff]   ;;  %v2380_v26 = vld [vmem:[%s3346_s0 + $0x48] sm:$0xff]  }
   0xa   :  { %v2381_v27 = vld [vmem:[%s3346_s0 + $0xc8] sm:$0xff]   ;;  %v2382_v28 = vld [vmem:[%s3346_s0 + $0x50] sm:$0xff]   ;;  %v2384_v30 = vld [vmem:[%s3346_s0 + $0x58] sm:$0xff]  }
   0xb   :  { %2263 = vmatpush3.bf16.msra.mxu0 %v2356_v2  ;;  %2348 = vmatpush3.bf16.msra.mxu1 %v2356_v2  ;;  %v2383_v29 = vld [vmem:[%s3346_s0 + $0xd0] sm:$0xff]   ;;  %v2385_v31 = vld [vmem:[%s3346_s0 + $0xd8] sm:$0xff]   ;;  %v2386_v32 = vld [vmem:[%s3346_s0 + $0x60] sm:$0xff]  }
   0xc   :  { %2264 = vmatprep.subr.bf16.mxu0 %v2357_v3  ;;  %2341 = vmatprep.subr.bf16.mxu1 %v2357_v3  ;;  %v2387_v33 = vld [vmem:[%s3346_s0 + $0xe0] sm:$0xff]   ;;  %v2388_v34 = vld [vmem:[%s3346_s0 + $0x68] sm:$0xff]   ;;  %v2390_v36 = vld [vmem:[%s3346_s0 + $0x70] sm:$0xff]  }
   0xd   :  { %v2389_v35 = vld [vmem:[%s3346_s0 + $0xe8] sm:$0xff]   ;;  %v2391_v37 = vld [vmem:[%s3346_s0 + $0xf0] sm:$0xff]   ;;  %v2392_v38 = vld [vmem:[%s3346_s0 + $0x78] sm:$0xff]  }
   0xe   :  { %v2393_v39 = vld [vmem:[%s3346_s0 + $0xf8] sm:$0xff]   ;;  %v2794_v40 = vld [vmem:[%s3347_s2] ss:$0 sm:$0xff] }
   0xf   :  { %2265 = vmatpush3.bf16.msra.mxu0 %v2357_v3  ;;  %2349 = vmatpush3.bf16.msra.mxu1 %v2357_v3 }
  0x10   :  { %2266 = vmatprep.subr.bf16.mxu0 %v2358_v6  ;;  %2342 = vmatprep.subr.bf16.mxu1 %v2358_v6 }
  0x13   :  { %2267 = vmatpush3.bf16.msra.mxu0 %v2358_v6  ;;  %2350 = vmatpush3.bf16.msra.mxu1 %v2358_v6 }
  0x14   :  { %2268 = vmatprep.subr.bf16.mxu0 %v2359_v7  ;;  %2343 = vmatprep.subr.bf16.mxu1 %v2359_v7 }
  0x17   :  { %2269 = vmatpush3.bf16.msra.mxu0 %v2359_v7  ;;  %2351 = vmatpush3.bf16.msra.mxu1 %v2359_v7 }
  0x18   :  { %2270 = vmatprep.subr.bf16.mxu0 %v2360_v8  ;;  %2344 = vmatprep.subr.bf16.mxu1 %v2360_v8 }
  0x1b   :  { %2271 = vmatpush3.bf16.msra.mxu0 %v2360_v8  ;;  %2352 = vmatpush3.bf16.msra.mxu1 %v2360_v8 }
  0x1c   :  { %2272 = vmatprep.subr.bf16.mxu0 %v2361_v9  ;;  %2345 = vmatprep.subr.bf16.mxu1 %v2361_v9 }
  0x1f   :  { %2273 = vmatpush3.bf16.msra.mxu0 %v2361_v9  ;;  %2353 = vmatpush3.bf16.msra.mxu1 %v2361_v9 }
  0x22   :  { %2275 = vmatmul.mubr.bf16.vlgmr.msra.gmra.mrb[0].mxu0 %v2364_v10  ;;  %2307 = vmatmul.mubr.bf16.vlgmr.msra.gmra.mrb[0].mxu1 %v2365_v11 }
  0x23   :  { %2278 = vmatprep.mubr.bf16.mxu0 %v2366_v12  ;;  %2310 = vmatprep.mubr.bf16.mxu1 %v2367_v13 }
  0x2a   :  { %2279 = vmatmul.mubr.bf16.gmra.mrb[4].mxu0 %v2368_v14  ;;  %2311 = vmatmul.mubr.bf16.gmra.mrb[4].mxu1 %v2369_v15 }
  0x2b   :  { %2282 = vmatprep.mubr.bf16.mxu0 %v2370_v16  ;;  %2314 = vmatprep.mubr.bf16.mxu1 %v2371_v17 }
  0x32   :  { %2283 = vmatmul.mubr.bf16.gmra.mrb[8].mxu0 %v2372_v18  ;;  %2315 = vmatmul.mubr.bf16.gmra.mrb[8].mxu1 %v2373_v19 }
  0x33   :  { %2286 = vmatprep.mubr.bf16.mxu0 %v2374_v20  ;;  %2318 = vmatprep.mubr.bf16.mxu1 %v2375_v21 }
  0x3a   :  { %2287 = vmatmul.mubr.bf16.gmra.mrb[12].mxu0 %v2376_v22  ;;  %2319 = vmatmul.mubr.bf16.gmra.mrb[12].mxu1 %v2377_v23 }
  0x3b   :  { %2290 = vmatprep.mubr.bf16.mxu0 %v2378_v24  ;;  %2322 = vmatprep.mubr.bf16.mxu1 %v2379_v25 }
  0x42   :  { %2291 = vmatmul.mubr.bf16.gmra.mrb[16].mxu0 %v2380_v26  ;;  %2323 = vmatmul.mubr.bf16.gmra.mrb[16].mxu1 %v2381_v27 }
  0x43   :  { %2294 = vmatprep.mubr.bf16.mxu0 %v2382_v28  ;;  %2326 = vmatprep.mubr.bf16.mxu1 %v2383_v29 }
  0x4a   :  { %2295 = vmatmul.mubr.bf16.gmra.mrb[20].mxu0 %v2384_v30  ;;  %2327 = vmatmul.mubr.bf16.gmra.mrb[20].mxu1 %v2385_v31 }
  0x4b   :  { %2298 = vmatprep.mubr.bf16.mxu0 %v2386_v32  ;;  %2330 = vmatprep.mubr.bf16.mxu1 %v2387_v33 }
  0x52   :  { %2299 = vmatmul.mubr.bf16.gmra.mrb[24].mxu0 %v2388_v34  ;;  %2331 = vmatmul.mubr.bf16.gmra.mrb[24].mxu1 %v2389_v35 }
  0x53   :  { %2302 = vmatprep.mubr.bf16.mxu0 %v2390_v36  ;;  %2334 = vmatprep.mubr.bf16.mxu1 %v2391_v37 }
  0x5a   :  { %2303 = vmatmul.mubr.bf16.gmra.mrb[28].mxu0 %v2392_v38  ;;  %2335 = vmatmul.mubr.bf16.gmra.mrb[28].mxu1 %v2393_v39 }
  0xf5   :  { %v2276_v41 = vpop.f32.mrb[0].mxu0  ;;  %v2308_v42 = vpop.f32.mrb[0].mxu1 }
  0xf6   :  { %v2797_v43 = vadd.f32 %v2276_v41, %v2794_v40  ;;  %v2800_v44 = vadd.f32 %v2308_v42, %v2794_v40  ;;  %v501_v45 = vpop.f32.mrb[1].mxu0  ;;  %v629_v46 = vpop.f32.mrb[1].mxu1 }
  0xf7   :  { %v2803_v47 = vadd.f32 %v2794_v40, %v501_v45  ;;  %v2806_v48 = vadd.f32 %v2794_v40, %v629_v46  ;;  %v2277_v49 = vpop.f32.mrb[2].mxu0  ;;  %v2309_v50 = vpop.f32.mrb[2].mxu1 }
  0xf8   :  { %v1837_v51 = vmul.f32 -1.442695, %v2797_v43  ;;  %v1869_v52 = vmul.f32 -1.442695, %v2800_v44  ;;  %v2811_v53 = vadd.f32 %v2277_v49, %v2794_v40  ;;  %v2814_v54 = vadd.f32 %v2309_v50, %v2794_v40  ;;  %v504_v55 = vpop.f32.mrb[3].mxu0  ;;  %v632_v56 = vpop.f32.mrb[3].mxu1 }
  0xf9   :  { %v1835_v57 = vmul.f32 -1.442695, %v2803_v47  ;;  %v1867_v58 = vmul.f32 -1.442695, %v2806_v48  ;;  %v2819_v59 = vadd.f32 %v2794_v40, %v504_v55  ;;  %v2822_v60 = vadd.f32 %v2794_v40, %v632_v56 }
  0xfa   :  { %2394 = vpow2.f32 %v1837_v51  ;;  %v1838_v61 = vmul.f32 -1.442695, %v2811_v53  ;;  %v1870_v62 = vmul.f32 -1.442695, %v2814_v54 }
  0xfb   :  { %2396 = vpow2.f32 %v1869_v52  ;;  %v1836_v63 = vmul.f32 -1.442695, %v2819_v59  ;;  %v1868_v0 = vmul.f32 -1.442695, %v2822_v60 }
  0xfc   :  { %2398 = vpow2.f32 %v1835_v57 }
  0xfd   :  { %2400 = vpow2.f32 %v1867_v58  ;;  %v2280_v1 = vpop.f32.mrb[4].mxu0  ;;  %v2312_v2 = vpop.f32.mrb[4].mxu1 }
  0xfe   :  { %2402 = vpow2.f32 %v1838_v61  ;;  %v2829_v3 = vadd.f32 %v2280_v1, %v2794_v40  ;;  %v2832_v4 = vadd.f32 %v2312_v2, %v2794_v40  ;;  %v517_v5 = vpop.f32.mrb[5].mxu0  ;;  %v645_v6 = vpop.f32.mrb[5].mxu1 }
  0xff   :  { %2404 = vpow2.f32 %v1870_v62  ;;  %v2835_v7 = vadd.f32 %v2794_v40, %v517_v5  ;;  %v2838_v8 = vadd.f32 %v2794_v40, %v645_v6  ;;  %v2281_v9 = vpop.f32.mrb[6].mxu0  ;;  %v2313_v10 = vpop.f32.mrb[6].mxu1 }
 0x100   :  { %2406 = vpow2.f32 %v1836_v63  ;;  %v1841_v11 = vmul.f32 -1.442695, %v2829_v3  ;;  %v1873_v12 = vmul.f32 -1.442695, %v2832_v4  ;;  %v2843_v13 = vadd.f32 %v2281_v9, %v2794_v40  ;;  %v520_v14 = vpop.f32.mrb[7].mxu0  ;;  %v648_v15 = vpop.f32.mrb[7].mxu1 }
 0x101   :  { %2408 = vpow2.f32 %v1868_v0  ;;  %v1839_v16 = vmul.f32 -1.442695, %v2835_v7  ;;  %v1871_v17 = vmul.f32 -1.442695, %v2838_v8  ;;  %v2849_v37 = vadd.f32 %v2313_v10, %v2794_v40 }
 0x102   :  { %2410 = vpow2.f32 %v1841_v11  ;;  %v1842_v18 = vmul.f32 -1.442695, %v2843_v13  ;;  %v2852_v42 = vadd.f32 %v2794_v40, %v520_v14  ;;  %v2856_v56 = vadd.f32 %v2794_v40, %v648_v15 }
 0x103   :  { %2412 = vpow2.f32 %v1873_v12  ;;  %v1874_v55 = vmul.f32 -1.442695, %v2849_v37 }
 0x104   :  { %v2395_v19 = vpop.eup %2394  ;;  %2414 = vpow2.f32 %v1839_v16  ;;  %v1840_v62 = vmul.f32 -1.442695, %v2852_v42 }
 0x105   :  { %v2397_v20 = vpop.eup %2396  ;;  %v1216_v21 = vadd.f32 1.0, %v2395_v19  ;;  %2416 = vpow2.f32 %v1871_v17  ;;  %v2284_v22 = vpop.f32.mrb[8].mxu0 }
 0x106   :  { %v2316_v23 = vpop.f32.mrb[8].mxu1  ;;  %v2399_v24 = vpop.eup %2398  ;;  %v1248_v25 = vadd.f32 1.0, %v2397_v20  ;;  %2418 = vpow2.f32 %v1842_v18  ;;  %v2860_v63 = vadd.f32 %v2284_v22, %v2794_v40 }
 0x107   :  { %v533_v26 = vpop.f32.mrb[9].mxu0  ;;  %v661_v27 = vpop.f32.mrb[9].mxu1  ;;  %2420 = vrcp.f32 %v1216_v21  ;;  %v1214_v29 = vadd.f32 1.0, %v2399_v24  ;;  %v2865_v6 = vadd.f32 %v2316_v23, %v2794_v40 }
 0x108   :  { %v2401_v28 = vpop.eup %2400  ;;  %v2285_v30 = vpop.f32.mrb[10].mxu0  ;;  %2422 = vrcp.f32 %v1248_v25  ;;  %v2868_v9 = vadd.f32 %v2794_v40, %v533_v26  ;;  %v2875_v15 = vadd.f32 %v2794_v40, %v661_v27  ;;  %v1872_v25 = vmul.f32 -1.442695, %v2856_v56 }
 0x109   :  { %v2317_v31 = vpop.f32.mrb[10].mxu1  ;;  %v2403_v32 = vpop.eup %2402  ;;  %v1246_v33 = vadd.f32 1.0, %v2401_v28  ;;  %2424 = vrcp.f32 %v1214_v29  ;;  %v2878_v16 = vadd.f32 %v2285_v30, %v2794_v40  ;;  %v1845_v27 = vmul.f32 -1.442695, %v2860_v63 }
 0x10a   :  { %v536_v34 = vpop.f32.mrb[11].mxu0  ;;  %v2405_v35 = vpop.eup %2404  ;;  %v1217_v36 = vadd.f32 1.0, %v2403_v32  ;;  %v2885_v21 = vadd.f32 %v2317_v31, %v2794_v40  ;;  %v1877_v28 = vmul.f32 -1.442695, %v2865_v6  ;;  %v1843_v30 = vmul.f32 -1.442695, %v2868_v9 }
 0x10b   :  { %v664_v38 = vpop.f32.mrb[11].mxu1  ;;  %v2407_v39 = vpop.eup %2406  ;;  %2426 = vrcp.f32 %v1246_v33  ;;  %v1249_v41 = vadd.f32 1.0, %v2405_v35  ;;  %v2888_v22 = vadd.f32 %v2794_v40, %v536_v34  ;;  %v1875_v31 = vmul.f32 -1.442695, %v2875_v15 }
 0x10c   :  { %v2409_v45 = vpop.eup %2408  ;;  %2428 = vrcp.f32 %v1217_v36  ;;  %v1215_v46 = vadd.f32 1.0, %v2407_v39  ;;  %v1846_v32 = vmul.f32 -1.442695, %v2878_v16  ;;  %v1878_v34 = vmul.f32 -1.442695, %v2885_v21 }
 0x10d   :  { %v2411_v49 = vpop.eup %2410  ;;  %2430 = vrcp.f32 %v1249_v41  ;;  %v1247_v50 = vadd.f32 1.0, %v2409_v45  ;;  %v2288_v57 = vpop.f32.mrb[12].mxu0  ;;  %v1844_v35 = vmul.f32 -1.442695, %v2888_v22  ;;  %v2901_v36 = vadd.f32 %v2794_v40, %v664_v38 }
 0x10e   :  { %v2413_v51 = vpop.eup %2412  ;;  %2432 = vrcp.f32 %v1215_v46  ;;  %v1220_v52 = vadd.f32 1.0, %v2411_v49  ;;  %v2320_v0 = vpop.f32.mrb[12].mxu1 }
 0x10f   :  { %v2415_v58 = vpop.eup %2414  ;;  %2434 = vrcp.f32 %v1247_v50  ;;  %v1252_v61 = vadd.f32 1.0, %v2413_v51  ;;  %v2862_v1 = vpop.f32.mrb[13].mxu0  ;;  %v2910_v50 = vadd.f32 %v2288_v57, %v2794_v40 }
 0x110   :  { %v2417_v2 = vpop.eup %2416  ;;  %2436 = vrcp.f32 %v1220_v52  ;;  %v1218_v5 = vadd.f32 1.0, %v2415_v58  ;;  %v2870_v10 = vpop.f32.mrb[13].mxu1 }
 0x111   :  { %v2872_v11 = vpop.f32.mrb[14].mxu0  ;;  %v2419_v12 = vpop.eup %2418  ;;  %2438 = vrcp.f32 %v1252_v61  ;;  %v1250_v14 = vadd.f32 1.0, %v2417_v2  ;;  %v2919_v61 = vadd.f32 %v2320_v0, %v2794_v40 }
 0x112   :  { %v2880_v17 = vpop.f32.mrb[14].mxu1  ;;  %v2882_v18 = vpop.f32.mrb[15].mxu0  ;;  %2440 = vrcp.f32 %v1218_v5  ;;  %v1221_v20 = vadd.f32 1.0, %v2419_v12 }
 0x113   :  { %v2421_v19 = vpop.eup %2420  ;;  %v2890_v23 = vpop.f32.mrb[15].mxu1  ;;  %2442 = vrcp.f32 %v1250_v14 }
 0x114   :  { %v2423_v24 = vpop.eup %2422  ;;  %2444 = vrcp.f32 %v1221_v20  ;;  %v1408_v46 = vmul.f32 %v2421_v19, %v2797_v43 }
 0x115   :  { %v2425_v26 = vpop.eup %2424  ;;  %2446 = vpow2.f32 %v1874_v55  ;;  %v2903_v39 = vpop.f32.mrb[16].mxu0  ;;  %v1440_v38 = vmul.f32 %v2423_v24, %v2800_v44 }
 0x116   :  { %v2427_v29 = vpop.eup %2426  ;;  %2448 = vpow2.f32 %v1840_v62  ;;  %v2905_v41 = vpop.f32.mrb[16].mxu1  ;;  %v1406_v57 = vmul.f32 %v2425_v26, %v2803_v47  ;;  %v1881_v26 = vmul.f32 -1.442695, %v2919_v61 }
 0x117   :  { %v2429_v33 = vpop.eup %2428  ;;  %2450 = vpow2.f32 %v1872_v25  ;;  %v2912_v51 = vpop.f32.mrb[17].mxu0  ;;  %v1438_v14 = vmul.f32 %v2427_v29, %v2806_v48 }
 0x118   :  { %v2431_v45 = vpop.eup %2430  ;;  %v1409_v49 = vmul.f32 %v2429_v33, %v2811_v53  ;;  %v2914_v52 = vpop.f32.mrb[17].mxu1  ;;  %2452 = vpow2.f32 %v1845_v27 }
 0x119   :  { %v2433_v55 = vpop.eup %2432  ;;  %v1441_v58 = vmul.f32 %v2431_v45, %v2814_v54  ;;  %v2921_v43 = vpop.f32.mrb[18].mxu0  ;;  %2454 = vpow2.f32 %v1877_v28 }
 0x11a   :  { %v2923_v53 = vpop.f32.mrb[18].mxu1  ;;  %v2435_v62 = vpop.eup %2434  ;;  %v2035_v2 = vpack.c.bf16 %v1409_v49, %v1408_v46  ;;  %v1407_v5 = vmul.f32 %v2433_v55, %v2819_v59  ;;  %2456 = vpow2.f32 %v1843_v30  ;;  %v1876_v59 = vmul.f32 -1.442695, %v2901_v36 }
 0x11b   :  { %v2927_v12 = vpop.f32.mrb[19].mxu0  ;;  %v2929_v44 = vpop.f32.mrb[19].mxu1  ;;  %v2115_v0 = vpack.c.bf16 %v1441_v58, %v1440_v38  ;;  %v1439_v19 = vmul.f32 %v2435_v62, %v2822_v60  ;;  %2458 = vpow2.f32 %v1875_v31  ;;  %v1849_v60 = vmul.f32 -1.442695, %v2910_v50 }
 0x11c   :  { %v2437_v54 = vpop.eup %2436  ;;  %2187 = vst [vmem:[%s3348_s3 + $0x8] sm:$0xff] %v2035_v2   ;;  %v2030_v47 = vpack.c.bf16 %v1407_v5, %v1406_v57  ;;  %2460 = vpow2.f32 %v1846_v32 }
 0x11d   :  { %v2933_v20 = vpop.eup %2438  ;;  %2203 = vst [vmem:[%s3348_s3 + $0x88] sm:$0xff] %v2115_v0   ;;  %v2110_v48 = vpack.c.bf16 %v1439_v19, %v1438_v14  ;;  %2462 = vpow2.f32 %v1878_v34  ;;  %v2954_v28 = vpop.f32.mrb[20].mxu0  ;;  %v1412_v31 = vmul.f32 %v2437_v54, %v2829_v3  ;;  %v2977_v54 = vadd.f32 %v2794_v40, %v2862_v1 }
 0x11e   :  { %v2939_v24 = vpop.eup %2440  ;;  %2031 = vst [vmem:[%s3348_s3] sm:$0xff] %v2030_v47   ;;  %2464 = vpow2.f32 %v1844_v35  ;;  %v2956_v29 = vpop.f32.mrb[20].mxu1  ;;  %v2981_v19 = vadd.f32 %v2794_v40, %v2870_v10  ;;  %v2989_v1 = vadd.f32 %v2880_v17, %v2794_v40 }
 0x11f   :  { %v2945_v25 = vpop.eup %2442  ;;  %2202 = vst [vmem:[%s3348_s3 + $0x80] sm:$0xff] %v2110_v48   ;;  %2466 = vpow2.f32 %v1876_v59  ;;  %v2960_v33 = vpop.f32.mrb[21].mxu0  ;;  %v2985_v48 = vadd.f32 %v2872_v11, %v2794_v40  ;;  %v2998_v11 = vadd.f32 %v2794_v40, %v2882_v18 }
 0x120   :  { %v2445_v27 = vpop.eup %2444  ;;  %v2962_v34 = vpop.f32.mrb[21].mxu1  ;;  %2468 = vpow2.f32 %v1849_v60 }
 0x121   :  { %v2447_v30 = vpop.eup %2446  ;;  %v1413_v32 = vmul.f32 %v2445_v27, %v2843_v13  ;;  %v2964_v49 = vpop.f32.mrb[22].mxu0  ;;  %2470 = vpow2.f32 %v1881_v26 }
 0x122   :  { %v2449_v45 = vpop.eup %2448  ;;  %v1253_v46 = vadd.f32 1.0, %v2447_v30  ;;  %v2966_v35 = vpop.f32.mrb[22].mxu1 }
 0x123   :  { %v2451_v55 = vpop.eup %2450  ;;  %v2045_v38 = vpack.c.bf16 %v1413_v32, %v1412_v31  ;;  %v1219_v58 = vadd.f32 1.0, %v2449_v45  ;;  %v2968_v62 = vpop.f32.mrb[23].mxu0  ;;  %v1847_v32 = vmul.f32 -1.442695, %v2977_v54 }
 0x124   :  { %v2970_v3 = vpop.f32.mrb[23].mxu1  ;;  %v2453_v13 = vpop.eup %2452  ;;  %2472 = vrcp.f32 %v1253_v46  ;;  %v1251_v57 = vadd.f32 1.0, %v2451_v55 }
 0x125   :  { %v2455_v2 = vpop.eup %2454  ;;  %2189 = vst [vmem:[%s3348_s3 + $0x18] sm:$0xff] %v2045_v38   ;;  %2474 = vrcp.f32 %v1219_v58  ;;  %v1224_v5 = vadd.f32 1.0, %v2453_v13  ;;  %v2991_v27 = vpop.f32.mrb[24].mxu0  ;;  %v1879_v38 = vmul.f32 -1.442695, %v2981_v19 }
 0x126   :  { %v2457_v14 = vpop.eup %2456  ;;  %2476 = vrcp.f32 %v1251_v57  ;;  %v1256_v0 = vadd.f32 1.0, %v2455_v2  ;;  %v2993_v30 = vpop.f32.mrb[24].mxu1 }
 0x127   :  { %v2459_v47 = vpop.eup %2458  ;;  %2478 = vrcp.f32 %v1224_v5  ;;  %v1222_v59 = vadd.f32 1.0, %v2457_v14  ;;  %v3000_v45 = vpop.f32.mrb[25].mxu0  ;;  %v1850_v5 = vmul.f32 -1.442695, %v2985_v48 }
 0x128   :  { %v2461_v60 = vpop.eup %2460  ;;  %2480 = vrcp.f32 %v1256_v0  ;;  %v1254_v26 = vadd.f32 1.0, %v2459_v47  ;;  %v3002_v46 = vpop.f32.mrb[25].mxu1 }
 0x129   :  { %v2463_v10 = vpop.eup %2462  ;;  %2482 = vrcp.f32 %v1222_v59  ;;  %v1225_v31 = vadd.f32 1.0, %v2461_v60  ;;  %v3005_v58 = vpop.f32.mrb[26].mxu0  ;;  %v1882_v59 = vmul.f32 -1.442695, %v2989_v1  ;;  %v3017_v60 = vadd.f32 %v2794_v40, %v2890_v23 }
 0x12a   :  { %v2465_v55 = vpop.eup %2464  ;;  %2484 = vrcp.f32 %v1254_v26  ;;  %v1257_v17 = vadd.f32 1.0, %v2463_v10  ;;  %v3007_v13 = vpop.f32.mrb[26].mxu1  ;;  %v3030_v23 = vadd.f32 %v2794_v40, %v2912_v51  ;;  %v3044_v51 = vadd.f32 %v2921_v43, %v2794_v40 }
 0x12b   :  { %3350 = vst [vmem:[#allocation3_spill] sm:$0xff] %v3007_v13  ;;  %v2467_v57 = vpop.eup %2466  ;;  %2486 = vrcp.f32 %v1225_v31  ;;  %v1223_v2 = vadd.f32 1.0, %v2465_v55  ;;  %v3010_v18 = vpop.f32.mrb[27].mxu0  ;;  %v1848_v31 = vmul.f32 -1.442695, %v2998_v11  ;;  %v3022_v55 = vadd.f32 %v2903_v39, %v2794_v40 }
 0x12c   :  { %3351 = vst [vmem:[#allocation4_spill] sm:$0xff] %v3010_v18  ;;  %v3012_v14 = vpop.f32.mrb[27].mxu1  ;;  %v2469_v0 = vpop.eup %2468  ;;  %2488 = vrcp.f32 %v1257_v17  ;;  %v1255_v47 = vadd.f32 1.0, %v2467_v57  ;;  %v3026_v17 = vadd.f32 %v2905_v41, %v2794_v40  ;;  %v3037_v39 = vadd.f32 %v2794_v40, %v2914_v52 }
 0x12d   :  { %3352 = vst [vmem:[#allocation5_spill] sm:$0xff] %v3012_v14  ;;  %v2471_v26 = vpop.eup %2470  ;;  %2490 = vrcp.f32 %v1223_v2  ;;  %v1228_v10 = vadd.f32 1.0, %v2469_v0  ;;  %v1444_v2 = vmul.f32 %v2933_v20, %v2832_v4  ;;  %v1410_v41 = vmul.f32 %v2939_v24, %v2835_v7  ;;  %v3046_v13 = vpop.f32.mrb[28].mxu0 }
 0x12e   :  { %v2473_v18 = vpop.eup %2472  ;;  %2492 = vrcp.f32 %v1255_v47  ;;  %v1260_v14 = vadd.f32 1.0, %v2471_v26  ;;  %3353 = vst [vmem:[#allocation6_spill] sm:$0xff] %v3037_v39  ;;  %v3048_v4 = vpop.f32.mrb[28].mxu1  ;;  %v1442_v52 = vmul.f32 %v2945_v25, %v2838_v8  ;;  %v1880_v43 = vmul.f32 -1.442695, %v3017_v60 }
 0x12f   :  { %v2475_v57 = vpop.eup %2474  ;;  %v1445_v0 = vmul.f32 %v2473_v18, %v2849_v37  ;;  %2494 = vrcp.f32 %v1228_v10  ;;  %v3053_v7 = vpop.f32.mrb[29].mxu0  ;;  %v3060_v10 = vadd.f32 %v2923_v53, %v2794_v40 }
 0x130   :  { %v2477_v47 = vpop.eup %2476  ;;  %v1411_v26 = vmul.f32 %v2475_v57, %v2852_v42  ;;  %2496 = vrcp.f32 %v1260_v14  ;;  %v3055_v42 = vpop.f32.mrb[29].mxu1 }
 0x131   :  { %v2479_v37 = vpop.eup %2478  ;;  %v2125_v20 = vpack.c.bf16 %v1445_v0, %v1444_v2  ;;  %v1443_v18 = vmul.f32 %v2477_v47, %v2856_v56  ;;  %2498 = vpow2.f32 %v1847_v32  ;;  %v3062_v57 = vpop.f32.mrb[30].mxu0  ;;  %v1853_v32 = vmul.f32 -1.442695, %v3022_v55 }
 0x132   :  { %v2481_v24 = vpop.eup %2480  ;;  %v2040_v14 = vpack.c.bf16 %v1411_v26, %v1410_v41  ;;  %2500 = vpow2.f32 %v1879_v38  ;;  %3354 = vst [vmem:[#allocation7_spill] sm:$0xff] %v3062_v57  ;;  %v3064_v8 = vpop.f32.mrb[30].mxu1  ;;  %v3072_v38 = vadd.f32 %v2794_v40, %v2927_v12  ;;  %v1885_v47 = vmul.f32 -1.442695, %v3026_v17 }
 0x133   :  { %3355 = vst [vmem:[#allocation8_spill] sm:$0xff] %v3064_v8  ;;  %v2483_v25 = vpop.eup %2482  ;;  %2205 = vst [vmem:[%s3348_s3 + $0x98] sm:$0xff] %v2125_v20   ;;  %v2120_v56 = vpack.c.bf16 %v1443_v18, %v1442_v52  ;;  %2502 = vpow2.f32 %v1850_v5  ;;  %v3074_v2 = vpop.f32.mrb[31].mxu0  ;;  %v1851_v12 = vmul.f32 -1.442695, %v3030_v23  ;;  %v1416_v20 = vmul.f32 %v2479_v37, %v2860_v63 }
 0x134   :  { %3356 = vst [vmem:[#allocation9_spill] sm:$0xff] %v3074_v2  ;;  %v3076_v53 = vpop.f32.mrb[31].mxu1  ;;  %v2485_v0 = vpop.eup %2484  ;;  %2188 = vst [vmem:[%s3348_s3 + $0x10] sm:$0xff] %v2040_v14   ;;  %2504 = vpow2.f32 %v1882_v59  ;;  %v1883_v5 = vmul.f32 -1.442695, %v3037_v39  ;;  %v1414_v8 = vmul.f32 %v2483_v25, %v2868_v9 }
 0x135   :  { %3357 = vst [vmem:[#allocation10_spill] sm:$0xff] %v3076_v53  ;;  %v2487_v41 = vpop.eup %2486  ;;  %2204 = vst [vmem:[%s3348_s3 + $0x90] sm:$0xff] %v2120_v56   ;;  %2506 = vpow2.f32 %v1848_v31  ;;  %v1854_v26 = vmul.f32 -1.442695, %v3044_v51  ;;  %v1886_v59 = vmul.f32 -1.442695, %v3060_v10  ;;  %v1448_v53 = vmul.f32 %v2481_v24, %v2865_v6 }
 0x136   :  { %v2489_v52 = vpop.eup %2488  ;;  %v1417_v18 = vmul.f32 %v2487_v41, %v2878_v16  ;;  %2508 = vpow2.f32 %v1880_v43  ;;  %v1852_v31 = vmul.f32 -1.442695, %v3072_v38  ;;  %v1446_v16 = vmul.f32 %v2485_v0, %v2875_v15 }
 0x137   :  { %v2491_v14 = vpop.eup %2490  ;;  %v1449_v56 = vmul.f32 %v2489_v52, %v2885_v21  ;;  %2510 = vpow2.f32 %v1853_v32 }
 0x138   :  { %v2493_v2 = vpop.eup %2492  ;;  %v2055_v57 = vpack.c.bf16 %v1417_v18, %v1416_v20  ;;  %v1415_v39 = vmul.f32 %v2491_v14, %v2888_v22  ;;  %2512 = vpow2.f32 %v1885_v47  ;;  %v3120_v20 = vadd.f32 %v2954_v28, %v2794_v40 }
 0x139   :  { %v3096_v63 = vpop.eup %2494  ;;  %v2135_v37 = vpack.c.bf16 %v1449_v56, %v1448_v53  ;;  %v1447_v43 = vmul.f32 %v2493_v2, %v2901_v36  ;;  %2514 = vpow2.f32 %v1851_v12  ;;  %v3124_v18 = vadd.f32 %v2956_v29, %v2794_v40 }
 0x13a   :  { %v3100_v6 = vpop.eup %2496  ;;  %2191 = vst [vmem:[%s3348_s3 + $0x28] sm:$0xff] %v2055_v57   ;;  %v2050_v21 = vpack.c.bf16 %v1415_v39, %v1414_v8  ;;  %2516 = vpow2.f32 %v1883_v5  ;;  %v3116_v5 = vadd.f32 %v2794_v40, %v2929_v44  ;;  %v3128_v56 = vadd.f32 %v2794_v40, %v2960_v33 }
 0x13b   :  { %v2499_v9 = vpop.eup %2498  ;;  %2207 = vst [vmem:[%s3348_s3 + $0xa8] sm:$0xff] %v2135_v37   ;;  %v2130_v22 = vpack.c.bf16 %v1447_v43, %v1446_v16  ;;  %2518 = vpow2.f32 %v1854_v26  ;;  %v3132_v44 = vadd.f32 %v2794_v40, %v2962_v34  ;;  %v3136_v28 = vadd.f32 %v2964_v49, %v2794_v40 }
 0x13c   :  { %v2501_v15 = vpop.eup %2500  ;;  %2190 = vst [vmem:[%s3348_s3 + $0x20] sm:$0xff] %v2050_v21   ;;  %v1226_v36 = vadd.f32 1.0, %v2499_v9  ;;  %2520 = vpow2.f32 %v1886_v59  ;;  %v3140_v29 = vadd.f32 %v2966_v35, %v2794_v40  ;;  %v3144_v33 = vadd.f32 %v2794_v40, %v2968_v62 }
 0x13d   :  { %v2503_v24 = vpop.eup %2502  ;;  %2206 = vst [vmem:[%s3348_s3 + $0xa0] sm:$0xff] %v2130_v22   ;;  %v1258_v39 = vadd.f32 1.0, %v2501_v15  ;;  %2522 = vpow2.f32 %v1852_v31  ;;  %v1884_v9 = vmul.f32 -1.442695, %v3116_v5  ;;  %v1857_v22 = vmul.f32 -1.442695, %v3120_v20 }
 0x13e   :  { %v2505_v57 = vpop.eup %2504  ;;  %2524 = vrcp.f32 %v1226_v36  ;;  %v1229_v8 = vadd.f32 1.0, %v2503_v24  ;;  %v1889_v35 = vmul.f32 -1.442695, %v3124_v18  ;;  %v1855_v36 = vmul.f32 -1.442695, %v3128_v56 }
 0x13f   :  { %v2507_v25 = vpop.eup %2506  ;;  %2526 = vrcp.f32 %v1258_v39  ;;  %v1261_v32 = vadd.f32 1.0, %v2505_v57  ;;  %v1887_v39 = vmul.f32 -1.442695, %v3132_v44  ;;  %v1858_v62 = vmul.f32 -1.442695, %v3136_v28 }
 0x140   :  { %v2509_v2 = vpop.eup %2508  ;;  %2528 = vrcp.f32 %v1229_v8  ;;  %v1227_v53 = vadd.f32 1.0, %v2507_v25  ;;  %v1890_v57 = vmul.f32 -1.442695, %v3140_v29  ;;  %v1856_v25 = vmul.f32 -1.442695, %v3144_v33 }
 0x141   :  { %v2511_v0 = vpop.eup %2510  ;;  %2530 = vrcp.f32 %v1261_v32  ;;  %v1259_v47 = vadd.f32 1.0, %v2509_v2  ;;  %v3156_v32 = vadd.f32 %v2794_v40, %v2970_v3  ;;  %v3160_v2 = vadd.f32 %v2991_v27, %v2794_v40 }
 0x142   :  { %v2513_v41 = vpop.eup %2512  ;;  %2532 = vrcp.f32 %v1227_v53  ;;  %v1232_v12 = vadd.f32 1.0, %v2511_v0  ;;  %v1420_v0 = vmul.f32 %v3096_v63, %v2910_v50  ;;  %v1452_v3 = vmul.f32 %v3100_v6, %v2919_v61 }
 0x143   :  { %v2515_v26 = vpop.eup %2514  ;;  %2534 = vrcp.f32 %v1259_v47  ;;  %v1264_v52 = vadd.f32 1.0, %v2513_v41  ;;  %v3167_v41 = vadd.f32 %v2993_v30, %v2794_v40  ;;  %v3174_v27 = vadd.f32 %v2794_v40, %v3000_v45 }
 0x144   :  { %v2517_v59 = vpop.eup %2516  ;;  %2536 = vrcp.f32 %v1232_v12  ;;  %v1230_v14 = vadd.f32 1.0, %v2515_v26 }
 0x145   :  { %v2519_v31 = vpop.eup %2518  ;;  %2538 = vrcp.f32 %v1264_v52  ;;  %v1262_v16 = vadd.f32 1.0, %v2517_v59 }
 0x146   :  { %v2521_v37 = vpop.eup %2520  ;;  %2540 = vrcp.f32 %v1230_v14  ;;  %v1233_v43 = vadd.f32 1.0, %v2519_v31 }
 0x147   :  { %v2523_v34 = vpop.eup %2522  ;;  %2542 = vrcp.f32 %v1262_v16  ;;  %v1265_v21 = vadd.f32 1.0, %v2521_v37  ;;  %v1893_v16 = vmul.f32 -1.442695, %v3167_v41  ;;  %v1859_v37 = vmul.f32 -1.442695, %v3174_v27 }
 0x148   :  { %v2525_v49 = vpop.eup %2524  ;;  %2544 = vrcp.f32 %v1233_v43  ;;  %v1231_v15 = vadd.f32 1.0, %v2523_v34 }
 0x149   :  { %v2527_v24 = vpop.eup %2526  ;;  %2546 = vrcp.f32 %v1265_v21  ;;  %v1418_v50 = vmul.f32 %v2525_v49, %v2977_v54  ;;  %v1888_v54 = vmul.f32 -1.442695, %v3156_v32 }
 0x14a   :  { %v2529_v8 = vpop.eup %2528  ;;  %2548 = vrcp.f32 %v1231_v15  ;;  %v1450_v59 = vmul.f32 %v2527_v24, %v2981_v19 }
 0x14b   :  { %v2531_v53 = vpop.eup %2530  ;;  %v1421_v47 = vmul.f32 %v2529_v8, %v2985_v48  ;;  %2550 = vpow2.f32 %v1884_v9 }
 0x14c   :  { %v2533_v12 = vpop.eup %2532  ;;  %v1453_v26 = vmul.f32 %v2531_v53, %v2989_v1  ;;  %2552 = vpow2.f32 %v1857_v22 }
 0x14d   :  { %v2535_v52 = vpop.eup %2534  ;;  %v2065_v48 = vpack.c.bf16 %v1421_v47, %v1420_v0  ;;  %v1419_v63 = vmul.f32 %v2533_v12, %v2998_v11  ;;  %2554 = vpow2.f32 %v1889_v35  ;;  %v3186_v11 = vadd.f32 %v2794_v40, %v3002_v46 }
 0x14e   :  { %v2537_v30 = vpop.eup %2536  ;;  %v2145_v14 = vpack.c.bf16 %v1453_v26, %v1452_v3  ;;  %v1451_v61 = vmul.f32 %v2535_v52, %v3017_v60  ;;  %2556 = vpow2.f32 %v1855_v36  ;;  %v1861_v60 = vmul.f32 -1.442695, %v3160_v2 }
 0x14f   :  { %v2539_v1 = vpop.eup %2538  ;;  %2193 = vst [vmem:[%s3348_s3 + $0x38] sm:$0xff] %v2065_v48   ;;  %v2060_v45 = vpack.c.bf16 %v1419_v63, %v1418_v50  ;;  %2558 = vpow2.f32 %v1887_v39  ;;  %v1424_v34 = vmul.f32 %v2537_v30, %v3022_v55  ;;  %v1891_v9 = vmul.f32 -1.442695, %v3186_v11  ;;  %v3358_v63 = vld [vmem:[#allocation3_spill] sm:$0xff] }
 0x150   :  { %v2541_v6 = vpop.eup %2540  ;;  %2209 = vst [vmem:[%s3348_s3 + $0xb8] sm:$0xff] %v2145_v14   ;;  %v2140_v19 = vpack.c.bf16 %v1451_v61, %v1450_v59  ;;  %2560 = vpow2.f32 %v1858_v62  ;;  %v1456_v49 = vmul.f32 %v2539_v1, %v3026_v17  ;;  %v3220_v52 = vadd.f32 %v3005_v58, %v2794_v40  ;;  %v3359_v59 = vld [vmem:[#allocation4_spill] sm:$0xff] }
 0x151   :  { %v3192_v31 = vpop.eup %2542  ;;  %2192 = vst [vmem:[%s3348_s3 + $0x30] sm:$0xff] %v2060_v45   ;;  %2562 = vpow2.f32 %v1890_v57  ;;  %v1422_v36 = vmul.f32 %v2541_v6, %v3030_v23  ;;  %v3224_v30 = vadd.f32 %v3358_v63, %v2794_v40  ;;  %v3228_v14 = vadd.f32 %v2794_v40, %v3359_v59 }
 0x152   :  { %v2545_v46 = vpop.eup %2544  ;;  %2208 = vst [vmem:[%s3348_s3 + $0xb0] sm:$0xff] %v2140_v19   ;;  %2564 = vpow2.f32 %v1856_v25  ;;  %v1862_v19 = vmul.f32 -1.442695, %v3220_v52 }
 0x153   :  { %v2547_v43 = vpop.eup %2546  ;;  %v1425_v21 = vmul.f32 %v2545_v46, %v3044_v51  ;;  %2566 = vpow2.f32 %v1888_v54 }
 0x154   :  { %v2549_v22 = vpop.eup %2548  ;;  %v1457_v15 = vmul.f32 %v2547_v43, %v3060_v10  ;;  %2568 = vpow2.f32 %v1861_v60  ;;  %v3360_v60 = vld [vmem:[#allocation5_spill] sm:$0xff]  ;;  %v1894_v43 = vmul.f32 -1.442695, %v3224_v30 }
 0x155   :  { %v2551_v35 = vpop.eup %2550  ;;  %v2075_v24 = vpack.c.bf16 %v1425_v21, %v1424_v34  ;;  %v1423_v39 = vmul.f32 %v2549_v22, %v3072_v38  ;;  %2570 = vpow2.f32 %v1893_v16  ;;  %v3233_v16 = vadd.f32 %v2794_v40, %v3360_v60 }
 0x156   :  { %v2553_v62 = vpop.eup %2552  ;;  %v2155_v55 = vpack.c.bf16 %v1457_v15, %v1456_v49  ;;  %v1263_v57 = vadd.f32 1.0, %v2551_v35  ;;  %2572 = vpow2.f32 %v1859_v37  ;;  %v1860_v34 = vmul.f32 -1.442695, %v3228_v14 }
 0x157   :  { %v2555_v51 = vpop.eup %2554  ;;  %2195 = vst [vmem:[%s3348_s3 + $0x48] sm:$0xff] %v2075_v24   ;;  %v2070_v17 = vpack.c.bf16 %v1423_v39, %v1422_v36  ;;  %v1236_v8 = vadd.f32 1.0, %v2553_v62  ;;  %2574 = vpow2.f32 %v1891_v9  ;;  %v3239_v21 = vadd.f32 %v3046_v13, %v2794_v40  ;;  %v3361_v36 = vld [vmem:[#allocation6_spill] sm:$0xff]  ;;  %v3362_v39 = vld [vmem:[#allocation7_spill] sm:$0xff] }
 0x158   :  { %v2557_v10 = vpop.eup %2556  ;;  %2211 = vst [vmem:[%s3348_s3 + $0xc8] sm:$0xff] %v2155_v55   ;;  %2576 = vrcp.f32 %v1263_v57  ;;  %v1268_v23 = vadd.f32 1.0, %v2555_v51  ;;  %v3243_v22 = vadd.f32 %v3048_v4, %v2794_v40  ;;  %v3247_v49 = vadd.f32 %v2794_v40, %v3053_v7  ;;  %v3363_v55 = vld [vmem:[#allocation8_spill] sm:$0xff] }
 0x159   :  { %v2559_v38 = vpop.eup %2558  ;;  %2194 = vst [vmem:[%s3348_s3 + $0x40] sm:$0xff] %v2070_v17   ;;  %2578 = vrcp.f32 %v1236_v8  ;;  %v1234_v25 = vadd.f32 1.0, %v2557_v10  ;;  %v3251_v15 = vadd.f32 %v2794_v40, %v3055_v42  ;;  %v1454_v24 = vmul.f32 %v3192_v31, %v3361_v36  ;;  %v3364_v17 = vld [vmem:[#allocation9_spill] sm:$0xff] }
 0x15a   :  { %v2561_v53 = vpop.eup %2560  ;;  %2580 = vrcp.f32 %v1268_v23  ;;  %v1266_v0 = vadd.f32 1.0, %v2559_v38  ;;  %v3258_v62 = vadd.f32 %v3362_v39, %v2794_v40  ;;  %v1892_v7 = vmul.f32 -1.442695, %v3233_v16 }
 0x15b   :  { %v2563_v47 = vpop.eup %2562  ;;  %2582 = vrcp.f32 %v1234_v25  ;;  %v1237_v12 = vadd.f32 1.0, %v2561_v53  ;;  %v3263_v57 = vadd.f32 %v3363_v55, %v2794_v40  ;;  %v1865_v31 = vmul.f32 -1.442695, %v3239_v21 }
 0x15c   :  { %v2565_v3 = vpop.eup %2564  ;;  %2584 = vrcp.f32 %v1266_v0  ;;  %v1269_v26 = vadd.f32 1.0, %v2563_v47  ;;  %v1897_v23 = vmul.f32 -1.442695, %v3243_v22  ;;  %v1863_v38 = vmul.f32 -1.442695, %v3247_v49  ;;  %v3365_v0 = vld [vmem:[#allocation10_spill] sm:$0xff] }
 0x15d   :  { %v2567_v50 = vpop.eup %2566  ;;  %2586 = vrcp.f32 %v1237_v12  ;;  %v1235_v48 = vadd.f32 1.0, %v2565_v3  ;;  %v1895_v25 = vmul.f32 -1.442695, %v3251_v15  ;;  %v1866_v53 = vmul.f32 -1.442695, %v3258_v62 }
 0x15e   :  { %v2569_v61 = vpop.eup %2568  ;;  %2588 = vrcp.f32 %v1269_v26  ;;  %v1267_v1 = vadd.f32 1.0, %v2567_v50  ;;  %v1898_v50 = vmul.f32 -1.442695, %v3263_v57 }
 0x15f   :  { %v2571_v45 = vpop.eup %2570  ;;  %2590 = vrcp.f32 %v1235_v48  ;;  %v1240_v54 = vadd.f32 1.0, %v2569_v61 }
 0x160   :  { %v2573_v6 = vpop.eup %2572  ;;  %2592 = vrcp.f32 %v1267_v1  ;;  %v1272_v58 = vadd.f32 1.0, %v2571_v45 }
 0x161   :  { %v2575_v46 = vpop.eup %2574  ;;  %v1238_v37 = vadd.f32 1.0, %v2573_v6  ;;  %2594 = vrcp.f32 %v1240_v54 }
 0x162   :  { %v2577_v9 = vpop.eup %2576  ;;  %2596 = vrcp.f32 %v1272_v58 }
 0x163   :  { %v2579_v35 = vpop.eup %2578  ;;  %v1455_v13 = vmul.f32 %v2577_v9, %v3116_v5  ;;  %2598 = vrcp.f32 %v1238_v37  ;;  %v2650_v5 = vld [vmem:[%s3347_s2] ss:$0 sm:$0xff] }
 0x164   :  { %v2581_v4 = vpop.eup %2580  ;;  %2600 = vpow2.f32 %v1862_v19  ;;  %v3270_v8 = vadd.f32 %v2650_v5, %v3364_v17  ;;  %v3280_v47 = vadd.f32 %v2650_v5, %v3365_v0  ;;  %v1428_v3 = vmul.f32 %v2579_v35, %v3120_v20 }
 0x165   :  { %v2583_v42 = vpop.eup %2582  ;;  %v2150_v51 = vpack.c.bf16 %v1455_v13, %v1454_v24  ;;  %2602 = vpow2.f32 %v1894_v43  ;;  %v1460_v63 = vmul.f32 %v2581_v4, %v3124_v18 }
 0x166   :  { %v2585_v10 = vpop.eup %2584  ;;  %2604 = vpow2.f32 %v1860_v34  ;;  %v1864_v61 = vmul.f32 -1.442695, %v3270_v8  ;;  %v1426_v45 = vmul.f32 %v2583_v42, %v3128_v56 }
 0x167   :  { %v2587_v40 = vpop.eup %2586  ;;  %2210 = vst [vmem:[%s3348_s3 + $0xc0] sm:$0xff] %v2150_v51   ;;  %2606 = vpow2.f32 %v1892_v7  ;;  %v1458_v20 = vmul.f32 %v2585_v10, %v3132_v44  ;;  %v1270_v44 = vadd.f32 1.0, %v2575_v46 }
 0x168   :  { %v2589_v12 = vpop.eup %2588  ;;  %v1429_v26 = vmul.f32 %v2587_v40, %v3136_v28  ;;  %2608 = vpow2.f32 %v1865_v31 }
 0x169   :  { %v2591_v48 = vpop.eup %2590  ;;  %v1461_v59 = vmul.f32 %v2589_v12, %v3140_v29  ;;  %2610 = vpow2.f32 %v1897_v23  ;;  %v1896_v29 = vmul.f32 -1.442695, %v3280_v47 }
 0x16a   :  { %v2593_v1 = vpop.eup %2592  ;;  %v2085_v54 = vpack.c.bf16 %v1429_v26, %v1428_v3  ;;  %v1427_v6 = vmul.f32 %v2591_v48, %v3144_v33  ;;  %2612 = vpow2.f32 %v1863_v38 }
 0x16b   :  { %v2165_v28 = vpack.c.bf16 %v1461_v59, %v1460_v63  ;;  %v1459_v58 = vmul.f32 %v2593_v1, %v3156_v32  ;;  %v2595_v19 = vpop.eup %2594  ;;  %2614 = vpow2.f32 %v1895_v25 }
 0x16c   :  { %2197 = vst [vmem:[%s3348_s3 + $0x58] sm:$0xff] %v2085_v54   ;;  %v2080_v18 = vpack.c.bf16 %v1427_v6, %v1426_v45  ;;  %v2597_v56 = vpop.eup %2596  ;;  %2616 = vpow2.f32 %v1866_v53  ;;  %v1432_v3 = vmul.f32 %v2595_v19, %v3160_v2 }
 0x16d   :  { %2213 = vst [vmem:[%s3348_s3 + $0xd8] sm:$0xff] %v2165_v28   ;;  %v2160_v33 = vpack.c.bf16 %v1459_v58, %v1458_v20  ;;  %v2599_v60 = vpop.eup %2598  ;;  %2618 = vpow2.f32 %v1898_v50  ;;  %v1464_v48 = vmul.f32 %v2597_v56, %v3167_v41 }
 0x16e   :  { %2196 = vst [vmem:[%s3348_s3 + $0x50] sm:$0xff] %v2080_v18   ;;  %v2601_v32 = vpop.eup %2600  ;;  %2620 = vpow2.f32 %v1864_v61  ;;  %v1430_v61 = vmul.f32 %v2599_v60, %v3174_v27 }
 0x16f   :  { %2212 = vst [vmem:[%s3348_s3 + $0xd0] sm:$0xff] %v2160_v33   ;;  %v2603_v37 = vpop.eup %2602  ;;  %v1241_v43 = vadd.f32 1.0, %v2601_v32  ;;  %2622 = vpow2.f32 %v1896_v29 }
 0x170   :  { %v2605_v34 = vpop.eup %2604  ;;  %2624 = vrcp.f32 %v1270_v44  ;;  %v1273_v9 = vadd.f32 1.0, %v2603_v37 }
 0x171   :  { %v2607_v46 = vpop.eup %2606  ;;  %2626 = vrcp.f32 %v1241_v43  ;;  %v1239_v35 = vadd.f32 1.0, %v2605_v34 }
 0x172   :  { %v2609_v36 = vpop.eup %2608  ;;  %2628 = vrcp.f32 %v1273_v9  ;;  %v1271_v24 = vadd.f32 1.0, %v2607_v46 }
 0x173   :  { %v2611_v13 = vpop.eup %2610  ;;  %2630 = vrcp.f32 %v1239_v35  ;;  %v1244_v39 = vadd.f32 1.0, %v2609_v36 }
 0x174   :  { %v2613_v4 = vpop.eup %2612  ;;  %2632 = vrcp.f32 %v1271_v24  ;;  %v1276_v7 = vadd.f32 1.0, %v2611_v13 }
 0x175   :  { %v2615_v55 = vpop.eup %2614  ;;  %2634 = vrcp.f32 %v1244_v39  ;;  %v1242_v42 = vadd.f32 1.0, %v2613_v4 }
 0x176   :  { %v2617_v51 = vpop.eup %2616  ;;  %2636 = vrcp.f32 %v1276_v7  ;;  %v1274_v31 = vadd.f32 1.0, %v2615_v55 }
 0x177   :  { %v2619_v5 = vpop.eup %2618  ;;  %2638 = vrcp.f32 %v1242_v42  ;;  %v1245_v17 = vadd.f32 1.0, %v2617_v51 }
 0x178   :  { %v2621_v10 = vpop.eup %2620  ;;  %2640 = vrcp.f32 %v1274_v31  ;;  %v1277_v23 = vadd.f32 1.0, %v2619_v5 }
 0x179   :  { %v2623_v38 = vpop.eup %2622  ;;  %2642 = vrcp.f32 %v1245_v17  ;;  %v1243_v40 = vadd.f32 1.0, %v2621_v10 }
 0x17a   :  { %v2625_v25 = vpop.eup %2624  ;;  %2644 = vrcp.f32 %v1277_v23  ;;  %v1275_v53 = vadd.f32 1.0, %v2623_v38 }
 0x17b   :  { %v2627_v0 = vpop.eup %2626  ;;  %2646 = vrcp.f32 %v1243_v40  ;;  %v1462_v6 = vmul.f32 %v2625_v25, %v3186_v11 }
 0x17c   :  { %v2629_v12 = vpop.eup %2628  ;;  %v1433_v26 = vmul.f32 %v2627_v0, %v3220_v52  ;;  %2648 = vrcp.f32 %v1275_v53 }
 0x17d   :  { %v2631_v50 = vpop.eup %2630  ;;  %v1465_v63 = vmul.f32 %v2629_v12, %v3224_v30 }
 0x17e   :  { %v2633_v59 = vpop.eup %2632  ;;  %v2095_v1 = vpack.c.bf16 %v1433_v26, %v1432_v3  ;;  %v1431_v45 = vmul.f32 %v2631_v50, %v3228_v14 }
 0x17f   :  { %v2635_v54 = vpop.eup %2634  ;;  %v2175_v20 = vpack.c.bf16 %v1465_v63, %v1464_v48  ;;  %v1463_v2 = vmul.f32 %v2633_v59, %v3233_v16 }
 0x180   :  { %v2637_v28 = vpop.eup %2636  ;;  %2199 = vst [vmem:[%s3348_s3 + $0x68] sm:$0xff] %v2095_v1   ;;  %v2090_v41 = vpack.c.bf16 %v1431_v45, %v1430_v61  ;;  %v1436_v16 = vmul.f32 %v2635_v54, %v3239_v21 }
 0x181   :  { %v2639_v52 = vpop.eup %2638  ;;  %2215 = vst [vmem:[%s3348_s3 + $0xe8] sm:$0xff] %v2175_v20   ;;  %v2170_v27 = vpack.c.bf16 %v1463_v2, %v1462_v6  ;;  %v1468_v18 = vmul.f32 %v2637_v28, %v3243_v22 }
 0x182   :  { %v2641_v30 = vpop.eup %2640  ;;  %2198 = vst [vmem:[%s3348_s3 + $0x60] sm:$0xff] %v2090_v41   ;;  %v1434_v33 = vmul.f32 %v2639_v52, %v3247_v49 }
 0x183   :  { %v2643_v11 = vpop.eup %2642  ;;  %2214 = vst [vmem:[%s3348_s3 + $0xe0] sm:$0xff] %v2170_v27   ;;  %v1466_v32 = vmul.f32 %v2641_v30, %v3251_v15 }
 0x184   :  { %v2645_v14 = vpop.eup %2644  ;;  %v1437_v58 = vmul.f32 %v2643_v11, %v3258_v62 }
 0x185   :  { %v2647_v19 = vpop.eup %2646  ;;  %v1469_v29 = vmul.f32 %v2645_v14, %v3263_v57 }
 0x186   :  { %v2649_v56 = vpop.eup %2648  ;;  %v2105_v44 = vpack.c.bf16 %v1437_v58, %v1436_v16  ;;  %v1435_v60 = vmul.f32 %v2647_v19, %v3270_v8 }
 0x187   :  { %v2185_v37 = vpack.c.bf16 %v1469_v29, %v1468_v18  ;;  %v1467_v43 = vmul.f32 %v2649_v56, %v3280_v47 }
 0x188   :  { %2201 = vst [vmem:[%s3348_s3 + $0x78] sm:$0xff] %v2105_v44   ;;  %v2100_v21 = vpack.c.bf16 %v1435_v60, %v1434_v33 }
 0x189   :  { %2217 = vst [vmem:[%s3348_s3 + $0xf8] sm:$0xff] %v2185_v37   ;;  %v2180_v22 = vpack.c.bf16 %v1467_v43, %v1466_v32 }
 0x18a   :  { %2200 = vst [vmem:[%s3348_s3 + $0x70] sm:$0xff] %v2100_v21  }
 0x18b   :  { %2216 = vst [vmem:[%s3348_s3 + $0xf0] sm:$0xff] %v2180_v22  }

// kernel: dual_yolo_forward.17
= control target key start
LH: loop header
LB: loop body
LE: loop exit
PB: predicated region body
PF: predicated region fallthrough
CT: control target
= control target key end

     0   :  { %s1522_s1 = inlined_call_operand.vmem [shape: bf16[384,128], index: 1, kind: input, shape index: {}]   ;;  %s1523_s0 = inlined_call_operand.vmem [shape: bf16[128,384], index: 0, kind: input, shape index: {}]   ;;  %s1524_s2 = inlined_call_operand.vmem [shape: f32[1,128], index: 2, kind: input, shape index: {}]   ;;  %s1525_s3 = inlined_call_operand.vmem [shape: bf16[128,128], index: 3, kind: output, shape index: {}]  }
   0x1   :  { %v1123_v0 = vld [vmem:[%s1522_s1 + $0x40] sm:$0xff]   ;;  %v1126_v3 = vld [vmem:[%s1522_s1 + $0x48] sm:$0xff]   ;;  %v1129_v6 = vld [vmem:[%s1522_s1 + $0x50] sm:$0xff]  }
   0x2   :  { %v1124_v1 = vld [vmem:[%s1522_s1] sm:$0xff]   ;;  %1011 = vmatprep.subr.bf16.mxu0 %v1123_v0  ;;  %v1127_v4 = vld [vmem:[%s1522_s1 + $0x8] sm:$0xff]   ;;  %v1130_v7 = vld [vmem:[%s1522_s1 + $0x10] sm:$0xff]  }
   0x3   :  { %v1125_v2 = vld [vmem:[%s1522_s1 + $0x80] sm:$0xff]   ;;  %1012 = vmatpush3.bf16.msra.mxu0 %v1124_v1  ;;  %v1128_v5 = vld [vmem:[%s1522_s1 + $0x88] sm:$0xff]   ;;  %v1131_v8 = vld [vmem:[%s1522_s1 + $0x90] sm:$0xff]  }
   0x4   :  { %1091 = vmatprep.subr.bf16.mxu1 %v1125_v2  ;;  %1013 = vmatprep.subr.bf16.mxu0 %v1126_v3  ;;  %v1132_v9 = vld [vmem:[%s1522_s1 + $0x58] sm:$0xff]   ;;  %v1135_v12 = vld [vmem:[%s1522_s1 + $0x60] sm:$0xff]   ;;  %v1138_v15 = vld [vmem:[%s1522_s1 + $0x68] sm:$0xff]  }
   0x5   :  { %1092 = vmatpush3.bf16.msra.mxu1 %v1125_v2  ;;  %v1133_v10 = vld [vmem:[%s1522_s1 + $0x18] sm:$0xff]   ;;  %v1137_v13 = vld [vmem:[%s1522_s1 + $0xa0] sm:$0xff]   ;;  %v1140_v16 = vld [vmem:[%s1522_s1 + $0xa8] sm:$0xff]  }
   0x6   :  { %1093 = vmatprep.subr.bf16.mxu1 %v1128_v5  ;;  %v1134_v11 = vld [vmem:[%s1522_s1 + $0x98] sm:$0xff]   ;;  %v1136_v14 = vld [vmem:[%s1522_s1 + $0x20] sm:$0xff]   ;;  %v1139_v17 = vld [vmem:[%s1522_s1 + $0x28] sm:$0xff]  }
   0x7   :  { %1014 = vmatpush3.bf16.msra.mxu0 %v1127_v4  ;;  %v1141_v18 = vld [vmem:[%s1522_s1 + $0x70] sm:$0xff]   ;;  %v1144_v21 = vld [vmem:[%s1522_s1 + $0x78] sm:$0xff]   ;;  %v1147_v26 = vld [vmem:[%s1523_s0] ss:$12 sps:$4 sm:$0xff]  }
   0x8   :  { %1015 = vmatprep.subr.bf16.mxu0 %v1129_v6  ;;  %v1142_v19 = vld [vmem:[%s1522_s1 + $0x30] sm:$0xff]   ;;  %v1146_v22 = vld [vmem:[%s1522_s1 + $0xb8] sm:$0xff]   ;;  %v1151_v28 = vld [vmem:[%s1523_s0 + $0x20] ss:$12 sps:$4 sm:$0xff]  }
   0x9   :  { %1094 = vmatpush3.bf16.msra.mxu1 %v1128_v5  ;;  %v1143_v20 = vld [vmem:[%s1522_s1 + $0xb0] sm:$0xff]   ;;  %v1145_v25 = vld [vmem:[%s1522_s1 + $0x38] sm:$0xff]   ;;  %v1167_v36 = vld [vmem:[%s1523_s0 + $0x80] ss:$12 sps:$4 sm:$0xff]  }
   0xa   :  { %1095 = vmatprep.subr.bf16.mxu1 %v1131_v8  ;;  %v1149_v23 = vld [vmem:[%s1523_s0 + $0x4] ss:$12 sps:$4 sm:$0xff]   ;;  %v1150_v24 = vld [vmem:[%s1523_s0 + $0x8] ss:$12 sps:$4 sm:$0xff]   ;;  %v1160_v35 = vld [vmem:[%s1523_s0 + $0x4c] ss:$12 sps:$4 sm:$0xff]  }
   0xb   :  { %1016 = vmatpush3.bf16.msra.mxu0 %v1130_v7  ;;  %435 = vmatprep.mubr.bf16.mxu0 %v1149_v23  ;;  %v1152_v27 = vld [vmem:[%s1523_s0 + $0x1c] ss:$12 sps:$4 sm:$0xff]   ;;  %v1158_v29 = vld [vmem:[%s1523_s0 + $0x38] ss:$12 sps:$4 sm:$0xff]   ;;  %v1155_v31 = vld [vmem:[%s1523_s0 + $0x34] ss:$12 sps:$4 sm:$0xff]  }
   0xc   :  { %1017 = vmatprep.subr.bf16.mxu0 %v1132_v9  ;;  %1107 = vmatprep.mubr.bf16.mxu1 %v1150_v24  ;;  %v1154_v30 = vld [vmem:[%s1523_s0 + $0x18] ss:$12 sps:$4 sm:$0xff]   ;;  %v1159_v32 = vld [vmem:[%s1523_s0 + $0x50] ss:$12 sps:$4 sm:$0xff]   ;;  %v1166_v33 = vld [vmem:[%s1523_s0 + $0x68] ss:$12 sps:$4 sm:$0xff]  }
   0xd   :  { %1096 = vmatpush3.bf16.msra.mxu1 %v1131_v8  ;;  %v1157_v34 = vld [vmem:[%s1523_s0 + $0x30] ss:$12 sps:$4 sm:$0xff]   ;;  %v1174_v37 = vld [vmem:[%s1523_s0 + $0x98] ss:$12 sps:$4 sm:$0xff]   ;;  %v1162_v38 = vld [vmem:[%s1523_s0 + $0x48] ss:$12 sps:$4 sm:$0xff]  }
   0xe   :  { %1097 = vmatprep.subr.bf16.mxu1 %v1134_v11  ;;  %v1163_v39 = vld [vmem:[%s1523_s0 + $0x64] ss:$12 sps:$4 sm:$0xff]   ;;  %v1165_v41 = vld [vmem:[%s1523_s0 + $0x60] ss:$12 sps:$4 sm:$0xff]   ;;  %v1168_v42 = vld [vmem:[%s1523_s0 + $0x7c] ss:$12 sps:$4 sm:$0xff]  }
   0xf   :  { %1018 = vmatpush3.bf16.msra.mxu0 %v1133_v10  ;;  %v1175_v40 = vld [vmem:[%s1523_s0 + $0xb0] ss:$12 sps:$4 sm:$0xff]   ;;  %v1170_v43 = vld [vmem:[%s1523_s0 + $0x78] ss:$12 sps:$4 sm:$0xff]   ;;  %v1171_v44 = vld [vmem:[%s1523_s0 + $0x94] ss:$12 sps:$4 sm:$0xff]  }
  0x10   :  { %1019 = vmatprep.subr.bf16.mxu0 %v1135_v12  ;;  %v1173_v45 = vld [vmem:[%s1523_s0 + $0x90] ss:$12 sps:$4 sm:$0xff]   ;;  %v1176_v46 = vld [vmem:[%s1523_s0 + $0xac] ss:$12 sps:$4 sm:$0xff]   ;;  %v1178_v47 = vld [vmem:[%s1523_s0 + $0xa8] ss:$12 sps:$4 sm:$0xff]  }
  0x11   :  { %1098 = vmatpush3.bf16.msra.mxu1 %v1134_v11  ;;  %v1410_v55 = vld [vmem:[%s1524_s2] ss:$0 sm:$0xff] }
  0x12   :  { %1099 = vmatprep.subr.bf16.mxu1 %v1137_v13 }
  0x13   :  { %1020 = vmatpush3.bf16.msra.mxu0 %v1136_v14 }
  0x14   :  { %1021 = vmatprep.subr.bf16.mxu0 %v1138_v15 }
  0x15   :  { %1100 = vmatpush3.bf16.msra.mxu1 %v1137_v13 }
  0x16   :  { %1101 = vmatprep.subr.bf16.mxu1 %v1140_v16 }
  0x17   :  { %1022 = vmatpush3.bf16.msra.mxu0 %v1139_v17 }
  0x18   :  { %1023 = vmatprep.subr.bf16.mxu0 %v1141_v18 }
  0x19   :  { %1102 = vmatpush3.bf16.msra.mxu1 %v1140_v16 }
  0x1a   :  { %1103 = vmatprep.subr.bf16.mxu1 %v1143_v20 }
  0x1b   :  { %1024 = vmatpush3.bf16.msra.mxu0 %v1142_v19 }
  0x1c   :  { %1025 = vmatprep.subr.bf16.mxu0 %v1144_v21 }
  0x1d   :  { %1104 = vmatpush3.bf16.msra.mxu1 %v1143_v20 }
  0x1e   :  { %1105 = vmatprep.subr.bf16.mxu1 %v1146_v22 }
  0x1f   :  { %1026 = vmatpush3.bf16.msra.mxu0 %v1145_v25 }
  0x21   :  { %1106 = vmatpush3.bf16.msra.mxu1 %v1146_v22 }
  0x22   :  { %436 = vmatmul.mubr.bf16.vlgmr.msra.gmra.mrb[0].mxu0 %v1147_v26 }
  0x23   :  { %443 = vmatprep.mubr.bf16.mxu0 %v1152_v27 }
  0x24   :  { %1108 = vmatmul.mubr.bf16.vlgmr.msra.gmra.mrb[0].mxu1 %v1151_v28 }
  0x25   :  { %1111 = vmatprep.mubr.bf16.mxu1 %v1158_v29 }
  0x2a   :  { %444 = vmatmul.mubr.bf16.gmra.mrb[4].mxu0 %v1154_v30 }
  0x2b   :  { %451 = vmatprep.mubr.bf16.mxu0 %v1155_v31 }
  0x2c   :  { %1112 = vmatmul.mubr.bf16.gmra.mrb[4].mxu1 %v1159_v32 }
  0x2d   :  { %1115 = vmatprep.mubr.bf16.mxu1 %v1166_v33 }
  0x32   :  { %452 = vmatmul.mubr.bf16.gmra.mrb[8].mxu0 %v1157_v34 }
  0x33   :  { %459 = vmatprep.mubr.bf16.mxu0 %v1160_v35 }
  0x34   :  { %1116 = vmatmul.mubr.bf16.gmra.mrb[8].mxu1 %v1167_v36 }
  0x35   :  { %1119 = vmatprep.mubr.bf16.mxu1 %v1174_v37 }
  0x3a   :  { %460 = vmatmul.mubr.bf16.gmra.mrb[12].mxu0 %v1162_v38 }
  0x3b   :  { %467 = vmatprep.mubr.bf16.mxu0 %v1163_v39 }
  0x3c   :  { %1120 = vmatmul.mubr.bf16.gmra.mrb[12].mxu1 %v1175_v40 }
  0x42   :  { %468 = vmatmul.mubr.bf16.gmra.mrb[16].mxu0 %v1165_v41 }
  0x43   :  { %475 = vmatprep.mubr.bf16.mxu0 %v1168_v42 }
  0x4a   :  { %476 = vmatmul.mubr.bf16.gmra.mrb[20].mxu0 %v1170_v43 }
  0x4b   :  { %483 = vmatprep.mubr.bf16.mxu0 %v1171_v44 }
  0x52   :  { %484 = vmatmul.mubr.bf16.gmra.mrb[24].mxu0 %v1173_v45 }
  0x53   :  { %491 = vmatprep.mubr.bf16.mxu0 %v1176_v46 }
  0x5a   :  { %492 = vmatmul.mubr.bf16.gmra.mrb[28].mxu0 %v1178_v47 }
  0xf5   :  { %v1027_v48 = vpop.f32.mrb[0].mxu0 }
  0xf6   :  { %v1028_v49 = vpop.f32.mrb[1].mxu0 }
  0xf7   :  { %v1029_v50 = vadd.f32 %v1028_v49, %v1027_v48  ;;  %v1030_v51 = vpop.f32.mrb[2].mxu0  ;;  %v1109_v52 = vpop.f32.mrb[0].mxu1 }
  0xf8   :  { %v1031_v53 = vpop.f32.mrb[3].mxu0  ;;  %v534_v54 = vpop.f32.mrb[1].mxu1 }
  0xf9   :  { %v1032_v56 = vadd.f32 %v1031_v53, %v1030_v51  ;;  %v535_v57 = vadd.f32 %v1029_v50, %v534_v54  ;;  %v1110_v58 = vpop.f32.mrb[2].mxu1 }
  0xfa   :  { %v537_v59 = vpop.f32.mrb[3].mxu1 }
  0xfb   :  { %v1413_v60 = vadd.f32 %v1410_v55, %v535_v57  ;;  %v538_v61 = vadd.f32 %v1032_v56, %v537_v59 }
  0xfd   :  { %v916_v62 = vmul.f32 -1.442695, %v1413_v60  ;;  %v1417_v63 = vadd.f32 %v1410_v55, %v538_v61  ;;  %v1033_v0 = vpop.f32.mrb[4].mxu0 }
  0xfe   :  { %v1034_v1 = vpop.f32.mrb[5].mxu0 }
  0xff   :  { %1179 = vpow2.f32 %v916_v62  ;;  %v917_v2 = vmul.f32 -1.442695, %v1417_v63  ;;  %v1035_v3 = vadd.f32 %v1034_v1, %v1033_v0  ;;  %v1036_v4 = vpop.f32.mrb[6].mxu0  ;;  %v1113_v5 = vpop.f32.mrb[4].mxu1 }
 0x100   :  { %v1037_v6 = vpop.f32.mrb[7].mxu0  ;;  %v550_v7 = vpop.f32.mrb[5].mxu1 }
 0x101   :  { %1181 = vpow2.f32 %v917_v2  ;;  %v543_v8 = vadd.f32 %v1109_v52, %v1035_v3  ;;  %v1038_v9 = vadd.f32 %v1037_v6, %v1036_v4  ;;  %v1114_v10 = vpop.f32.mrb[6].mxu1 }
 0x102   :  { %v553_v11 = vpop.f32.mrb[7].mxu1 }
 0x103   :  { %v1421_v12 = vadd.f32 %v1410_v55, %v543_v8  ;;  %v546_v13 = vadd.f32 %v1110_v58, %v1038_v9 }
 0x105   :  { %v918_v14 = vmul.f32 -1.442695, %v1421_v12  ;;  %v1425_v15 = vadd.f32 %v1410_v55, %v546_v13  ;;  %v1039_v16 = vpop.f32.mrb[8].mxu0 }
 0x106   :  { %v1040_v17 = vpop.f32.mrb[9].mxu0 }
 0x107   :  { %1183 = vpow2.f32 %v918_v14  ;;  %v919_v18 = vmul.f32 -1.442695, %v1425_v15  ;;  %v1041_v19 = vadd.f32 %v1040_v17, %v1039_v16  ;;  %v1042_v20 = vpop.f32.mrb[10].mxu0  ;;  %v1428_v21 = vpop.f32.mrb[8].mxu1 }
 0x108   :  { %v1043_v22 = vpop.f32.mrb[11].mxu0  ;;  %v566_v23 = vpop.f32.mrb[9].mxu1 }
 0x109   :  { %v1180_v24 = vpop.eup %1179  ;;  %1185 = vpow2.f32 %v919_v18  ;;  %v1044_v25 = vadd.f32 %v1043_v22, %v1042_v20  ;;  %v551_v26 = vadd.f32 %v1041_v19, %v550_v7  ;;  %v1430_v27 = vpop.f32.mrb[10].mxu1 }
 0x10a   :  { %v719_v28 = vadd.f32 1.0, %v1180_v24  ;;  %v569_v29 = vpop.f32.mrb[11].mxu1 }
 0x10b   :  { %v1182_v30 = vpop.eup %1181  ;;  %v1433_v31 = vadd.f32 %v1410_v55, %v551_v26  ;;  %v554_v32 = vadd.f32 %v1044_v25, %v553_v11 }
 0x10c   :  { %1187 = vrcp.f32 %v719_v28  ;;  %v720_v33 = vadd.f32 1.0, %v1182_v30 }
 0x10d   :  { %v920_v34 = vmul.f32 -1.442695, %v1433_v31  ;;  %v1437_v35 = vadd.f32 %v1410_v55, %v554_v32  ;;  %v1045_v36 = vpop.f32.mrb[12].mxu0 }
 0x10e   :  { %1189 = vrcp.f32 %v720_v33  ;;  %v1046_v37 = vpop.f32.mrb[13].mxu0 }
 0x10f   :  { %1191 = vpow2.f32 %v920_v34  ;;  %v921_v38 = vmul.f32 -1.442695, %v1437_v35  ;;  %v1047_v39 = vadd.f32 %v1046_v37, %v1045_v36  ;;  %v1048_v40 = vpop.f32.mrb[14].mxu0  ;;  %v1440_v41 = vpop.f32.mrb[12].mxu1 }
 0x110   :  { %v1049_v42 = vpop.f32.mrb[15].mxu0  ;;  %v1442_v43 = vpop.f32.mrb[13].mxu1 }
 0x111   :  { %v1184_v44 = vpop.eup %1183  ;;  %1193 = vpow2.f32 %v921_v38  ;;  %v559_v45 = vadd.f32 %v1113_v5, %v1047_v39  ;;  %v1050_v46 = vadd.f32 %v1049_v42, %v1048_v40  ;;  %v1444_v47 = vpop.f32.mrb[14].mxu1 }
 0x112   :  { %v721_v48 = vadd.f32 1.0, %v1184_v44  ;;  %v1446_v49 = vpop.f32.mrb[15].mxu1 }
 0x113   :  { %v1186_v50 = vpop.eup %1185  ;;  %v1449_v51 = vadd.f32 %v1410_v55, %v559_v45  ;;  %v562_v52 = vadd.f32 %v1114_v10, %v1050_v46 }
 0x114   :  { %1195 = vrcp.f32 %v721_v48  ;;  %v722_v53 = vadd.f32 1.0, %v1186_v50 }
 0x115   :  { %v922_v54 = vmul.f32 -1.442695, %v1449_v51  ;;  %v1453_v56 = vadd.f32 %v1410_v55, %v562_v52  ;;  %v1051_v57 = vpop.f32.mrb[16].mxu0 }
 0x116   :  { %v1188_v58 = vpop.eup %1187  ;;  %1197 = vrcp.f32 %v722_v53  ;;  %v1052_v59 = vpop.f32.mrb[17].mxu0 }
 0x117   :  { %1199 = vpow2.f32 %v922_v54  ;;  %v923_v61 = vmul.f32 -1.442695, %v1453_v56  ;;  %v1053_v62 = vadd.f32 %v1052_v59, %v1051_v57  ;;  %v1054_v0 = vpop.f32.mrb[18].mxu0  ;;  %v767_v2 = vmul.f32 %v1188_v58, %v1413_v60 }
 0x118   :  { %v1190_v1 = vpop.eup %1189  ;;  %v1055_v3 = vpop.f32.mrb[19].mxu0 }
 0x119   :  { %v1192_v4 = vpop.eup %1191  ;;  %v768_v5 = vmul.f32 %v1190_v1, %v1417_v63  ;;  %1201 = vpow2.f32 %v923_v61  ;;  %v1056_v6 = vadd.f32 %v1055_v3, %v1054_v0  ;;  %v567_v7 = vadd.f32 %v1053_v62, %v566_v23 }
 0x11a   :  { %v723_v8 = vadd.f32 1.0, %v1192_v4 }
 0x11b   :  { %v1194_v9 = vpop.eup %1193  ;;  %v967_v10 = vpack.c.bf16 %v768_v5, %v767_v2  ;;  %v1459_v11 = vadd.f32 %v1410_v55, %v567_v7  ;;  %v570_v13 = vadd.f32 %v1056_v6, %v569_v29 }
 0x11c   :  { %1203 = vrcp.f32 %v723_v8  ;;  %v724_v14 = vadd.f32 1.0, %v1194_v9 }
 0x11d   :  { %968 = vst [vmem:[%s1525_s3] sm:$0xff] %v967_v10   ;;  %v924_v60 = vmul.f32 -1.442695, %v1459_v11  ;;  %v1466_v63 = vadd.f32 %v1410_v55, %v570_v13  ;;  %v1057_v16 = vpop.f32.mrb[20].mxu0 }
 0x11e   :  { %v1196_v17 = vpop.eup %1195  ;;  %1205 = vrcp.f32 %v724_v14  ;;  %v1058_v18 = vpop.f32.mrb[21].mxu0 }
 0x11f   :  { %1207 = vpow2.f32 %v924_v60  ;;  %v925_v19 = vmul.f32 -1.442695, %v1466_v63  ;;  %v1059_v20 = vadd.f32 %v1058_v18, %v1057_v16  ;;  %v1060_v22 = vpop.f32.mrb[22].mxu0  ;;  %v769_v24 = vmul.f32 %v1196_v17, %v1421_v12 }
 0x120   :  { %v1198_v23 = vpop.eup %1197  ;;  %v1061_v25 = vpop.f32.mrb[23].mxu0 }
 0x121   :  { %v1200_v26 = vpop.eup %1199  ;;  %v770_v28 = vmul.f32 %v1198_v23, %v1425_v15  ;;  %1209 = vpow2.f32 %v925_v19  ;;  %v575_v29 = vadd.f32 %v1428_v21, %v1059_v20  ;;  %v1062_v30 = vadd.f32 %v1061_v25, %v1060_v22 }
 0x122   :  { %v725_v32 = vadd.f32 1.0, %v1200_v26 }
 0x123   :  { %v1202_v33 = vpop.eup %1201  ;;  %v972_v34 = vpack.c.bf16 %v770_v28, %v769_v24  ;;  %v1473_v36 = vadd.f32 %v1410_v55, %v575_v29  ;;  %v578_v37 = vadd.f32 %v1430_v27, %v1062_v30 }
 0x124   :  { %1211 = vrcp.f32 %v725_v32  ;;  %v726_v38 = vadd.f32 1.0, %v1202_v33 }
 0x125   :  { %1004 = vst [vmem:[%s1525_s3 + $0x8] sm:$0xff] %v972_v34   ;;  %v926_v12 = vmul.f32 -1.442695, %v1473_v36  ;;  %v1481_v15 = vadd.f32 %v1410_v55, %v578_v37  ;;  %v1063_v21 = vpop.f32.mrb[24].mxu0 }
 0x126   :  { %v1204_v39 = vpop.eup %1203  ;;  %1213 = vrcp.f32 %v726_v38  ;;  %v1064_v40 = vpop.f32.mrb[25].mxu0 }
 0x127   :  { %1215 = vpow2.f32 %v926_v12  ;;  %v927_v42 = vmul.f32 -1.442695, %v1481_v15  ;;  %v1065_v44 = vadd.f32 %v1064_v40, %v1063_v21  ;;  %v1066_v27 = vpop.f32.mrb[26].mxu0  ;;  %v771_v46 = vmul.f32 %v1204_v39, %v1433_v31 }
 0x128   :  { %v1206_v45 = vpop.eup %1205  ;;  %v1067_v48 = vpop.f32.mrb[27].mxu0 }
 0x129   :  { %v1208_v50 = vpop.eup %1207  ;;  %v772_v52 = vmul.f32 %v1206_v45, %v1437_v35  ;;  %1217 = vpow2.f32 %v927_v42  ;;  %v1068_v53 = vadd.f32 %v1067_v48, %v1066_v27  ;;  %v583_v54 = vadd.f32 %v1065_v44, %v1442_v43 }
 0x12a   :  { %v727_v57 = vadd.f32 1.0, %v1208_v50 }
 0x12b   :  { %v1210_v58 = vpop.eup %1209  ;;  %v977_v59 = vpack.c.bf16 %v772_v52, %v771_v46  ;;  %v1488_v61 = vadd.f32 %v1410_v55, %v583_v54  ;;  %v586_v62 = vadd.f32 %v1068_v53, %v1446_v49 }
 0x12c   :  { %1219 = vrcp.f32 %v727_v57  ;;  %v728_v0 = vadd.f32 1.0, %v1210_v58 }
 0x12d   :  { %1005 = vst [vmem:[%s1525_s3 + $0x10] sm:$0xff] %v977_v59   ;;  %v928_v31 = vmul.f32 -1.442695, %v1488_v61  ;;  %v668_v35 = vadd.f32 %v1410_v55, %v586_v62  ;;  %v1069_v1 = vpop.f32.mrb[28].mxu0 }
 0x12e   :  { %v1212_v43 = vpop.eup %1211  ;;  %1221 = vrcp.f32 %v728_v0  ;;  %v1070_v2 = vpop.f32.mrb[29].mxu0 }
 0x12f   :  { %1223 = vpow2.f32 %v928_v31  ;;  %v929_v3 = vmul.f32 -1.442695, %v668_v35  ;;  %v1071_v4 = vadd.f32 %v1070_v2, %v1069_v1  ;;  %v1072_v5 = vpop.f32.mrb[30].mxu0  ;;  %v773_v49 = vmul.f32 %v1212_v43, %v1449_v51 }
 0x130   :  { %v1214_v6 = vpop.eup %1213  ;;  %v1073_v7 = vpop.f32.mrb[31].mxu0 }
 0x131   :  { %v1216_v8 = vpop.eup %1215  ;;  %v774_v9 = vmul.f32 %v1214_v6, %v1453_v56  ;;  %1225 = vpow2.f32 %v929_v3  ;;  %v591_v10 = vadd.f32 %v1440_v41, %v1071_v4  ;;  %v1074_v13 = vadd.f32 %v1073_v7, %v1072_v5 }
 0x132   :  { %v729_v14 = vadd.f32 1.0, %v1216_v8 }
 0x133   :  { %v1218_v60 = vpop.eup %1217  ;;  %v982_v16 = vpack.c.bf16 %v774_v9, %v773_v49  ;;  %v669_v17 = vadd.f32 %v1410_v55, %v591_v10  ;;  %v594_v18 = vadd.f32 %v1444_v47, %v1074_v13 }
 0x134   :  { %1227 = vrcp.f32 %v729_v14  ;;  %v730_v19 = vadd.f32 1.0, %v1218_v60 }
 0x135   :  { %1006 = vst [vmem:[%s1525_s3 + $0x18] sm:$0xff] %v982_v16   ;;  %v930_v51 = vmul.f32 -1.442695, %v669_v17  ;;  %v670_v56 = vadd.f32 %v1410_v55, %v594_v18 }
 0x136   :  { %v1220_v20 = vpop.eup %1219  ;;  %1229 = vrcp.f32 %v730_v19 }
 0x137   :  { %1231 = vpow2.f32 %v930_v51  ;;  %v931_v41 = vmul.f32 -1.442695, %v670_v56  ;;  %v775_v24 = vmul.f32 %v1220_v20, %v1459_v11 }
 0x138   :  { %v1222_v22 = vpop.eup %1221 }
 0x139   :  { %v1224_v23 = vpop.eup %1223  ;;  %v776_v25 = vmul.f32 %v1222_v22, %v1466_v63  ;;  %1233 = vpow2.f32 %v931_v41 }
 0x13a   :  { %v731_v47 = vadd.f32 1.0, %v1224_v23 }
 0x13b   :  { %v1226_v26 = vpop.eup %1225  ;;  %v987_v28 = vpack.c.bf16 %v776_v25, %v775_v24 }
 0x13c   :  { %1235 = vrcp.f32 %v731_v47  ;;  %v732_v29 = vadd.f32 1.0, %v1226_v26 }
 0x13d   :  { %1007 = vst [vmem:[%s1525_s3 + $0x20] sm:$0xff] %v987_v28  }
 0x13e   :  { %v1228_v55 = vpop.eup %1227  ;;  %1237 = vrcp.f32 %v732_v29 }
 0x13f   :  { %v777_v33 = vmul.f32 %v1228_v55, %v1473_v36 }
 0x140   :  { %v1230_v30 = vpop.eup %1229 }
 0x141   :  { %v1232_v32 = vpop.eup %1231  ;;  %v778_v11 = vmul.f32 %v1230_v30, %v1481_v15 }
 0x142   :  { %v733_v34 = vadd.f32 1.0, %v1232_v32 }
 0x143   :  { %v1234_v63 = vpop.eup %1233  ;;  %v992_v37 = vpack.c.bf16 %v778_v11, %v777_v33 }
 0x144   :  { %1239 = vrcp.f32 %v733_v34  ;;  %v734_v38 = vadd.f32 1.0, %v1234_v63 }
 0x145   :  { %1008 = vst [vmem:[%s1525_s3 + $0x28] sm:$0xff] %v992_v37  }
 0x146   :  { %v1236_v12 = vpop.eup %1235  ;;  %1241 = vrcp.f32 %v734_v38 }
 0x147   :  { %v779_v39 = vmul.f32 %v1236_v12, %v1488_v61 }
 0x148   :  { %v1238_v21 = vpop.eup %1237 }
 0x149   :  { %v780_v40 = vmul.f32 %v1238_v21, %v668_v35 }
 0x14b   :  { %v997_v42 = vpack.c.bf16 %v780_v40, %v779_v39 }
 0x14d   :  { %1009 = vst [vmem:[%s1525_s3 + $0x30] sm:$0xff] %v997_v42  }
 0x14e   :  { %v1240_v36 = vpop.eup %1239 }
 0x14f   :  { %v781_v44 = vmul.f32 %v1240_v36, %v669_v17 }
 0x150   :  { %v1242_v15 = vpop.eup %1241 }
 0x151   :  { %v782_v27 = vmul.f32 %v1242_v15, %v670_v56 }
 0x153   :  { %v1002_v45 = vpack.c.bf16 %v782_v27, %v781_v44 }
 0x155   :  { %1010 = vst [vmem:[%s1525_s3 + $0x38] sm:$0xff] %v1002_v45  }

// kernel: dual_yolo_forward.18
= control target key start
LH: loop header
LB: loop body
LE: loop exit
PB: predicated region body
PF: predicated region fallthrough
CT: control target
= control target key end

     0   :  { %s1484_s1 = inlined_call_operand.vmem [shape: bf16[640,256], index: 1, kind: input, shape index: {}]   ;;  %s1485_s0 = inlined_call_operand.vmem [shape: bf16[32,640], index: 0, kind: input, shape index: {}]   ;;  %s1486_s2 = inlined_call_operand.vmem [shape: f32[1,256], index: 2, kind: input, shape index: {}]   ;;  %s1487_s3 = inlined_call_operand.vmem [shape: bf16[32,256], index: 3, kind: output, shape index: {}]  }
   0x1   :  { %v1012_v0 = vld [vmem:[%s1484_s1 + $0x4] ss:$8 sps:$4 sm:$0xff]   ;;  %v1016_v2 = vld [vmem:[%s1484_s1] ss:$8 sps:$4 sm:$0xff]   ;;  %v1018_v4 = vld [vmem:[%s1484_s1 + $0x14] ss:$8 sps:$4 sm:$0xff]  }
   0x2   :  { %v1014_v1 = vld [vmem:[%s1484_s1 + $0x104] ss:$8 sps:$4 sm:$0xff]   ;;  %579 = vmatprep.subr.bf16.mxu1 %v1012_v0  ;;  %v1017_v3 = vld [vmem:[%s1484_s1 + $0x100] ss:$8 sps:$4 sm:$0xff]   ;;  %v1020_v5 = vld [vmem:[%s1484_s1 + $0x114] ss:$8 sps:$4 sm:$0xff]  }
   0x3   :  { %632 = vmatprep.subr.bf16.mxu0 %v1014_v1  ;;  %580 = vmatpush1.bf16.msra.mxu1 %v1016_v2  ;;  %v1022_v6 = vld [vmem:[%s1484_s1 + $0x10] ss:$8 sps:$4 sm:$0xff]   ;;  %v1024_v8 = vld [vmem:[%s1484_s1 + $0x24] ss:$8 sps:$4 sm:$0xff]   ;;  %v1028_v10 = vld [vmem:[%s1484_s1 + $0x20] ss:$8 sps:$4 sm:$0xff]  }
   0x4   :  { %633 = vmatpush1.bf16.msra.mxu0 %v1017_v3  ;;  %581 = vmatprep.subr.bf16.mxu1 %v1018_v4  ;;  %v1023_v7 = vld [vmem:[%s1484_s1 + $0x110] ss:$8 sps:$4 sm:$0xff]   ;;  %v1026_v9 = vld [vmem:[%s1484_s1 + $0x124] ss:$8 sps:$4 sm:$0xff]   ;;  %v1029_v11 = vld [vmem:[%s1484_s1 + $0x120] ss:$8 sps:$4 sm:$0xff]  }
   0x5   :  { %634 = vmatprep.subr.bf16.mxu0 %v1020_v5  ;;  %v1030_v12 = vld [vmem:[%s1484_s1 + $0x34] ss:$8 sps:$4 sm:$0xff]   ;;  %v1034_v14 = vld [vmem:[%s1484_s1 + $0x30] ss:$8 sps:$4 sm:$0xff]   ;;  %v1036_v16 = vld [vmem:[%s1484_s1 + $0x44] ss:$8 sps:$4 sm:$0xff]  }
   0x6   :  { %v1032_v13 = vld [vmem:[%s1484_s1 + $0x134] ss:$8 sps:$4 sm:$0xff]   ;;  %v1035_v15 = vld [vmem:[%s1484_s1 + $0x130] ss:$8 sps:$4 sm:$0xff]   ;;  %v1038_v17 = vld [vmem:[%s1484_s1 + $0x144] ss:$8 sps:$4 sm:$0xff]  }
   0x7   :  { %582 = vmatpush1.bf16.msra.mxu1 %v1022_v6  ;;  %v1040_v18 = vld [vmem:[%s1484_s1 + $0x40] ss:$8 sps:$4 sm:$0xff]   ;;  %v1042_v20 = vld [vmem:[%s1484_s1 + $0x54] ss:$8 sps:$4 sm:$0xff]   ;;  %v1046_v22 = vld [vmem:[%s1484_s1 + $0x50] ss:$8 sps:$4 sm:$0xff]  }
   0x8   :  { %635 = vmatpush1.bf16.msra.mxu0 %v1023_v7  ;;  %583 = vmatprep.subr.bf16.mxu1 %v1024_v8  ;;  %v1041_v19 = vld [vmem:[%s1484_s1 + $0x140] ss:$8 sps:$4 sm:$0xff]   ;;  %v1044_v21 = vld [vmem:[%s1484_s1 + $0x154] ss:$8 sps:$4 sm:$0xff]   ;;  %v1047_v23 = vld [vmem:[%s1484_s1 + $0x150] ss:$8 sps:$4 sm:$0xff]  }
   0x9   :  { %636 = vmatprep.subr.bf16.mxu0 %v1026_v9  ;;  %v1048_v24 = vld [vmem:[%s1484_s1 + $0x64] ss:$8 sps:$4 sm:$0xff]   ;;  %v1052_v26 = vld [vmem:[%s1484_s1 + $0x60] ss:$8 sps:$4 sm:$0xff]   ;;  %v1054_v28 = vld [vmem:[%s1484_s1 + $0x74] ss:$8 sps:$4 sm:$0xff]  }
   0xa   :  { %v1050_v25 = vld [vmem:[%s1484_s1 + $0x164] ss:$8 sps:$4 sm:$0xff]   ;;  %v1053_v27 = vld [vmem:[%s1484_s1 + $0x160] ss:$8 sps:$4 sm:$0xff]   ;;  %v1056_v29 = vld [vmem:[%s1484_s1 + $0x174] ss:$8 sps:$4 sm:$0xff]  }
   0xb   :  { %584 = vmatpush1.bf16.msra.mxu1 %v1028_v10  ;;  %v1058_v30 = vld [vmem:[%s1484_s1 + $0x70] ss:$8 sps:$4 sm:$0xff]   ;;  %v1060_v32 = vld [vmem:[%s1484_s1 + $0x84] ss:$8 sps:$4 sm:$0xff]   ;;  %v1064_v34 = vld [vmem:[%s1484_s1 + $0x80] ss:$8 sps:$4 sm:$0xff]  }
   0xc   :  { %637 = vmatpush1.bf16.msra.mxu0 %v1029_v11  ;;  %585 = vmatprep.subr.bf16.mxu1 %v1030_v12  ;;  %v1059_v31 = vld [vmem:[%s1484_s1 + $0x170] ss:$8 sps:$4 sm:$0xff]   ;;  %v1062_v33 = vld [vmem:[%s1484_s1 + $0x184] ss:$8 sps:$4 sm:$0xff]   ;;  %v1065_v35 = vld [vmem:[%s1484_s1 + $0x180] ss:$8 sps:$4 sm:$0xff]  }
   0xd   :  { %638 = vmatprep.subr.bf16.mxu0 %v1032_v13  ;;  %v1066_v36 = vld [vmem:[%s1484_s1 + $0x94] ss:$8 sps:$4 sm:$0xff]   ;;  %v1070_v38 = vld [vmem:[%s1484_s1 + $0x90] ss:$8 sps:$4 sm:$0xff]   ;;  %v1072_v40 = vld [vmem:[%s1484_s1 + $0xa4] ss:$8 sps:$4 sm:$0xff]  }
   0xe   :  { %v1068_v37 = vld [vmem:[%s1484_s1 + $0x194] ss:$8 sps:$4 sm:$0xff]   ;;  %v1071_v39 = vld [vmem:[%s1484_s1 + $0x190] ss:$8 sps:$4 sm:$0xff]   ;;  %v1074_v41 = vld [vmem:[%s1484_s1 + $0x1a4] ss:$8 sps:$4 sm:$0xff]  }
   0xf   :  { %586 = vmatpush1.bf16.msra.mxu1 %v1034_v14  ;;  %v1076_v42 = vld [vmem:[%s1484_s1 + $0xa0] ss:$8 sps:$4 sm:$0xff]   ;;  %v1078_v44 = vld [vmem:[%s1484_s1 + $0xb4] ss:$8 sps:$4 sm:$0xff]   ;;  %v1082_v46 = vld [vmem:[%s1484_s1 + $0xb0] ss:$8 sps:$4 sm:$0xff]  }
  0x10   :  { %639 = vmatpush1.bf16.msra.mxu0 %v1035_v15  ;;  %587 = vmatprep.subr.bf16.mxu1 %v1036_v16  ;;  %v1077_v43 = vld [vmem:[%s1484_s1 + $0x1a0] ss:$8 sps:$4 sm:$0xff]   ;;  %v1080_v45 = vld [vmem:[%s1484_s1 + $0x1b4] ss:$8 sps:$4 sm:$0xff]   ;;  %v1083_v47 = vld [vmem:[%s1484_s1 + $0x1b0] ss:$8 sps:$4 sm:$0xff]  }
  0x11   :  { %640 = vmatprep.subr.bf16.mxu0 %v1038_v17  ;;  %v1084_v48 = vld [vmem:[%s1484_s1 + $0xc4] ss:$8 sps:$4 sm:$0xff]   ;;  %v1088_v52 = vld [vmem:[%s1484_s1 + $0xc0] ss:$8 sps:$4 sm:$0xff]   ;;  %v1090_v54 = vld [vmem:[%s1484_s1 + $0xd4] ss:$8 sps:$4 sm:$0xff]  }
  0x12   :  { %v1110_v49 = vld [vmem:[%s1485_s0 + $0x4] ss:$20 sps:$4 sm:$0xff]   ;;  %v1113_v51 = vld [vmem:[%s1485_s0 + $0xc] ss:$20 sps:$4 sm:$0xff]   ;;  %v1092_v55 = vld [vmem:[%s1484_s1 + $0x1d4] ss:$8 sps:$4 sm:$0xff]  }
  0x13   :  { %588 = vmatpush1.bf16.msra.mxu1 %v1040_v18  ;;  %v1086_v50 = vld [vmem:[%s1484_s1 + $0x1c4] ss:$8 sps:$4 sm:$0xff]   ;;  %611 = vmatprep.mubr.bf16.mxu1 %v1110_v49  ;;  %v1089_v53 = vld [vmem:[%s1484_s1 + $0x1c0] ss:$8 sps:$4 sm:$0xff]   ;;  %v1094_v56 = vld [vmem:[%s1484_s1 + $0xd0] ss:$8 sps:$4 sm:$0xff]  }
  0x14   :  { %641 = vmatpush1.bf16.msra.mxu0 %v1041_v19  ;;  %589 = vmatprep.subr.bf16.mxu1 %v1042_v20  ;;  %v1095_v57 = vld [vmem:[%s1484_s1 + $0x1d0] ss:$8 sps:$4 sm:$0xff]   ;;  %v1096_v58 = vld [vmem:[%s1484_s1 + $0xe4] ss:$8 sps:$4 sm:$0xff]   ;;  %v1100_v60 = vld [vmem:[%s1484_s1 + $0xe0] ss:$8 sps:$4 sm:$0xff]  }
  0x15   :  { %642 = vmatprep.subr.bf16.mxu0 %v1044_v21  ;;  %664 = vmatprep.mubr.bf16.mxu0 %v1113_v51  ;;  %v1098_v59 = vld [vmem:[%s1484_s1 + $0x1e4] ss:$8 sps:$4 sm:$0xff]   ;;  %v1101_v61 = vld [vmem:[%s1484_s1 + $0x1e0] ss:$8 sps:$4 sm:$0xff]   ;;  %v1102_v62 = vld [vmem:[%s1484_s1 + $0xf4] ss:$8 sps:$4 sm:$0xff]  }
  0x16   :  { %v1104_v63 = vld [vmem:[%s1484_s1 + $0x1f4] ss:$8 sps:$4 sm:$0xff]   ;;  %v1106_v0 = vld [vmem:[%s1484_s1 + $0xf0] ss:$8 sps:$4 sm:$0xff]   ;;  %v1116_v2 = vld [vmem:[%s1484_s1 + $0x204] ss:$8 sps:$4 sm:$0xff]  }
  0x17   :  { %590 = vmatpush1.bf16.msra.mxu1 %v1046_v22  ;;  %v1107_v1 = vld [vmem:[%s1484_s1 + $0x1f0] ss:$8 sps:$4 sm:$0xff]   ;;  %v1108_v3 = vld [vmem:[%s1485_s0] ss:$20 sps:$4 sm:$0xff]   ;;  %v1111_v4 = vld [vmem:[%s1485_s0 + $0x8] ss:$20 sps:$4 sm:$0xff]  }
  0x18   :  { %643 = vmatpush1.bf16.msra.mxu0 %v1047_v23  ;;  %591 = vmatprep.subr.bf16.mxu1 %v1048_v24  ;;  %v1114_v5 = vld [vmem:[%s1484_s1 + $0x200] ss:$8 sps:$4 sm:$0xff]   ;;  %v1119_v6 = vld [vmem:[%s1484_s1 + $0x214] ss:$8 sps:$4 sm:$0xff]   ;;  %v1117_v9 = vld [vmem:[%s1484_s1 + $0x210] ss:$8 sps:$4 sm:$0xff]  }
  0x19   :  { %644 = vmatprep.subr.bf16.mxu0 %v1050_v25  ;;  %v1129_v7 = vld [vmem:[%s1485_s0 + $0x2c] ss:$20 sps:$4 sm:$0xff]   ;;  %v1131_v8 = vld [vmem:[%s1485_s0 + $0x34] ss:$20 sps:$4 sm:$0xff]   ;;  %v1137_v12 = vld [vmem:[%s1485_s0 + $0x30] ss:$20 sps:$4 sm:$0xff]  }
  0x1a   :  { %v1122_v10 = vld [vmem:[%s1484_s1 + $0x224] ss:$8 sps:$4 sm:$0xff]   ;;  %v1136_v11 = vld [vmem:[%s1485_s0 + $0x28] ss:$20 sps:$4 sm:$0xff]   ;;  %v1123_v15 = vld [vmem:[%s1484_s1 + $0x230] ss:$8 sps:$4 sm:$0xff]  }
  0x1b   :  { %592 = vmatpush1.bf16.msra.mxu1 %v1052_v26  ;;  %v1120_v13 = vld [vmem:[%s1484_s1 + $0x220] ss:$8 sps:$4 sm:$0xff]   ;;  %v1125_v14 = vld [vmem:[%s1484_s1 + $0x234] ss:$8 sps:$4 sm:$0xff]   ;;  %v1128_v16 = vld [vmem:[%s1484_s1 + $0x244] ss:$8 sps:$4 sm:$0xff]  }
  0x1c   :  { %645 = vmatpush1.bf16.msra.mxu0 %v1053_v27  ;;  %593 = vmatprep.subr.bf16.mxu1 %v1054_v28  ;;  %v1178_v17 = vmov 0   ;;  %v1126_v18 = vld [vmem:[%s1484_s1 + $0x240] ss:$8 sps:$4 sm:$0xff]   ;;  %v1135_v19 = vld [vmem:[%s1484_s1 + $0x254] ss:$8 sps:$4 sm:$0xff]  }
  0x1d   :  { %646 = vmatprep.subr.bf16.mxu0 %v1056_v29  ;;  %v1133_v20 = vld [vmem:[%s1484_s1 + $0x250] ss:$8 sps:$4 sm:$0xff]   ;;  %v1140_v21 = vld [vmem:[%s1484_s1 + $0x264] ss:$8 sps:$4 sm:$0xff]   ;;  %v1138_v22 = vld [vmem:[%s1484_s1 + $0x260] ss:$8 sps:$4 sm:$0xff]  }
  0x1e   :  { %v1143_v23 = vld [vmem:[%s1484_s1 + $0x274] ss:$8 sps:$4 sm:$0xff]   ;;  %v1141_v24 = vld [vmem:[%s1484_s1 + $0x270] ss:$8 sps:$4 sm:$0xff]  }
  0x1f   :  { %594 = vmatpush1.bf16.msra.mxu1 %v1058_v30  ;;  %v1144_v25 = vld [vmem:[%s1485_s0 + $0x10] ss:$20 sps:$4 sm:$0xff]   ;;  %v1145_v26 = vld [vmem:[%s1485_s0 + $0x38] ss:$20 sps:$4 sm:$0xff]  }
  0x20   :  { %647 = vmatpush1.bf16.msra.mxu0 %v1059_v31  ;;  %595 = vmatprep.subr.bf16.mxu1 %v1060_v32 }
  0x21   :  { %648 = vmatprep.subr.bf16.mxu0 %v1062_v33 }
  0x23   :  { %596 = vmatpush1.bf16.msra.mxu1 %v1064_v34 }
  0x24   :  { %649 = vmatpush1.bf16.msra.mxu0 %v1065_v35  ;;  %597 = vmatprep.subr.bf16.mxu1 %v1066_v36 }
  0x25   :  { %650 = vmatprep.subr.bf16.mxu0 %v1068_v37 }
  0x27   :  { %598 = vmatpush1.bf16.msra.mxu1 %v1070_v38 }
  0x28   :  { %651 = vmatpush1.bf16.msra.mxu0 %v1071_v39  ;;  %599 = vmatprep.subr.bf16.mxu1 %v1072_v40 }
  0x29   :  { %652 = vmatprep.subr.bf16.mxu0 %v1074_v41 }
  0x2b   :  { %600 = vmatpush1.bf16.msra.mxu1 %v1076_v42 }
  0x2c   :  { %653 = vmatpush1.bf16.msra.mxu0 %v1077_v43  ;;  %601 = vmatprep.subr.bf16.mxu1 %v1078_v44  ;;  %v767_v43 = vlaneseq }
  0x2d   :  { %654 = vmatprep.subr.bf16.mxu0 %v1080_v45 }
  0x2e   :  { %v768_v44 = vshrl.u32 %v767_v43, 7 }
  0x2f   :  { %602 = vmatpush1.bf16.msra.mxu1 %v1082_v46  ;;  %v765_v46 = vld [vmem:[%s1486_s2] sm:$0x3] }
  0x30   :  { %655 = vmatpush1.bf16.msra.mxu0 %v1083_v47  ;;  %603 = vmatprep.subr.bf16.mxu1 %v1084_v48  ;;  %v769_v45 = vsub.s32 0, %v768_v44  ;;  %v773_v47 = vsub.s32 1, %v768_v44 }
  0x31   :  { %656 = vmatprep.subr.bf16.mxu0 %v1086_v50 }
  0x32   :  { %v770_v48 = vrot.slane %v765_v46, %v769_v45  ;;  %v774_v51 = vrot.slane %v765_v46, %v773_v47 }
  0x33   :  { %604 = vmatpush1.bf16.msra.mxu1 %v1088_v52 }
  0x34   :  { %657 = vmatpush1.bf16.msra.mxu0 %v1089_v53  ;;  %605 = vmatprep.subr.bf16.mxu1 %v1090_v54 }
  0x35   :  { %658 = vmatprep.subr.bf16.mxu0 %v1092_v55 }
  0x37   :  { %606 = vmatpush1.bf16.msra.mxu1 %v1094_v56 }
  0x38   :  { %659 = vmatpush1.bf16.msra.mxu0 %v1095_v57  ;;  %607 = vmatprep.subr.bf16.mxu1 %v1096_v58 }
  0x39   :  { %660 = vmatprep.subr.bf16.mxu0 %v1098_v59 }
  0x3b   :  { %608 = vmatpush1.bf16.msra.mxu1 %v1100_v60 }
  0x3c   :  { %661 = vmatpush1.bf16.msra.mxu0 %v1101_v61  ;;  %609 = vmatprep.subr.bf16.mxu1 %v1102_v62 }
  0x3d   :  { %662 = vmatprep.subr.bf16.mxu0 %v1104_v63 }
  0x3f   :  { %610 = vmatpush1.bf16.msra.mxu1 %v1106_v0 }
  0x40   :  { %663 = vmatpush1.bf16.msra.mxu0 %v1107_v1  ;;  %979 = vmatprep.subr.bf16.mxu1 %v1116_v2 }
  0x41   :  { %685 = vmatprep.subr.bf16.mxu0 %v1116_v2 }
  0x42   :  { %612 = vmatmul.mubr.bf16.vlgmr.msra.gmra.mrb[0].mxu1 %v1108_v3 }
  0x43   :  { %665 = vmatmul.mubr.bf16.vlgmr.msra.gmra.mrb[0].mxu0 %v1111_v4  ;;  %987 = vmatpush1.bf16.msra.mxu1 %v1114_v5 }
  0x44   :  { %686 = vmatpush1.bf16.msra.mxu0 %v1114_v5  ;;  %980 = vmatprep.subr.bf16.mxu1 %v1119_v6 }
  0x45   :  { %687 = vmatprep.subr.bf16.mxu0 %v1119_v6  ;;  %621 = vmatprep.mubr.bf16.mxu1 %v1129_v7 }
  0x46   :  { %674 = vmatprep.mubr.bf16.mxu0 %v1131_v8 }
  0x47   :  { %988 = vmatpush1.bf16.msra.mxu1 %v1117_v9 }
  0x48   :  { %688 = vmatpush1.bf16.msra.mxu0 %v1117_v9  ;;  %981 = vmatprep.subr.bf16.mxu1 %v1122_v10 }
  0x49   :  { %689 = vmatprep.subr.bf16.mxu0 %v1122_v10 }
  0x4a   :  { %622 = vmatmul.mubr.bf16.gmra.mrb[4].mxu1 %v1136_v11 }
  0x4b   :  { %675 = vmatmul.mubr.bf16.gmra.mrb[4].mxu0 %v1137_v12  ;;  %989 = vmatpush1.bf16.msra.mxu1 %v1120_v13 }
  0x4c   :  { %690 = vmatpush1.bf16.msra.mxu0 %v1120_v13  ;;  %982 = vmatprep.subr.bf16.mxu1 %v1125_v14 }
  0x4d   :  { %691 = vmatprep.subr.bf16.mxu0 %v1125_v14  ;;  %717 = vmatprep.mubr.bf16.mxu0 %v1178_v17 }
  0x4e   :  { %727 = vmatprep.mubr.bf16.mxu1 %v1178_v17 }
  0x4f   :  { %990 = vmatpush1.bf16.msra.mxu1 %v1123_v15 }
  0x50   :  { %692 = vmatpush1.bf16.msra.mxu0 %v1123_v15  ;;  %983 = vmatprep.subr.bf16.mxu1 %v1128_v16 }
  0x51   :  { %693 = vmatprep.subr.bf16.mxu0 %v1128_v16 }
  0x53   :  { %991 = vmatpush1.bf16.msra.mxu1 %v1126_v18 }
  0x54   :  { %694 = vmatpush1.bf16.msra.mxu0 %v1126_v18  ;;  %984 = vmatprep.subr.bf16.mxu1 %v1135_v19 }
  0x55   :  { %695 = vmatprep.subr.bf16.mxu0 %v1135_v19 }
  0x57   :  { %992 = vmatpush1.bf16.msra.mxu1 %v1133_v20 }
  0x58   :  { %696 = vmatpush1.bf16.msra.mxu0 %v1133_v20  ;;  %985 = vmatprep.subr.bf16.mxu1 %v1140_v21 }
  0x59   :  { %697 = vmatprep.subr.bf16.mxu0 %v1140_v21 }
  0x5b   :  { %993 = vmatpush1.bf16.msra.mxu1 %v1138_v22 }
  0x5c   :  { %698 = vmatpush1.bf16.msra.mxu0 %v1138_v22  ;;  %986 = vmatprep.subr.bf16.mxu1 %v1143_v23 }
  0x5d   :  { %699 = vmatprep.subr.bf16.mxu0 %v1143_v23 }
  0x5f   :  { %994 = vmatpush1.bf16.msra.mxu1 %v1141_v24 }
  0x60   :  { %700 = vmatpush1.bf16.msra.mxu0 %v1141_v24 }
  0x62   :  { %728 = vmatmul.mubr.bf16.vlgmr.msra.gmra.mrb[8].mxu1 %v1145_v26 }
  0x63   :  { %718 = vmatmul.mubr.bf16.vlgmr.msra.gmra.mrb[0].mxu0 %v1144_v25 }
 0x115   :  { %v613_v27 = vpop.f32.mrb[0].mxu1 }
 0x116   :  { %v615_v28 = vpop.f32.mrb[1].mxu1 }
 0x117   :  { %v617_v29 = vpop.f32.mrb[2].mxu1 }
 0x118   :  { %v619_v30 = vpop.f32.mrb[3].mxu1 }
 0x11d   :  { %v623_v31 = vpop.f32.mrb[4].mxu1 }
 0x11e   :  { %v676_v32 = vpop.f32.mrb[4].mxu0  ;;  %v625_v34 = vpop.f32.mrb[5].mxu1 }
 0x11f   :  { %v677_v33 = vadd.f32 %v676_v32, %v623_v31  ;;  %v678_v35 = vpop.f32.mrb[5].mxu0  ;;  %v627_v37 = vpop.f32.mrb[6].mxu1 }
 0x120   :  { %v679_v36 = vadd.f32 %v678_v35, %v625_v34  ;;  %v680_v38 = vpop.f32.mrb[6].mxu0  ;;  %v629_v40 = vpop.f32.mrb[7].mxu1 }
 0x121   :  { %v681_v39 = vadd.f32 %v680_v38, %v627_v37  ;;  %v682_v41 = vpop.f32.mrb[7].mxu0 }
 0x122   :  { %v683_v42 = vadd.f32 %v682_v41, %v629_v40 }
 0x135   :  { %v729_v50 = vpop.f32.mrb[8].mxu1 }
 0x136   :  { %v719_v49 = vpop.f32.mrb[0].mxu0  ;;  %v730_v53 = vadd.f32 %v729_v50, %v677_v33  ;;  %v731_v55 = vpop.f32.mrb[9].mxu1 }
 0x137   :  { %v995_v52 = vadd.f32 %v719_v49, %v613_v27  ;;  %v721_v54 = vpop.f32.mrb[1].mxu0  ;;  %v732_v57 = vadd.f32 %v731_v55, %v679_v36  ;;  %v733_v59 = vpop.f32.mrb[10].mxu1 }
 0x138   :  { %v996_v56 = vadd.f32 %v721_v54, %v615_v28  ;;  %v723_v58 = vpop.f32.mrb[2].mxu0  ;;  %v781_v61 = vadd.f32 %v770_v48, %v730_v53  ;;  %v734_v63 = vadd.f32 %v733_v59, %v681_v39  ;;  %v735_v1 = vpop.f32.mrb[11].mxu1 }
 0x139   :  { %v777_v60 = vadd.f32 %v995_v52, %v770_v48  ;;  %v997_v62 = vadd.f32 %v723_v58, %v617_v29  ;;  %v725_v0 = vpop.f32.mrb[3].mxu0  ;;  %v782_v3 = vadd.f32 %v774_v51, %v732_v57  ;;  %v736_v5 = vadd.f32 %v735_v1, %v683_v42 }
 0x13a   :  { %v778_v2 = vadd.f32 %v996_v56, %v774_v51  ;;  %v998_v4 = vadd.f32 %v725_v0, %v619_v30  ;;  %v967_v7 = vmul.f32 -1.442695, %v781_v61  ;;  %v783_v9 = vadd.f32 %v770_v48, %v734_v63 }
 0x13b   :  { %v963_v6 = vmul.f32 -1.442695, %v777_v60  ;;  %v779_v8 = vadd.f32 %v997_v62, %v770_v48  ;;  %v968_v11 = vmul.f32 -1.442695, %v782_v3  ;;  %v784_v13 = vadd.f32 %v774_v51, %v736_v5 }
 0x13c   :  { %v964_v10 = vmul.f32 -1.442695, %v778_v2  ;;  %v780_v12 = vadd.f32 %v998_v4, %v774_v51  ;;  %v969_v15 = vmul.f32 -1.442695, %v783_v9 }
 0x13d   :  { %1146 = vpow2.f32 %v963_v6  ;;  %v965_v14 = vmul.f32 -1.442695, %v779_v8  ;;  %v970_v17 = vmul.f32 -1.442695, %v784_v13 }
 0x13e   :  { %1148 = vpow2.f32 %v967_v7  ;;  %v966_v16 = vmul.f32 -1.442695, %v780_v12 }
 0x13f   :  { %1150 = vpow2.f32 %v964_v10 }
 0x140   :  { %1152 = vpow2.f32 %v968_v11 }
 0x141   :  { %1154 = vpow2.f32 %v965_v14 }
 0x142   :  { %1156 = vpow2.f32 %v969_v15 }
 0x143   :  { %1158 = vpow2.f32 %v966_v16 }
 0x144   :  { %1160 = vpow2.f32 %v970_v17 }
 0x147   :  { %v1147_v18 = vpop.eup %1146 }
 0x148   :  { %v1149_v19 = vpop.eup %1148  ;;  %v809_v20 = vadd.f32 1.0, %v1147_v18 }
 0x149   :  { %v1151_v21 = vpop.eup %1150  ;;  %v813_v22 = vadd.f32 1.0, %v1149_v19 }
 0x14a   :  { %v1153_v23 = vpop.eup %1152  ;;  %1162 = vrcp.f32 %v809_v20  ;;  %v810_v24 = vadd.f32 1.0, %v1151_v21 }
 0x14b   :  { %v1155_v25 = vpop.eup %1154  ;;  %1164 = vrcp.f32 %v813_v22  ;;  %v814_v26 = vadd.f32 1.0, %v1153_v23 }
 0x14c   :  { %v1157_v27 = vpop.eup %1156  ;;  %1166 = vrcp.f32 %v810_v24  ;;  %v811_v28 = vadd.f32 1.0, %v1155_v25 }
 0x14d   :  { %v1159_v29 = vpop.eup %1158  ;;  %1168 = vrcp.f32 %v814_v26  ;;  %v815_v30 = vadd.f32 1.0, %v1157_v27 }
 0x14e   :  { %v1161_v31 = vpop.eup %1160  ;;  %1170 = vrcp.f32 %v811_v28  ;;  %v812_v32 = vadd.f32 1.0, %v1159_v29 }
 0x14f   :  { %1172 = vrcp.f32 %v815_v30  ;;  %v816_v33 = vadd.f32 1.0, %v1161_v31 }
 0x150   :  { %1174 = vrcp.f32 %v812_v32 }
 0x151   :  { %1176 = vrcp.f32 %v816_v33 }
 0x154   :  { %v1163_v34 = vpop.eup %1162 }
 0x155   :  { %v1165_v35 = vpop.eup %1164  ;;  %v833_v36 = vmul.f32 %v1163_v34, %v777_v60 }
 0x156   :  { %v1167_v37 = vpop.eup %1166  ;;  %v837_v38 = vmul.f32 %v1165_v35, %v781_v61 }
 0x157   :  { %v1169_v39 = vpop.eup %1168  ;;  %v834_v40 = vmul.f32 %v1167_v37, %v778_v2 }
 0x158   :  { %v1171_v41 = vpop.eup %1170  ;;  %v838_v42 = vmul.f32 %v1169_v39, %v782_v3 }
 0x159   :  { %v1173_v43 = vpop.eup %1172  ;;  %v975_v44 = vpack.c.bf16 %v834_v40, %v833_v36  ;;  %v835_v45 = vmul.f32 %v1171_v41, %v779_v8 }
 0x15a   :  { %v1175_v46 = vpop.eup %1174  ;;  %v977_v47 = vpack.c.bf16 %v838_v42, %v837_v38  ;;  %v839_v48 = vmul.f32 %v1173_v43, %v783_v9 }
 0x15b   :  { %v1177_v49 = vpop.eup %1176  ;;  %865 = vst [vmem:[%s1487_s3] sm:$0xff] %v975_v44  ;;  %v836_v50 = vmul.f32 %v1175_v46, %v780_v12 }
 0x15c   :  { %867 = vst [vmem:[%s1487_s3 + $0x10] sm:$0xff] %v977_v47  ;;  %v840_v51 = vmul.f32 %v1177_v49, %v784_v13 }
 0x15d   :  { %v976_v52 = vpack.c.bf16 %v836_v50, %v835_v45 }
 0x15e   :  { %v978_v53 = vpack.c.bf16 %v840_v51, %v839_v48 }
 0x15f   :  { %866 = vst [vmem:[%s1487_s3 + $0x8] sm:$0xff] %v976_v52 }
 0x160   :  { %868 = vst [vmem:[%s1487_s3 + $0x18] sm:$0xff] %v978_v53 }

// kernel: dual_yolo_forward.20
= control target key start
LH: loop header
LB: loop body
LE: loop exit
PB: predicated region body
PF: predicated region fallthrough
CT: control target
= control target key end

     0   :  { %v530_v52 = vlaneseq  ;;  %s978_s1 = inlined_call_operand.vmem [shape: bf16[256,384], index: 1, kind: input, shape index: {}]   ;;  %s979_s0 = inlined_call_operand.vmem [shape: bf16[32,256], index: 0, kind: input, shape index: {}]   ;;  %s980_s2 = inlined_call_operand.vmem [shape: f32[1,384], index: 2, kind: input, shape index: {}]   ;;  %s981_s3 = inlined_call_operand.vmem [shape: bf16[32,384], index: 3, kind: output, shape index: {}]  }
   0x1   :  { %v705_v0 = vld [vmem:[%s978_s1 + $0x4] ss:$12 sps:$4 sm:$0xff]   ;;  %v707_v1 = vld [vmem:[%s978_s1] ss:$12 sps:$4 sm:$0xff]   ;;  %v708_v2 = vld [vmem:[%s978_s1 + $0x1c] ss:$12 sps:$4 sm:$0xff]  }
   0x2   :  { %387 = vmatprep.subr.bf16.mxu0 %v705_v0  ;;  %v710_v3 = vld [vmem:[%s978_s1 + $0x18] ss:$12 sps:$4 sm:$0xff]   ;;  %v711_v4 = vld [vmem:[%s978_s1 + $0x34] ss:$12 sps:$4 sm:$0xff]   ;;  %v713_v5 = vld [vmem:[%s978_s1 + $0x30] ss:$12 sps:$4 sm:$0xff]  }
   0x3   :  { %388 = vmatpush1.bf16.msra.mxu0 %v707_v1  ;;  %v714_v6 = vld [vmem:[%s978_s1 + $0x4c] ss:$12 sps:$4 sm:$0xff]   ;;  %v726_v7 = vld [vmem:[%s978_s1 + $0xc8] ss:$12 sps:$4 sm:$0xff]   ;;  %v717_v9 = vld [vmem:[%s978_s1 + $0x64] ss:$12 sps:$4 sm:$0xff]  }
   0x4   :  { %389 = vmatprep.subr.bf16.mxu0 %v708_v2  ;;  %v716_v8 = vld [vmem:[%s978_s1 + $0x48] ss:$12 sps:$4 sm:$0xff]   ;;  %677 = vmatprep.subr.bf16.mxu1 %v726_v7  ;;  %v731_v11 = vld [vmem:[%s978_s1 + $0xe0] ss:$12 sps:$4 sm:$0xff]   ;;  %v736_v15 = vld [vmem:[%s978_s1 + $0xf8] ss:$12 sps:$4 sm:$0xff]  }
   0x5   :  { %v729_v10 = vld [vmem:[%s978_s1 + $0x8] ss:$12 sps:$4 sm:$0xff]   ;;  %v719_v12 = vld [vmem:[%s978_s1 + $0x60] ss:$12 sps:$4 sm:$0xff]   ;;  %v722_v16 = vld [vmem:[%s978_s1 + $0x78] ss:$12 sps:$4 sm:$0xff]  }
   0x6   :  { %678 = vmatpush3.bf16.msra.mxu1 %v729_v10  ;;  %v720_v13 = vld [vmem:[%s978_s1 + $0x7c] ss:$12 sps:$4 sm:$0xff]   ;;  %v734_v14 = vld [vmem:[%s978_s1 + $0x20] ss:$12 sps:$4 sm:$0xff]   ;;  %v739_v17 = vld [vmem:[%s978_s1 + $0x38] ss:$12 sps:$4 sm:$0xff]  }
   0x7   :  { %390 = vmatpush1.bf16.msra.mxu0 %v710_v3  ;;  %679 = vmatprep.subr.bf16.mxu1 %v731_v11  ;;  %v723_v18 = vld [vmem:[%s978_s1 + $0x94] ss:$12 sps:$4 sm:$0xff]   ;;  %v741_v19 = vld [vmem:[%s978_s1 + $0x110] ss:$12 sps:$4 sm:$0xff]   ;;  %v727_v23 = vld [vmem:[%s978_s1 + $0xac] ss:$12 sps:$4 sm:$0xff]  }
   0x8   :  { %391 = vmatprep.subr.bf16.mxu0 %v711_v4  ;;  %v725_v20 = vld [vmem:[%s978_s1 + $0x90] ss:$12 sps:$4 sm:$0xff]   ;;  %v746_v22 = vld [vmem:[%s978_s1 + $0x128] ss:$12 sps:$4 sm:$0xff]   ;;  %v751_v26 = vld [vmem:[%s978_s1 + $0x140] ss:$12 sps:$4 sm:$0xff]  }
   0x9   :  { %v744_v21 = vld [vmem:[%s978_s1 + $0x50] ss:$12 sps:$4 sm:$0xff]   ;;  %v730_v24 = vld [vmem:[%s978_s1 + $0xa8] ss:$12 sps:$4 sm:$0xff]   ;;  %v735_v28 = vld [vmem:[%s978_s1 + $0xc0] ss:$12 sps:$4 sm:$0xff]  }
   0xa   :  { %680 = vmatpush3.bf16.msra.mxu1 %v734_v14  ;;  %v749_v25 = vld [vmem:[%s978_s1 + $0x68] ss:$12 sps:$4 sm:$0xff]   ;;  %v732_v27 = vld [vmem:[%s978_s1 + $0xc4] ss:$12 sps:$4 sm:$0xff]   ;;  %v754_v29 = vld [vmem:[%s978_s1 + $0x80] ss:$12 sps:$4 sm:$0xff]  }
   0xb   :  { %392 = vmatpush1.bf16.msra.mxu0 %v713_v5  ;;  %681 = vmatprep.subr.bf16.mxu1 %v736_v15  ;;  %v756_v30 = vld [vmem:[%s978_s1 + $0x158] ss:$12 sps:$4 sm:$0xff]   ;;  %v737_v31 = vld [vmem:[%s978_s1 + $0xdc] ss:$12 sps:$4 sm:$0xff]   ;;  %v742_v35 = vld [vmem:[%s978_s1 + $0xf4] ss:$12 sps:$4 sm:$0xff]  }
   0xc   :  { %393 = vmatprep.subr.bf16.mxu0 %v714_v6  ;;  %v759_v32 = vld [vmem:[%s978_s1 + $0x98] ss:$12 sps:$4 sm:$0xff]   ;;  %v761_v34 = vld [vmem:[%s978_s1 + $0x170] ss:$12 sps:$4 sm:$0xff]   ;;  %v766_v40 = vld [vmem:[%s979_s0] ss:$8 sps:$4 sm:$0xff]  }
   0xd   :  { %v740_v33 = vld [vmem:[%s978_s1 + $0xd8] ss:$12 sps:$4 sm:$0xff]   ;;  %v764_v37 = vld [vmem:[%s978_s1 + $0xb0] ss:$12 sps:$4 sm:$0xff]   ;;  %v750_v42 = vld [vmem:[%s978_s1 + $0x108] ss:$12 sps:$4 sm:$0xff]  }
   0xe   :  { %682 = vmatpush3.bf16.msra.mxu1 %v739_v17  ;;  %v768_v36 = vld [vmem:[%s979_s0 + $0x4] ss:$8 sps:$4 sm:$0xff]   ;;  %v745_v38 = vld [vmem:[%s978_s1 + $0xf0] ss:$12 sps:$4 sm:$0xff]   ;;  %v762_v48 = vld [vmem:[%s978_s1 + $0x154] ss:$12 sps:$4 sm:$0xff]  }
   0xf   :  { %394 = vmatpush1.bf16.msra.mxu0 %v716_v8  ;;  %683 = vmatprep.subr.bf16.mxu1 %v741_v19  ;;  %v747_v39 = vld [vmem:[%s978_s1 + $0x10c] ss:$12 sps:$4 sm:$0xff]   ;;  %v772_v41 = vld [vmem:[%s979_s0 + $0x14] ss:$8 sps:$4 sm:$0xff]   ;;  %v752_v43 = vld [vmem:[%s978_s1 + $0x124] ss:$12 sps:$4 sm:$0xff]  }
  0x10   :  { %395 = vmatprep.subr.bf16.mxu0 %v717_v9  ;;  %472 = vmatprep.mubr.bf16.mxu1 %v768_v36  ;;  %v755_v44 = vld [vmem:[%s978_s1 + $0x120] ss:$12 sps:$4 sm:$0xff]   ;;  %v757_v45 = vld [vmem:[%s978_s1 + $0x13c] ss:$12 sps:$4 sm:$0xff]   ;;  %v774_v46 = vld [vmem:[%s979_s0 + $0x10] ss:$8 sps:$4 sm:$0xff]  }
  0x11   :  { %419 = vmatprep.mubr.bf16.mxu0 %v768_v36  ;;  %v760_v47 = vld [vmem:[%s978_s1 + $0x138] ss:$12 sps:$4 sm:$0xff]   ;;  %v765_v49 = vld [vmem:[%s978_s1 + $0x150] ss:$12 sps:$4 sm:$0xff]   ;;  %v771_v51 = vld [vmem:[%s978_s1 + $0x168] ss:$12 sps:$4 sm:$0xff]  }
  0x12   :  { %684 = vmatpush3.bf16.msra.mxu1 %v744_v21  ;;  %v769_v50 = vld [vmem:[%s978_s1 + $0x16c] ss:$12 sps:$4 sm:$0xff]   ;;  %v531_v53 = vshrl.u32 %v530_v52, 7  ;;  %v528_v55 = vld [vmem:[%s980_s2] sm:$0x7] }
  0x13   :  { %396 = vmatpush1.bf16.msra.mxu0 %v719_v12  ;;  %685 = vmatprep.subr.bf16.mxu1 %v746_v22 }
  0x14   :  { %397 = vmatprep.subr.bf16.mxu0 %v720_v13  ;;  %v540_v54 = vsub.s32 2, %v531_v53  ;;  %v532_v10 = vsub.s32 0, %v531_v53  ;;  %v536_v13 = vsub.s32 1, %v531_v53 }
  0x16   :  { %686 = vmatpush3.bf16.msra.mxu1 %v749_v25  ;;  %v541_v57 = vrot.slane %v528_v55, %v540_v54  ;;  %v533_v15 = vrot.slane %v528_v55, %v532_v10 }
  0x17   :  { %398 = vmatpush1.bf16.msra.mxu0 %v722_v16  ;;  %687 = vmatprep.subr.bf16.mxu1 %v751_v26  ;;  %v537_v16 = vrot.slane %v528_v55, %v536_v13 }
  0x18   :  { %399 = vmatprep.subr.bf16.mxu0 %v723_v18 }
  0x1a   :  { %688 = vmatpush3.bf16.msra.mxu1 %v754_v29 }
  0x1b   :  { %400 = vmatpush1.bf16.msra.mxu0 %v725_v20  ;;  %689 = vmatprep.subr.bf16.mxu1 %v756_v30 }
  0x1c   :  { %401 = vmatprep.subr.bf16.mxu0 %v727_v23 }
  0x1e   :  { %690 = vmatpush3.bf16.msra.mxu1 %v759_v32 }
  0x1f   :  { %402 = vmatpush1.bf16.msra.mxu0 %v730_v24  ;;  %691 = vmatprep.subr.bf16.mxu1 %v761_v34 }
  0x20   :  { %403 = vmatprep.subr.bf16.mxu0 %v732_v27 }
  0x22   :  { %692 = vmatpush3.bf16.msra.mxu1 %v764_v37 }
  0x23   :  { %404 = vmatpush1.bf16.msra.mxu0 %v735_v28 }
  0x24   :  { %405 = vmatprep.subr.bf16.mxu0 %v737_v31 }
  0x25   :  { %473 = vmatmul.mubr.bf16.vlgmr.msra.gmra.mrb[0].mxu1 %v766_v40 }
  0x26   :  { %480 = vmatprep.mubr.bf16.mxu1 %v772_v41 }
  0x27   :  { %406 = vmatpush1.bf16.msra.mxu0 %v740_v33 }
  0x28   :  { %407 = vmatprep.subr.bf16.mxu0 %v742_v35 }
  0x2b   :  { %408 = vmatpush1.bf16.msra.mxu0 %v745_v38 }
  0x2c   :  { %409 = vmatprep.subr.bf16.mxu0 %v747_v39 }
  0x2d   :  { %481 = vmatmul.mubr.bf16.gmra.mrb[4].mxu1 %v774_v46 }
  0x2f   :  { %410 = vmatpush1.bf16.msra.mxu0 %v750_v42 }
  0x30   :  { %411 = vmatprep.subr.bf16.mxu0 %v752_v43 }
  0x33   :  { %412 = vmatpush1.bf16.msra.mxu0 %v755_v44 }
  0x34   :  { %413 = vmatprep.subr.bf16.mxu0 %v757_v45 }
  0x37   :  { %414 = vmatpush1.bf16.msra.mxu0 %v760_v47 }
  0x38   :  { %415 = vmatprep.subr.bf16.mxu0 %v762_v48 }
  0x3b   :  { %416 = vmatpush1.bf16.msra.mxu0 %v765_v49 }
  0x3c   :  { %417 = vmatprep.subr.bf16.mxu0 %v769_v50 }
  0x3f   :  { %418 = vmatpush1.bf16.msra.mxu0 %v771_v51 }
  0x42   :  { %420 = vmatmul.mubr.bf16.vlgmr.msra.gmra.mrb[0].mxu0 %v766_v40 }
  0x43   :  { %429 = vmatprep.mubr.bf16.mxu0 %v772_v41 }
  0x4a   :  { %430 = vmatmul.mubr.bf16.gmra.mrb[4].mxu0 %v774_v46 }
  0xf8   :  { %v693_v56 = vpop.f32.mrb[0].mxu1 }
  0xf9   :  { %v694_v58 = vpop.f32.mrb[1].mxu1 }
  0xfa   :  { %v695_v59 = vadd.f32 %v694_v58, %v693_v56  ;;  %v696_v60 = vpop.f32.mrb[2].mxu1 }
  0xfb   :  { %v697_v61 = vpop.f32.mrb[3].mxu1 }
  0xfc   :  { %v547_v62 = vadd.f32 %v695_v59, %v541_v57  ;;  %v698_v63 = vadd.f32 %v697_v61, %v696_v60 }
  0xfe   :  { %v670_v0 = vpack.c.bf16 %v547_v62, %v547_v62  ;;  %v550_v1 = vadd.f32 %v698_v63, %v541_v57 }
 0x100   :  { %598 = vst [vmem:[%s981_s3 + $0x8] sm:$0xf] %v670_v0  ;;  %v672_v2 = vpack.c.bf16 %v550_v1, %v550_v1  ;;  %v699_v3 = vpop.f32.mrb[4].mxu1 }
 0x101   :  { %v700_v4 = vpop.f32.mrb[5].mxu1 }
 0x102   :  { %600 = vst [vmem:[%s981_s3 + $0x14] sm:$0xf] %v672_v2  ;;  %v701_v5 = vadd.f32 %v700_v4, %v699_v3  ;;  %v702_v6 = vpop.f32.mrb[6].mxu1 }
 0x103   :  { %v703_v7 = vpop.f32.mrb[7].mxu1 }
 0x104   :  { %v553_v8 = vadd.f32 %v701_v5, %v541_v57  ;;  %v704_v9 = vadd.f32 %v703_v7, %v702_v6 }
 0x106   :  { %v674_v11 = vpack.c.bf16 %v553_v8, %v553_v8  ;;  %v556_v12 = vadd.f32 %v704_v9, %v541_v57 }
 0x108   :  { %602 = vst [vmem:[%s981_s3 + $0x20] sm:$0xf] %v674_v11  ;;  %v676_v14 = vpack.c.bf16 %v556_v12, %v556_v12 }
 0x10a   :  { %604 = vst [vmem:[%s981_s3 + $0x2c] sm:$0xf] %v676_v14 }
 0x115   :  { %v421_v17 = vpop.f32.mrb[0].mxu0 }
 0x116   :  { %v545_v18 = vadd.f32 %v533_v15, %v421_v17  ;;  %v423_v19 = vpop.f32.mrb[1].mxu0 }
 0x117   :  { %v546_v20 = vadd.f32 %v537_v16, %v423_v19  ;;  %v425_v21 = vpop.f32.mrb[2].mxu0 }
 0x118   :  { %v548_v22 = vadd.f32 %v533_v15, %v425_v21  ;;  %v427_v23 = vpop.f32.mrb[3].mxu0 }
 0x119   :  { %v669_v24 = vpack.c.bf16 %v546_v20, %v545_v18  ;;  %v549_v25 = vadd.f32 %v537_v16, %v427_v23 }
 0x11b   :  { %597 = vst [vmem:[%s981_s3] sm:$0xff] %v669_v24  ;;  %v671_v26 = vpack.c.bf16 %v549_v25, %v548_v22 }
 0x11d   :  { %599 = vst [vmem:[%s981_s3 + $0xc] sm:$0xff] %v671_v26  ;;  %v431_v27 = vpop.f32.mrb[4].mxu0 }
 0x11e   :  { %v551_v28 = vadd.f32 %v533_v15, %v431_v27  ;;  %v433_v29 = vpop.f32.mrb[5].mxu0 }
 0x11f   :  { %v552_v30 = vadd.f32 %v537_v16, %v433_v29  ;;  %v435_v31 = vpop.f32.mrb[6].mxu0 }
 0x120   :  { %v554_v32 = vadd.f32 %v533_v15, %v435_v31  ;;  %v437_v33 = vpop.f32.mrb[7].mxu0 }
 0x121   :  { %v673_v34 = vpack.c.bf16 %v552_v30, %v551_v28  ;;  %v555_v35 = vadd.f32 %v537_v16, %v437_v33 }
 0x123   :  { %601 = vst [vmem:[%s981_s3 + $0x18] sm:$0xff] %v673_v34  ;;  %v675_v36 = vpack.c.bf16 %v555_v35, %v554_v32 }
 0x125   :  { %603 = vst [vmem:[%s981_s3 + $0x24] sm:$0xff] %v675_v36 }

// kernel: dual_yolo_forward.22
= control target key start
LH: loop header
LB: loop body
LE: loop exit
PB: predicated region body
PF: predicated region fallthrough
CT: control target
= control target key end

     0   :  { %s780_s12 = smov 0   ;;  %s782_s13 = smov 0   ;;  %s844_s0 = inlined_call_operand.vmem [shape: bf16[8,16,32], index: 0, kind: input, shape index: {}]   ;;  %s845_s1 = inlined_call_operand.vmem [shape: bf16[8,16,32], index: 1, kind: input, shape index: {}]   ;;  %s846_s2 = inlined_call_operand.vmem [shape: bf16[8,16,32], index: 2, kind: input, shape index: {}]   ;;  %s847_s3 = inlined_call_operand.vmem [shape: bf16[8,16,32], index: 3, kind: output, shape index: {}]  }
   0x1   :  { %s784_s14 = smov 0  }
   0x2 LB: > { %s32_s15 = sadd.s32 1, %s750_s13  ;;  %p647_p0 = scmp.ge.s32.totalorder %s754_s14, 1  ;;  %s754_s14 = sphi %s784_s14, %s13_s14   ;;  %s750_s13 = sphi %s782_s13, %s849_s13   ;;  %s746_s12 = sphi %s780_s12, %s848_s12  }
   0x3   : > { %p34_p1 = scmp.ge.s32.totalorder %s32_s15, 8  ;;  %p199_p2 = scmp.lt.s32.totalorder %s754_s14, 9 }
   0x5   : > { %s851_s15 = smov (%p34_p1, %s32_s15), 0  ;;  %p200_p3 = pnand %p647_p0, %p199_p2 }
   0x6   : > { %p250_p4 = scmp.lt.s32.totalorder (!%p200_p3), %s746_s12, 7  ;;  %vm299_vm0 = vcmask (!%p200_p3), 261120   ;;  %v756_v0 = vmov (!%p200_p3), 0.0   ;;  %vm757_vm1 = vmmov (!%p200_p3), 0   ;;  %vm294_vm2 = vcmask (!%p200_p3), 7168  }
   0x7   : > { %203 = sbr.rel (%p200_p3) target bundleno = 827 (0x33b), region = 32  ;;  %675 = vmatprep.subr.bf16.mxu0 (!%p200_p3), %v756_v0  ;;  %300 = vst.msk [vmem:[#allocation4] sm:$0xff] (!%p200_p3), %vm299_vm0, %v756_v0  ;;  %301 = vst.msk [vmem:[#allocation4 + $0x8] sm:$0xff] (!%p200_p3), %vm299_vm0, %v756_v0  ;;  %677 = vmatprep.mubr.msk.bf16.mxu0 (!%p200_p3), %vm757_vm1, %v756_v0  ;;  %v758_v4 = vmov (!%p200_p3), -1e+30   ;;  %vm366_vm3 = vcmask (!%p200_p3), 130048  }
   0x8   : > { %681 = vmatprep.subr.bf16.mxu1 (!%p200_p3), %v756_v0  ;;  %683 = vmatprep.mubr.msk.bf16.mxu1 (!%p200_p3), %vm757_vm1, %v756_v0  ;;  %295 = vst.msk [vmem:[#allocation2] sm:$0xff] (!%p200_p3), %vm294_vm2, %v758_v4  ;;  %296 = vst.msk [vmem:[#allocation2 + $0x8] sm:$0xff] (!%p200_p3), %vm294_vm2, %v758_v4  ;;  %v759_v11 = vmov (!%p200_p3), 0   ;;  %vm514_vm4 = vcmask (!%p200_p3), 257024  }
   0x9   : > { %297 = vst.msk [vmem:[#allocation3] sm:$0xff] (!%p200_p3), %vm294_vm2, %v756_v0  ;;  %298 = vst.msk [vmem:[#allocation3 + $0x8] sm:$0xff] (!%p200_p3), %vm294_vm2, %v756_v0  ;;  %715 = vset.pattern.permute.xlu1 (!%p200_p3), %v759_v11  ;;  %716 = vset.pattern.permute.xlu0 (!%p200_p3), %v759_v11 }
   0xe   : > { %s853_s12 = smov (!%p250_p4, %s746_s12), 7  ;;  %v412_v48 = vld [vmem:[#allocation4] sm:$0xff]  ;;  %v413_v50 = vld [vmem:[#allocation4 + $0x8] sm:$0xff] }
   0xf   : > { %s800_s16 = sshll.u32 %s853_s12, 3  ;;  %v364_v12 = vld [vmem:[#allocation2] sm:$0xff]  ;;  %v365_v15 = vld [vmem:[#allocation2 + $0x8] sm:$0xff] }
  0x10   : > { %s267_s19 = scalar_lea.vmem %s845_s1, %s800_s16  ;;  %s257_s22 = scalar_lea.vmem %s844_s0, %s800_s16  ;;  %v397_v36 = vld [vmem:[#allocation3] sm:$0xff]  ;;  %v398_v39 = vld [vmem:[#allocation3 + $0x8] sm:$0xff] }
  0x11   : > { %v717_v1 = vld [vmem:[%s267_s19] sm:$0xff]   ;;  %s277_s25 = scalar_lea.vmem %s846_s2, %s800_s16  ;;  %s287_s28 = scalar_lea.vmem %s847_s3, %s800_s16 }
  0x12   : > { %v321_v2 = vsel %vm299_vm0, %v717_v1, 0  ;;  %v718_v3 = vld [vmem:[%s257_s22] sm:$0xff]  }
  0x13   : > { %676 = vmatpush3.bf16.xpose.msra.mxu0 %v321_v2  ;;  %v719_v20 = vld [vmem:[%s277_s25] sm:$0xff]  }
  0x14   : > { %682 = vmatpush3.bf16.msra.mxu1 %v719_v20 }
  0x1a   : > { %678 = vmatmul.mubr.msk.bf16.vlgmr.msra.gmra.mrb[0].mxu0 %vm299_vm0, %v718_v3 }
  0xed   : > { %v357_v5 = vpop.f32.mrb[0].mxu0 }
  0xee   : > { %v679_v6 = vpop.f32.mrb[1].mxu0  ;;  %v367_v7 = vsel %vm366_vm3, %v357_v5, -inf }
  0xef   : > { %368 = vmax.xlane.f32.xlu0 %v367_v7  ;;  %v360_v8 = vpop.f32.mrb[2].mxu0 }
  0xf0   : > { %v680_v9 = vpop.f32.mrb[3].mxu0  ;;  %v370_v10 = vsel %vm366_vm3, %v360_v8, -inf }
  0xf3   : > { %371 = vmax.xlane.f32.xlu0 %v370_v10 }
 0x17c   : > { %v369_v13 = vpop.xlane.xlu0 %368 }
 0x17d   : > { %v373_v14 = vmax.f32 %v364_v12, %v369_v13 }
 0x17f   : > { %v375_v16 = vsub.f32 %v364_v12, %v373_v14  ;;  %483 = vst.msk [vmem:[#allocation2] sm:$0xff] %vm294_vm2, %v373_v14  ;;  %383 = vperm.xlu1 %715, %v373_v14  }
 0x180   : > { %v372_v17 = vpop.xlane.xlu0 %371 }
 0x181   : > { %v374_v18 = vmax.f32 %v365_v15, %v372_v17  ;;  %v377_v33 = vmul.f32 1.442695, %v375_v16 }
 0x183   : > { %v376_v19 = vsub.f32 %v365_v15, %v374_v18  ;;  %484 = vst.msk [vmem:[#allocation2 + $0x8] sm:$0xff] %vm294_vm2, %v374_v18  ;;  %388 = vperm.xlu1 %715, %v374_v18  }
 0x185   : > { %v379_v32 = vmul.f32 1.442695, %v376_v19 }
 0x1fe   : > { %v384_v21 = vpop.permute.xlu1 %383 }
 0x1ff   : > { %v391_v22 = vsub.f32 %v357_v5, %v384_v21 }
 0x201   : > { %v393_v23 = vmul.f32 1.442695, %v391_v22 }
 0x202   : > { %v389_v24 = vpop.permute.xlu1 %388 }
 0x203   : > { %720 = vpow2.f32 %v393_v23  ;;  %v392_v25 = vsub.f32 %v360_v8, %v389_v24 }
 0x205   : > { %v395_v26 = vmul.f32 1.442695, %v392_v25 }
 0x207   : > { %722 = vpow2.f32 %v395_v26 }
 0x208   : > { %724 = vpow2.f32 %v379_v32 }
 0x209   : > { %726 = vpow2.f32 %v377_v33 }
 0x20d   : > { %v721_v27 = vpop.eup %720 }
 0x20e   : > { %v401_v28 = vsel %vm366_vm3, %v721_v27, 0.0 }
 0x20f   : > { %402 = vadd.xlane.f32.xlu0 %v401_v28 }
 0x211   : > { %v723_v29 = vpop.eup %722 }
 0x212   : > { %v404_v30 = vsel %vm366_vm3, %v723_v29, 0.0  ;;  %v426_v31 = vpack.c.bf16 %v723_v29, %v721_v27  ;;  %v725_v34 = vpop.eup %724 }
 0x213   : > { %405 = vadd.xlane.f32.xlu1 %v404_v30  ;;  %v727_v35 = vpop.eup %726  ;;  %v400_v41 = vmul.f32 %v725_v34, %v398_v39 }
 0x214   : > { %684 = vmatmul.mubr.msk.bf16.vlgmr.msra.gmra.mrb[0].mxu1 %vm366_vm3, %v426_v31  ;;  %v399_v37 = vmul.f32 %v727_v35, %v397_v36 }
 0x224   : > { %421 = vperm.xlu1 %715, %v725_v34  }
 0x225   : > { %416 = vperm.xlu0 %716, %v727_v35  }
 0x29c   : > { %v403_v38 = vpop.xlane.xlu0 %402 }
 0x29d   : > { %v407_v40 = vadd.f32 %v403_v38, %v399_v37 }
 0x29f   : > { %410 = vst.msk [vmem:[#allocation3] sm:$0xff] %vm294_vm2, %v407_v40 }
 0x2a0   : > { %v406_v42 = vpop.xlane.xlu1 %405 }
 0x2a1   : > { %v408_v43 = vadd.f32 %v406_v42, %v400_v41 }
 0x2a3   : > { %411 = vst.msk [vmem:[#allocation3 + $0x8] sm:$0xff] %vm294_vm2, %v408_v43 }
 0x2a4   : > { %v417_v49 = vpop.permute.xlu0 %416  ;;  %v422_v51 = vpop.permute.xlu1 %421 }
 0x2a5   : > { %v424_v52 = vmul.f32 %v417_v49, %v412_v48  ;;  %v425_v54 = vmul.f32 %v422_v51, %v413_v50 }
 0x2a6   : > { %v488_v44 = vld [vmem:[#allocation3] sm:$0xff] }
 0x2a7   : > { %728 = vrcp.f32 %v488_v44 }
 0x2aa   : > { %v489_v45 = vld [vmem:[#allocation3 + $0x8] sm:$0xff] }
 0x2ab   : > { %730 = vrcp.f32 %v489_v45 }
 0x2b1   : > { %v729_v46 = vpop.eup %728 }
 0x2b2   : > { %496 = vperm.xlu0 %716, %v729_v46  }
 0x2b5   : > { %v731_v47 = vpop.eup %730 }
 0x2b6   : > { %501 = vperm.xlu0 %716, %v731_v47  }
 0x2e7   : > { %v472_v53 = vpop.f32.mrb[0].mxu1 }
 0x2e8   : > { %v479_v55 = vadd.f32 %v472_v53, %v424_v52  ;;  %v685_v56 = vpop.f32.mrb[1].mxu1 }
 0x2e9   : > { %v475_v57 = vpop.f32.mrb[2].mxu1 }
 0x2ea   : > { %481 = vst.msk [vmem:[#allocation4] sm:$0xff] %vm299_vm0, %v479_v55  ;;  %v480_v58 = vadd.f32 %v475_v57, %v425_v54  ;;  %v686_v59 = vpop.f32.mrb[3].mxu1 }
 0x2ec   : > { %482 = vst.msk [vmem:[#allocation4 + $0x8] sm:$0xff] %vm299_vm0, %v480_v58 }
 0x2f1   : > { %v492_v60 = vld [vmem:[#allocation4] sm:$0xff] }
 0x2f3   : > { %v493_v0 = vld [vmem:[#allocation4 + $0x8] sm:$0xff] }
 0x331   : > { %v497_v61 = vpop.permute.xlu0 %496 }
 0x332   : > { %v504_v62 = vmul.f32 %v497_v61, %v492_v60 }
 0x334   : > { %v669_v63 = vpack.c.bf16 %v504_v62, %v504_v62 }
 0x335   : > { %v502_v1 = vpop.permute.xlu0 %501 }
 0x336   : > { %515 = vst.msk [vmem:[%s287_s28] sm:$0xf] %vm514_vm4, %v669_v63  ;;  %v505_v2 = vmul.f32 %v502_v1, %v493_v0 }
 0x338   : > { %v670_v3 = vpack.c.bf16 %v505_v2, %v505_v2 }
 0x33a   : > { %516 = vst.msk [vmem:[%s287_s28 + $0x4] sm:$0xf] %vm514_vm4, %v670_v3 }
 0x33b PF: > { %s13_s14 = sadd.s32 1, %s754_s14   ;;  %s848_s12 = smov %s750_s13 }
 0x33c   : > { %p10_p5 = scmp.ge.s32.totalorder %s13_s14, 10   ;;  %s849_s13 = smov %s851_s15 }
 0x33e   :  { %12 = sbr.rel (!%p10_p5) target bundleno = 2 (0x2), region = 76 }

// kernel: dual_yolo_forward.24
= control target key start
LH: loop header
LB: loop body
LE: loop exit
PB: predicated region body
PF: predicated region fallthrough
CT: control target
= control target key end

     0   :  { %v630_v1 = vmov 0   ;;  %v457_v59 = vlaneseq  ;;  %s852_s2 = inlined_call_operand.vmem [shape: bf16[256,256], index: 2, kind: input, shape index: {}]   ;;  %s853_s3 = inlined_call_operand.vmem [shape: bf16[128,256], index: 3, kind: input, shape index: {}]   ;;  %s854_s1 = inlined_call_operand.vmem [shape: bf16[32,128], index: 1, kind: input, shape index: {}]   ;;  %s855_s0 = inlined_call_operand.vmem [shape: bf16[32,256], index: 0, kind: input, shape index: {}]   ;;  %s856_s4 = inlined_call_operand.vmem [shape: f32[1,256], index: 4, kind: input, shape index: {}]   ;;  %s857_s5 = inlined_call_operand.vmem [shape: f32[32,256], index: 5, kind: output, shape index: {}]  }
   0x1   :  { %v550_v0 = vld [vmem:[%s852_s2 + $0x4] ss:$8 sps:$4 sm:$0xff]   ;;  %201 = vmatprep.mubr.bf16.mxu1 %v630_v1  ;;  %v552_v2 = vld [vmem:[%s852_s2] ss:$8 sps:$4 sm:$0xff]   ;;  %v553_v3 = vld [vmem:[%s852_s2 + $0x14] ss:$8 sps:$4 sm:$0xff]  }
   0x2   :  { %402 = vmatprep.subr.bf16.mxu0 %v550_v0  ;;  %v555_v4 = vld [vmem:[%s852_s2 + $0x10] ss:$8 sps:$4 sm:$0xff]   ;;  %v556_v5 = vld [vmem:[%s852_s2 + $0x24] ss:$8 sps:$4 sm:$0xff]   ;;  %v558_v6 = vld [vmem:[%s852_s2 + $0x20] ss:$8 sps:$4 sm:$0xff]  }
   0x3   :  { %403 = vmatpush1.bf16.msra.mxu0 %v552_v2  ;;  %v559_v7 = vld [vmem:[%s852_s2 + $0x34] ss:$8 sps:$4 sm:$0xff]   ;;  %v561_v8 = vld [vmem:[%s852_s2 + $0x30] ss:$8 sps:$4 sm:$0xff]   ;;  %v573_v9 = vld [vmem:[%s853_s3 + $0x4] ss:$8 sps:$4 sm:$0xff]  }
   0x4   :  { %404 = vmatprep.subr.bf16.mxu0 %v553_v3  ;;  %v576_v10 = vld [vmem:[%s853_s3] ss:$8 sps:$4 sm:$0xff]   ;;  %v562_v11 = vld [vmem:[%s852_s2 + $0x44] ss:$8 sps:$4 sm:$0xff]   ;;  %169 = vmatprep.subr.bf16.mxu1 %v573_v9  ;;  %v579_v12 = vld [vmem:[%s853_s3 + $0x14] ss:$8 sps:$4 sm:$0xff]  }
   0x5   :  { %170 = vmatpush1.bf16.msra.mxu1 %v576_v10  ;;  %v582_v13 = vld [vmem:[%s853_s3 + $0x10] ss:$8 sps:$4 sm:$0xff]   ;;  %v564_v14 = vld [vmem:[%s852_s2 + $0x40] ss:$8 sps:$4 sm:$0xff]   ;;  %v565_v15 = vld [vmem:[%s852_s2 + $0x54] ss:$8 sps:$4 sm:$0xff]  }
   0x6   :  { %171 = vmatprep.subr.bf16.mxu1 %v579_v12  ;;  %v585_v16 = vld [vmem:[%s853_s3 + $0x24] ss:$8 sps:$4 sm:$0xff]   ;;  %v588_v17 = vld [vmem:[%s853_s3 + $0x20] ss:$8 sps:$4 sm:$0xff]   ;;  %v567_v18 = vld [vmem:[%s852_s2 + $0x50] ss:$8 sps:$4 sm:$0xff]  }
   0x7   :  { %405 = vmatpush1.bf16.msra.mxu0 %v555_v4  ;;  %v591_v19 = vld [vmem:[%s853_s3 + $0x34] ss:$8 sps:$4 sm:$0xff]   ;;  %v568_v20 = vld [vmem:[%s852_s2 + $0x64] ss:$8 sps:$4 sm:$0xff]   ;;  %v570_v21 = vld [vmem:[%s852_s2 + $0x60] ss:$8 sps:$4 sm:$0xff]  }
   0x8   :  { %406 = vmatprep.subr.bf16.mxu0 %v556_v5  ;;  %v594_v22 = vld [vmem:[%s853_s3 + $0x30] ss:$8 sps:$4 sm:$0xff]   ;;  %v597_v23 = vld [vmem:[%s853_s3 + $0x44] ss:$8 sps:$4 sm:$0xff]   ;;  %v571_v24 = vld [vmem:[%s852_s2 + $0x74] ss:$8 sps:$4 sm:$0xff]  }
   0x9   :  { %172 = vmatpush1.bf16.msra.mxu1 %v582_v13  ;;  %v600_v25 = vld [vmem:[%s853_s3 + $0x40] ss:$8 sps:$4 sm:$0xff]   ;;  %v575_v26 = vld [vmem:[%s852_s2 + $0x70] ss:$8 sps:$4 sm:$0xff]   ;;  %v603_v27 = vld [vmem:[%s853_s3 + $0x54] ss:$8 sps:$4 sm:$0xff]  }
   0xa   :  { %173 = vmatprep.subr.bf16.mxu1 %v585_v16  ;;  %v577_v28 = vld [vmem:[%s852_s2 + $0x84] ss:$8 sps:$4 sm:$0xff]   ;;  %v581_v29 = vld [vmem:[%s852_s2 + $0x80] ss:$8 sps:$4 sm:$0xff]   ;;  %v606_v30 = vld [vmem:[%s853_s3 + $0x50] ss:$8 sps:$4 sm:$0xff]  }
   0xb   :  { %407 = vmatpush1.bf16.msra.mxu0 %v558_v6  ;;  %v609_v31 = vld [vmem:[%s853_s3 + $0x64] ss:$8 sps:$4 sm:$0xff]   ;;  %v583_v32 = vld [vmem:[%s852_s2 + $0x94] ss:$8 sps:$4 sm:$0xff]   ;;  %v587_v33 = vld [vmem:[%s852_s2 + $0x90] ss:$8 sps:$4 sm:$0xff]  }
   0xc   :  { %408 = vmatprep.subr.bf16.mxu0 %v559_v7  ;;  %v612_v34 = vld [vmem:[%s853_s3 + $0x60] ss:$8 sps:$4 sm:$0xff]   ;;  %v625_v35 = vld [vmem:[%s855_s0 + $0x4] ss:$8 sps:$4 sm:$0xff]   ;;  %v615_v36 = vld [vmem:[%s853_s3 + $0x74] ss:$8 sps:$4 sm:$0xff]  }
   0xd   :  { %174 = vmatpush1.bf16.msra.mxu1 %v588_v17  ;;  %v589_v37 = vld [vmem:[%s852_s2 + $0xa4] ss:$8 sps:$4 sm:$0xff]   ;;  %434 = vmatprep.mubr.bf16.mxu0 %v625_v35  ;;  %v618_v38 = vld [vmem:[%s853_s3 + $0x70] ss:$8 sps:$4 sm:$0xff]   ;;  %v593_v39 = vld [vmem:[%s852_s2 + $0xa0] ss:$8 sps:$4 sm:$0xff]  }
   0xe   :  { %175 = vmatprep.subr.bf16.mxu1 %v591_v19  ;;  %v595_v40 = vld [vmem:[%s852_s2 + $0xb4] ss:$8 sps:$4 sm:$0xff]   ;;  %v621_v41 = vld [vmem:[%s854_s1] sm:$0xff]   ;;  %v599_v42 = vld [vmem:[%s852_s2 + $0xb0] ss:$8 sps:$4 sm:$0xff]   ;;  %v458_v0 = vshrl.u32 %v457_v59, 7 }
   0xf   :  { %409 = vmatpush1.bf16.msra.mxu0 %v561_v8  ;;  %v601_v43 = vld [vmem:[%s852_s2 + $0xc4] ss:$8 sps:$4 sm:$0xff]   ;;  %v605_v44 = vld [vmem:[%s852_s2 + $0xc0] ss:$8 sps:$4 sm:$0xff]   ;;  %v607_v45 = vld [vmem:[%s852_s2 + $0xd4] ss:$8 sps:$4 sm:$0xff]  }
  0x10   :  { %410 = vmatprep.subr.bf16.mxu0 %v562_v11  ;;  %v626_v46 = vld [vmem:[%s854_s1 + $0x8] sm:$0xff]   ;;  %v611_v47 = vld [vmem:[%s852_s2 + $0xd0] ss:$8 sps:$4 sm:$0xff]   ;;  %v619_v50 = vld [vmem:[%s852_s2 + $0xf4] ss:$8 sps:$4 sm:$0xff]   ;;  %v463_v3 = vsub.s32 1, %v458_v0 }
  0x11   :  { %176 = vmatpush1.bf16.msra.mxu1 %v594_v22  ;;  %v613_v48 = vld [vmem:[%s852_s2 + $0xe4] ss:$8 sps:$4 sm:$0xff]   ;;  %v617_v49 = vld [vmem:[%s852_s2 + $0xe0] ss:$8 sps:$4 sm:$0xff]   ;;  %v622_v51 = vld [vmem:[%s852_s2 + $0xf0] ss:$8 sps:$4 sm:$0xff]  }
  0x12   :  { %177 = vmatprep.subr.bf16.mxu1 %v597_v23  ;;  %v623_v52 = vld [vmem:[%s855_s0] ss:$8 sps:$4 sm:$0xff]   ;;  %v627_v53 = vld [vmem:[%s855_s0 + $0x14] ss:$8 sps:$4 sm:$0xff]   ;;  %v629_v54 = vld [vmem:[%s855_s0 + $0x10] ss:$8 sps:$4 sm:$0xff]  }
  0x13   :  { %411 = vmatpush1.bf16.msra.mxu0 %v564_v14  ;;  %v455_v2 = vld [vmem:[%s856_s4] sm:$0x3] }
  0x14   :  { %412 = vmatprep.subr.bf16.mxu0 %v565_v15  ;;  %v464_v6 = vrot.slane %v455_v2, %v463_v3 }
  0x15   :  { %178 = vmatpush1.bf16.msra.mxu1 %v600_v25 }
  0x16   :  { %179 = vmatprep.subr.bf16.mxu1 %v603_v27 }
  0x17   :  { %413 = vmatpush1.bf16.msra.mxu0 %v567_v18 }
  0x18   :  { %414 = vmatprep.subr.bf16.mxu0 %v568_v20 }
  0x19   :  { %180 = vmatpush1.bf16.msra.mxu1 %v606_v30 }
  0x1a   :  { %181 = vmatprep.subr.bf16.mxu1 %v609_v31 }
  0x1b   :  { %415 = vmatpush1.bf16.msra.mxu0 %v570_v21 }
  0x1c   :  { %416 = vmatprep.subr.bf16.mxu0 %v571_v24 }
  0x1d   :  { %182 = vmatpush1.bf16.msra.mxu1 %v612_v34 }
  0x1e   :  { %183 = vmatprep.subr.bf16.mxu1 %v615_v36 }
  0x1f   :  { %417 = vmatpush1.bf16.msra.mxu0 %v575_v26 }
  0x20   :  { %418 = vmatprep.subr.bf16.mxu0 %v577_v28 }
  0x21   :  { %184 = vmatpush1.bf16.msra.mxu1 %v618_v38 }
  0x23   :  { %419 = vmatpush1.bf16.msra.mxu0 %v581_v29 }
  0x24   :  { %420 = vmatprep.subr.bf16.mxu0 %v583_v32  ;;  %202 = vmatmul.mubr.bf16.vlgmr.msra.gmra.mrb[0].mxu1 %v621_v41 }
  0x25   :  { %211 = vmatprep.mubr.bf16.mxu1 %v630_v1  ;;  %v459_v1 = vsub.s32 0, %v458_v0 }
  0x27   :  { %421 = vmatpush1.bf16.msra.mxu0 %v587_v33  ;;  %v460_v4 = vrot.slane %v455_v2, %v459_v1 }
  0x28   :  { %422 = vmatprep.subr.bf16.mxu0 %v589_v37 }
  0x2b   :  { %423 = vmatpush1.bf16.msra.mxu0 %v593_v39 }
  0x2c   :  { %424 = vmatprep.subr.bf16.mxu0 %v595_v40  ;;  %212 = vmatmul.mubr.bf16.gmra.mrb[4].mxu1 %v626_v46 }
  0x2f   :  { %425 = vmatpush1.bf16.msra.mxu0 %v599_v42 }
  0x30   :  { %426 = vmatprep.subr.bf16.mxu0 %v601_v43 }
  0x33   :  { %427 = vmatpush1.bf16.msra.mxu0 %v605_v44 }
  0x34   :  { %428 = vmatprep.subr.bf16.mxu0 %v607_v45 }
  0x37   :  { %429 = vmatpush1.bf16.msra.mxu0 %v611_v47 }
  0x38   :  { %430 = vmatprep.subr.bf16.mxu0 %v613_v48 }
  0x3b   :  { %431 = vmatpush1.bf16.msra.mxu0 %v617_v49 }
  0x3c   :  { %432 = vmatprep.subr.bf16.mxu0 %v619_v50 }
  0x3f   :  { %433 = vmatpush1.bf16.msra.mxu0 %v622_v51 }
  0x42   :  { %435 = vmatmul.mubr.bf16.vlgmr.msra.gmra.mrb[0].mxu0 %v623_v52 }
  0x43   :  { %444 = vmatprep.mubr.bf16.mxu0 %v627_v53 }
  0x4a   :  { %445 = vmatmul.mubr.bf16.gmra.mrb[4].mxu0 %v629_v54 }
  0xf7   :  { %v203_v55 = vpop.f32.mrb[0].mxu1 }
  0xf8   :  { %v205_v56 = vpop.f32.mrb[1].mxu1 }
  0xf9   :  { %v207_v57 = vpop.f32.mrb[2].mxu1 }
  0xfa   :  { %v209_v58 = vpop.f32.mrb[3].mxu1 }
  0xff   :  { %v213_v60 = vpop.f32.mrb[4].mxu1 }
 0x100   :  { %v215_v61 = vpop.f32.mrb[5].mxu1 }
 0x101   :  { %v217_v62 = vpop.f32.mrb[6].mxu1 }
 0x102   :  { %v219_v63 = vpop.f32.mrb[7].mxu1 }
 0x115   :  { %v436_v5 = vpop.f32.mrb[0].mxu0 }
 0x116   :  { %v437_v7 = vadd.f32 %v436_v5, %v203_v55  ;;  %v438_v8 = vpop.f32.mrb[1].mxu0 }
 0x117   :  { %v439_v9 = vadd.f32 %v438_v8, %v205_v56  ;;  %v440_v10 = vpop.f32.mrb[2].mxu0 }
 0x118   :  { %v467_v11 = vadd.f32 %v460_v4, %v437_v7  ;;  %v441_v12 = vadd.f32 %v440_v10, %v207_v57  ;;  %v442_v13 = vpop.f32.mrb[3].mxu0 }
 0x119   :  { %v468_v14 = vadd.f32 %v464_v6, %v439_v9  ;;  %v443_v15 = vadd.f32 %v442_v13, %v209_v58 }
 0x11a   :  { %475 = vst [vmem:[%s857_s5] sm:$0xff] %v467_v11  ;;  %v469_v16 = vadd.f32 %v460_v4, %v441_v12 }
 0x11b   :  { %476 = vst [vmem:[%s857_s5 + $0x8] sm:$0xff] %v468_v14  ;;  %v470_v17 = vadd.f32 %v464_v6, %v443_v15 }
 0x11c   :  { %477 = vst [vmem:[%s857_s5 + $0x10] sm:$0xff] %v469_v16 }
 0x11d   :  { %478 = vst [vmem:[%s857_s5 + $0x18] sm:$0xff] %v470_v17  ;;  %v446_v18 = vpop.f32.mrb[4].mxu0 }
 0x11e   :  { %v447_v19 = vadd.f32 %v446_v18, %v213_v60  ;;  %v448_v20 = vpop.f32.mrb[5].mxu0 }
 0x11f   :  { %v449_v21 = vadd.f32 %v448_v20, %v215_v61  ;;  %v450_v22 = vpop.f32.mrb[6].mxu0 }
 0x120   :  { %v471_v23 = vadd.f32 %v460_v4, %v447_v19  ;;  %v451_v24 = vadd.f32 %v450_v22, %v217_v62  ;;  %v452_v25 = vpop.f32.mrb[7].mxu0 }
 0x121   :  { %v472_v26 = vadd.f32 %v464_v6, %v449_v21  ;;  %v453_v27 = vadd.f32 %v452_v25, %v219_v63 }
 0x122   :  { %479 = vst [vmem:[%s857_s5 + $0x20] sm:$0xff] %v471_v23  ;;  %v473_v28 = vadd.f32 %v460_v4, %v451_v24 }
 0x123   :  { %480 = vst [vmem:[%s857_s5 + $0x28] sm:$0xff] %v472_v26  ;;  %v474_v29 = vadd.f32 %v464_v6, %v453_v27 }
 0x124   :  { %481 = vst [vmem:[%s857_s5 + $0x30] sm:$0xff] %v473_v28 }
 0x125   :  { %482 = vst [vmem:[%s857_s5 + $0x38] sm:$0xff] %v474_v29 }

// kernel: dual_yolo_forward.25
= control target key start
LH: loop header
LB: loop body
LE: loop exit
PB: predicated region body
PF: predicated region fallthrough
CT: control target
= control target key end

     0   :  { %s843_s0 = inlined_call_operand.vmem [shape: f32[32,256], index: 0, kind: input, shape index: {}]   ;;  %s844_s1 = inlined_call_operand.vmem [shape: f32[32,256], index: 1, kind: input, shape index: {}]   ;;  %s845_s2 = inlined_call_operand.vmem [shape: f32[1,256], index: 2, kind: input, shape index: {}]   ;;  %s846_s3 = inlined_call_operand.vmem [shape: f32[1,256], index: 3, kind: input, shape index: {}]   ;;  %s847_s4 = inlined_call_operand.vmem [shape: f32[1,256], index: 4, kind: input, shape index: {}]   ;;  %s848_s5 = inlined_call_operand.vmem [shape: f32[1,256], index: 5, kind: input, shape index: {}]   ;;  %s849_s6 = inlined_call_operand.vmem [shape: bf16[256,128], index: 6, kind: input, shape index: {}]   ;;  %s850_s7 = inlined_call_operand.vmem [shape: f32[1,128], index: 7, kind: input, shape index: {}]   ;;  %s851_s8 = inlined_call_operand.hbm [shape: f32[32,128], index: 8, kind: output, shape index: {}]  }
   0x1   :  { %v31_v0 = vld [vmem:[%s843_s0] sm:$0xff]  ;;  %v32_v1 = vld [vmem:[%s843_s0 + $0x8] sm:$0xff]  ;;  %v33_v5 = vld [vmem:[%s843_s0 + $0x10] sm:$0xff] }
   0x2   :  { %v35_v2 = vld [vmem:[%s843_s0 + $0x20] sm:$0xff]  ;;  %v41_v3 = vadd.f32 %v32_v1, %v31_v0  ;;  %v36_v4 = vld [vmem:[%s843_s0 + $0x28] sm:$0xff]  ;;  %v34_v6 = vld [vmem:[%s843_s0 + $0x18] sm:$0xff] }
   0x3   :  { %v47_v7 = vadd.f32 %v36_v4, %v35_v2  ;;  %v37_v8 = vld [vmem:[%s843_s0 + $0x30] sm:$0xff]  ;;  %v38_v9 = vld [vmem:[%s843_s0 + $0x38] sm:$0xff]  ;;  %v44_v10 = vadd.f32 %v34_v6, %v33_v5  ;;  %v144_v12 = vld [vmem:[%s844_s1] sm:$0xff] }
   0x4   :  { %42 = vadd.xlane.f32.xlu0 %v41_v3  ;;  %v50_v11 = vadd.f32 %v38_v9, %v37_v8  ;;  %v145_v13 = vld [vmem:[%s844_s1 + $0x8] sm:$0xff]  ;;  %v146_v14 = vld [vmem:[%s844_s1 + $0x10] sm:$0xff]  ;;  %v147_v15 = vld [vmem:[%s844_s1 + $0x18] sm:$0xff] }
   0x5   :  { %48 = vadd.xlane.f32.xlu1 %v47_v7  ;;  %v148_v16 = vld [vmem:[%s844_s1 + $0x20] sm:$0xff]  ;;  %v149_v17 = vld [vmem:[%s844_s1 + $0x28] sm:$0xff]  ;;  %v154_v18 = vadd.f32 %v145_v13, %v144_v12  ;;  %v150_v19 = vld [vmem:[%s844_s1 + $0x30] sm:$0xff]  ;;  %v157_v21 = vadd.f32 %v147_v15, %v146_v14 }
   0x6   :  { %v151_v20 = vld [vmem:[%s844_s1 + $0x38] sm:$0xff]  ;;  %v160_v22 = vadd.f32 %v149_v17, %v148_v16 }
   0x7   :  { %v163_v23 = vadd.f32 %v151_v20, %v150_v19 }
   0x8   :  { %45 = vadd.xlane.f32.xlu0 %v44_v10 }
   0x9   :  { %51 = vadd.xlane.f32.xlu1 %v50_v11 }
   0xc   :  { %155 = vadd.xlane.f32.xlu0 %v154_v18 }
   0xd   :  { %158 = vadd.xlane.f32.xlu1 %v157_v21 }
  0x10   :  { %161 = vadd.xlane.f32.xlu0 %v160_v22 }
  0x11   :  { %164 = vadd.xlane.f32.xlu1 %v163_v23 }
  0x12   :  { %13 = vsyncpa [#allocation3], 0  ;;  %v538_v18 = vld [vmem:[%s849_s6 + $0x48] sm:$0xff]   ;;  %v541_v21 = vld [vmem:[%s849_s6 + $0x10] sm:$0xff]   ;;  %s592_s26 = smov [#allocation2]  }
  0x13   :  { %v542_v22 = vld [vmem:[%s849_s6 + $0x58] sm:$0xff]   ;;  %s461_s27 = sshll.u32 %s592_s26, 4  ;;  %s462_s27 = int_to_ptr.vmem [resolvable:$true] %s461_s27 }
  0x14   :  { %v543_v23 = vld [vmem:[%s849_s6 + $0x18] sm:$0xff]   ;;  %p573_p1 = scmp.lt.s32.totalorder %s462_s27, %s462_s27 }
  0x91   :  { %v43_v24 = vpop.xlane.xlu0 %42 }
  0x92   :  { %v54_v25 = vmul.f32 0.00390625, %v43_v24  ;;  %v49_v26 = vpop.xlane.xlu1 %48  ;;  %v544_v24 = vld [vmem:[%s849_s6 + $0x60] sm:$0xff]  }
  0x93   :  { %v56_v27 = vmul.f32 0.00390625, %v49_v26  ;;  %v546_v26 = vld [vmem:[%s849_s6 + $0x68] sm:$0xff]  }
  0x94   :  { %v688_v28 = vsub.f32 %v31_v0, %v54_v25  ;;  %v690_v29 = vsub.f32 %v32_v1, %v54_v25  ;;  %v545_v25 = vld [vmem:[%s849_s6 + $0x20] sm:$0xff]  }
  0x95   :  { %v692_v30 = vsub.f32 %v35_v2, %v56_v27  ;;  %v694_v31 = vsub.f32 %v36_v4, %v56_v27  ;;  %v46_v32 = vpop.xlane.xlu0 %45  ;;  %v547_v27 = vld [vmem:[%s849_s6 + $0x28] sm:$0xff]  }
  0x96   :  { %v55_v33 = vmul.f32 0.00390625, %v46_v32  ;;  %v52_v34 = vpop.xlane.xlu1 %51  ;;  %v66_v35 = vmul.f32 %v688_v28, %v688_v28  ;;  %v67_v36 = vmul.f32 %v690_v29, %v690_v29  ;;  %v548_v32 = vld [vmem:[%s849_s6 + $0x70] sm:$0xff]  }
  0x97   :  { %v57_v37 = vmul.f32 0.00390625, %v52_v34  ;;  %v70_v38 = vmul.f32 %v692_v30, %v692_v30  ;;  %v71_v39 = vmul.f32 %v694_v31, %v694_v31  ;;  %v550_v34 = vld [vmem:[%s849_s6 + $0x78] sm:$0xff]  }
  0x98   :  { %v704_v40 = vsub.f32 %v33_v5, %v55_v33  ;;  %v706_v41 = vsub.f32 %v34_v6, %v55_v33  ;;  %v74_v42 = vadd.f32 %v67_v36, %v66_v35  ;;  %v549_v33 = vld [vmem:[%s849_s6 + $0x30] sm:$0xff]   ;;  %v551_v35 = vld [vmem:[%s849_s6 + $0x38] sm:$0xff]  }
  0x99   :  { %v708_v43 = vsub.f32 %v37_v8, %v57_v37  ;;  %v710_v44 = vsub.f32 %v38_v9, %v57_v37  ;;  %v156_v45 = vpop.xlane.xlu0 %155  ;;  %v80_v48 = vadd.f32 %v71_v39, %v70_v38 }
  0x9a   :  { %v166_v46 = vmul.f32 0.00390625, %v156_v45  ;;  %75 = vadd.xlane.f32.xlu0 %v74_v42  ;;  %v159_v47 = vpop.xlane.xlu1 %158  ;;  %v68_v49 = vmul.f32 %v704_v40, %v704_v40  ;;  %v69_v50 = vmul.f32 %v706_v41, %v706_v41 }
  0x9b   :  { %v167_v51 = vmul.f32 0.00390625, %v159_v47  ;;  %v72_v52 = vmul.f32 %v708_v43, %v708_v43  ;;  %v73_v53 = vmul.f32 %v710_v44, %v710_v44  ;;  %v107_v47 = vlaneseq }
  0x9c   :  { %v720_v54 = vsub.f32 %v144_v12, %v166_v46  ;;  %v722_v55 = vsub.f32 %v145_v13, %v166_v46  ;;  %v77_v56 = vadd.f32 %v69_v50, %v68_v49 }
  0x9d   :  { %v724_v57 = vsub.f32 %v146_v14, %v167_v51  ;;  %v726_v58 = vsub.f32 %v147_v15, %v167_v51  ;;  %v162_v59 = vpop.xlane.xlu0 %161  ;;  %v83_v62 = vadd.f32 %v73_v53, %v72_v52 }
  0x9e   :  { %v168_v60 = vmul.f32 0.00390625, %v162_v59  ;;  %81 = vadd.xlane.f32.xlu0 %v80_v48  ;;  %78 = vadd.xlane.f32.xlu1 %v77_v56  ;;  %v165_v61 = vpop.xlane.xlu1 %164  ;;  %v178_v63 = vmul.f32 %v720_v54, %v720_v54  ;;  %v179_v0 = vmul.f32 %v722_v55, %v722_v55  ;;  %v108_v56 = vshrl.u32 %v107_v47, 7 }
  0x9f   :  { %v169_v1 = vmul.f32 0.00390625, %v165_v61  ;;  %v180_v2 = vmul.f32 %v724_v57, %v724_v57  ;;  %v181_v3 = vmul.f32 %v726_v58, %v726_v58 }
  0xa0   :  { %v736_v4 = vsub.f32 %v148_v16, %v168_v60  ;;  %v738_v5 = vsub.f32 %v149_v17, %v168_v60  ;;  %v186_v6 = vadd.f32 %v179_v0, %v178_v63  ;;  %v536_v16 = vld [vmem:[%s849_s6 + $0x40] sm:$0xff]  }
  0xa1   :  { %v740_v7 = vsub.f32 %v150_v19, %v169_v1  ;;  %v742_v8 = vsub.f32 %v151_v20, %v169_v1  ;;  %v189_v9 = vadd.f32 %v181_v3, %v180_v2  ;;  %v537_v17 = vld [vmem:[%s849_s6] sm:$0xff]   ;;  %489 = vmatprep.subr.bf16.mxu0 %v536_v16  ;;  %517 = vmatprep.subr.bf16.mxu1 %v536_v16  ;;  %v539_v19 = vld [vmem:[%s849_s6 + $0x8] sm:$0xff]   ;;  %v540_v20 = vld [vmem:[%s849_s6 + $0x50] sm:$0xff]   ;;  %v109_v1 = vsub.s32 0, %v108_v56 }
  0xa2   :  { %84 = vadd.xlane.f32.xlu1 %v83_v62  ;;  %187 = vadd.xlane.f32.xlu0 %v186_v6  ;;  %v182_v10 = vmul.f32 %v736_v4, %v736_v4  ;;  %v183_v11 = vmul.f32 %v738_v5, %v738_v5  ;;  %v39_v2 = vld [vmem:[%s845_s2] sm:$0x3]  ;;  %v113_v3 = vsub.s32 1, %v108_v56 }
  0xa3   :  { %v184_v12 = vmul.f32 %v740_v7, %v740_v7  ;;  %v185_v13 = vmul.f32 %v742_v8, %v742_v8  ;;  %490 = vmatpush3.bf16.msra.mxu0 %v537_v17  ;;  %525 = vmatpush3.bf16.msra.mxu1 %v537_v17 }
  0xa4   :  { %v192_v14 = vadd.f32 %v183_v11, %v182_v10  ;;  %491 = vmatprep.subr.bf16.mxu0 %v538_v18  ;;  %518 = vmatprep.subr.bf16.mxu1 %v538_v18  ;;  %v114_v16 = vrot.slane %v39_v2, %v113_v3 }
  0xa5   :  { %v195_v15 = vadd.f32 %v185_v13, %v184_v12  ;;  %v110_v13 = vrot.slane %v39_v2, %v109_v1 }
  0xa6   :  { %190 = vadd.xlane.f32.xlu1 %v189_v9  ;;  %193 = vadd.xlane.f32.xlu0 %v192_v14  ;;  %v40_v14 = vld [vmem:[%s846_s3] sm:$0x3] }
  0xa7   :  { %492 = vmatpush3.bf16.msra.mxu0 %v539_v19  ;;  %526 = vmatpush3.bf16.msra.mxu1 %v539_v19 }
  0xa8   :  { %493 = vmatprep.subr.bf16.mxu0 %v540_v20  ;;  %519 = vmatprep.subr.bf16.mxu1 %v540_v20  ;;  %v152_v20 = vld [vmem:[%s847_s4] sm:$0x3] }
  0xaa   :  { %196 = vadd.xlane.f32.xlu1 %v195_v15 }
  0xab   :  { %494 = vmatpush3.bf16.msra.mxu0 %v541_v21  ;;  %527 = vmatpush3.bf16.msra.mxu1 %v541_v21 }
  0xac   :  { %495 = vmatprep.subr.bf16.mxu0 %v542_v22  ;;  %520 = vmatprep.subr.bf16.mxu1 %v542_v22  ;;  %v129_v22 = vrot.slane %v40_v14, %v109_v1 }
  0xaf   :  { %496 = vmatpush3.bf16.msra.mxu0 %v543_v23  ;;  %528 = vmatpush3.bf16.msra.mxu1 %v543_v23  ;;  %v133_v23 = vrot.slane %v40_v14, %v113_v3 }
  0xb0   :  { %497 = vmatprep.subr.bf16.mxu0 %v544_v24  ;;  %521 = vmatprep.subr.bf16.mxu1 %v544_v24 }
  0xb3   :  { %498 = vmatpush3.bf16.msra.mxu0 %v545_v25  ;;  %529 = vmatpush3.bf16.msra.mxu1 %v545_v25 }
  0xb4   :  { %499 = vmatprep.subr.bf16.mxu0 %v546_v26  ;;  %522 = vmatprep.subr.bf16.mxu1 %v546_v26 }
  0xb7   :  { %500 = vmatpush3.bf16.msra.mxu0 %v547_v27  ;;  %530 = vmatpush3.bf16.msra.mxu1 %v547_v27 }
  0xb8   :  { %501 = vmatprep.subr.bf16.mxu0 %v548_v32  ;;  %523 = vmatprep.subr.bf16.mxu1 %v548_v32  ;;  %v222_v32 = vrot.slane %v152_v20, %v109_v1 }
  0xbb   :  { %502 = vmatpush3.bf16.msra.mxu0 %v549_v33  ;;  %531 = vmatpush3.bf16.msra.mxu1 %v549_v33  ;;  %v226_v33 = vrot.slane %v152_v20, %v113_v3 }
  0xbc   :  { %503 = vmatprep.subr.bf16.mxu0 %v550_v34  ;;  %524 = vmatprep.subr.bf16.mxu1 %v550_v34 }
  0xbf   :  { %504 = vmatpush3.bf16.msra.mxu0 %v551_v35  ;;  %532 = vmatpush3.bf16.msra.mxu1 %v551_v35 }
 0x127   :  { %v76_v36 = vpop.xlane.xlu0 %75 }
 0x128   :  { %v86_v37 = vmul.f32 0.00390625, %v76_v36 }
 0x12a   :  { %v90_v38 = vadd.f32 1e-05, %v86_v37 }
 0x12b   :  { %v79_v39 = vpop.xlane.xlu1 %78  ;;  %v82_v42 = vpop.xlane.xlu0 %81 }
 0x12c   :  { %552 = vrsqrt.f32 %v90_v38  ;;  %v87_v45 = vmul.f32 0.00390625, %v79_v39  ;;  %v88_v46 = vmul.f32 0.00390625, %v82_v42 }
 0x12e   :  { %v91_v48 = vadd.f32 1e-05, %v87_v45  ;;  %v92_v49 = vadd.f32 1e-05, %v88_v46 }
 0x12f   :  { %v85_v50 = vpop.xlane.xlu1 %84  ;;  %v188_v51 = vpop.xlane.xlu0 %187 }
 0x130   :  { %554 = vrsqrt.f32 %v91_v48  ;;  %v89_v52 = vmul.f32 0.00390625, %v85_v50  ;;  %v198_v53 = vmul.f32 0.00390625, %v188_v51 }
 0x131   :  { %556 = vrsqrt.f32 %v92_v49 }
 0x132   :  { %v93_v59 = vadd.f32 1e-05, %v89_v52  ;;  %v202_v60 = vadd.f32 1e-05, %v198_v53 }
 0x133   :  { %v191_v61 = vpop.xlane.xlu1 %190  ;;  %v194_v62 = vpop.xlane.xlu0 %193 }
 0x134   :  { %558 = vrsqrt.f32 %v93_v59  ;;  %v199_v63 = vmul.f32 0.00390625, %v191_v61  ;;  %v200_v0 = vmul.f32 0.00390625, %v194_v62 }
 0x135   :  { %560 = vrsqrt.f32 %v202_v60 }
 0x136   :  { %v553_v6 = vpop.eup %552  ;;  %v203_v9 = vadd.f32 1e-05, %v199_v63  ;;  %v204_v10 = vadd.f32 1e-05, %v200_v0 }
 0x137   :  { %v197_v11 = vpop.xlane.xlu1 %196  ;;  %v99_v15 = vmul.f32 %v553_v6, %v690_v29  ;;  %v98_v17 = vmul.f32 %v553_v6, %v688_v28  ;;  %v153_v29 = vld [vmem:[%s848_s5] sm:$0x3] }
 0x138   :  { %562 = vrsqrt.f32 %v203_v9  ;;  %v201_v12 = vmul.f32 0.00390625, %v197_v11  ;;  %v241_v38 = vrot.slane %v153_v29, %v109_v1 }
 0x139   :  { %564 = vrsqrt.f32 %v204_v10  ;;  %v118_v25 = vmul.f32 %v114_v16, %v99_v15  ;;  %v117_v28 = vmul.f32 %v110_v13, %v98_v17 }
 0x13a   :  { %v555_v18 = vpop.eup %554  ;;  %v205_v19 = vadd.f32 1e-05, %v201_v12 }
 0x13b   :  { %v557_v21 = vpop.eup %556  ;;  %v101_v24 = vmul.f32 %v555_v18, %v706_v41  ;;  %v100_v26 = vmul.f32 %v555_v18, %v704_v40  ;;  %v245_v41 = vrot.slane %v153_v29, %v113_v3  ;;  %v137_v45 = vadd.f32 %v133_v23, %v118_v25 }
 0x13c   :  { %566 = vrsqrt.f32 %v205_v19  ;;  %v103_v35 = vmul.f32 %v557_v21, %v694_v31  ;;  %v102_v36 = vmul.f32 %v557_v21, %v692_v30  ;;  %v136_v47 = vadd.f32 %v129_v22, %v117_v28 }
 0x13d   :  { %v120_v42 = vmul.f32 %v114_v16, %v101_v24  ;;  %v119_v46 = vmul.f32 %v110_v13, %v100_v26 }
 0x13e   :  { %v559_v27 = vpop.eup %558  ;;  %v122_v52 = vmul.f32 %v114_v16, %v103_v35  ;;  %v121_v53 = vmul.f32 %v110_v13, %v102_v36 }
 0x13f   :  { %v561_v34 = vpop.eup %560  ;;  %v105_v50 = vmul.f32 %v559_v27, %v710_v44  ;;  %v104_v51 = vmul.f32 %v559_v27, %v708_v43  ;;  %v139_v61 = vadd.f32 %v133_v23, %v120_v42  ;;  %v138_v63 = vadd.f32 %v129_v22, %v119_v46 }
 0x140   :  { %v211_v37 = vmul.f32 %v561_v34, %v722_v55  ;;  %v210_v39 = vmul.f32 %v561_v34, %v720_v54  ;;  %v141_v18 = vadd.f32 %v133_v23, %v122_v52 }
 0x141   :  { %v124_v1 = vmul.f32 %v114_v16, %v105_v50  ;;  %v123_v2 = vmul.f32 %v110_v13, %v104_v51  ;;  %v140_v16 = vadd.f32 %v129_v22, %v121_v53 }
 0x142   :  { %v563_v40 = vpop.eup %562  ;;  %v230_v48 = vmul.f32 %v226_v33, %v211_v37  ;;  %v229_v49 = vmul.f32 %v222_v32, %v210_v39 }
 0x143   :  { %v565_v31 = vpop.eup %564  ;;  %v213_v30 = vmul.f32 %v563_v40, %v726_v58  ;;  %v212_v55 = vmul.f32 %v563_v40, %v724_v57  ;;  %v143_v19 = vadd.f32 %v133_v23, %v124_v1  ;;  %v142_v20 = vadd.f32 %v129_v22, %v123_v2  ;;  %v472_v23 = vld [vmem:[%s850_s7] ss:$0 sm:$0xff]  ;;  %s568_s7 = scalar_lea.vmem %s462_s27, 512 }
 0x144   :  { %v214_v54 = vmul.f32 %v565_v31, %v736_v4  ;;  %v249_v56 = vadd.f32 %v245_v41, %v230_v48  ;;  %v248_v59 = vadd.f32 %v241_v38, %v229_v49  ;;  %v215_v60 = vmul.f32 %v565_v31, %v738_v5  ;;  %p569_p0 = scmp.ne.s32.totalorder %s462_s27, %s568_s7  ;;  %p574_p2 = scmp.lt.s32.totalorder %s568_s7, %s568_s7 }
 0x145   :  { %v232_v62 = vmul.f32 %v226_v33, %v213_v30  ;;  %v231_v0 = vmul.f32 %v222_v32, %v212_v55 }
 0x146   :  { %v567_v44 = vpop.eup %566  ;;  %v234_v43 = vmul.f32 %v226_v33, %v215_v60  ;;  %v233_v3 = vmul.f32 %v222_v32, %v214_v54  ;;  %v257_v4 = vadd.f32 %v249_v56, %v137_v45  ;;  %v256_v10 = vadd.f32 %v248_v59, %v136_v47  ;;  %p575_p3 = por %p574_p2, %p573_p1 }
 0x147   :  { %v216_v58 = vmul.f32 %v567_v44, %v740_v7  ;;  %v251_v57 = vadd.f32 %v245_v41, %v232_v62  ;;  %v250_v6 = vadd.f32 %v241_v38, %v231_v0  ;;  %v217_v9 = vmul.f32 %v567_v44, %v742_v8 }
 0x148   :  { %v253_v11 = vadd.f32 %v245_v41, %v234_v43  ;;  %v252_v12 = vadd.f32 %v241_v38, %v233_v3  ;;  %p576_p4 = pnand %p575_p3, %p569_p0 }
 0x149   :  { %v259_v5 = vadd.f32 %v251_v57, %v139_v61  ;;  %v258_v14 = vadd.f32 %v250_v6, %v138_v63  ;;  %v236_v15 = vmul.f32 %v226_v33, %v217_v9  ;;  %v235_v17 = vmul.f32 %v222_v32, %v216_v58 }
 0x14a   :  { %v261_v25 = vadd.f32 %v253_v11, %v141_v18  ;;  %v260_v8 = vadd.f32 %v252_v12, %v140_v16 }
 0x14b   :  { %v265_v13 = vpack.c.bf16 %v259_v5, %v257_v4  ;;  %v264_v21 = vpack.c.bf16 %v258_v14, %v256_v10  ;;  %v255_v24 = vadd.f32 %v245_v41, %v236_v15  ;;  %v254_v7 = vadd.f32 %v241_v38, %v235_v17 }
 0x14d   :  { %435 = vmatprep.mubr.bf16.mxu0 %v265_v13  ;;  %v263_v29 = vadd.f32 %v255_v24, %v143_v19  ;;  %v262_v26 = vadd.f32 %v254_v7, %v142_v20 }
 0x14e   :  { %436 = vmatmul.mubr.bf16.vlgmr.msra.gmra.mrb[0].mxu0 %v264_v21 }
 0x14f   :  { %v267_v28 = vpack.c.bf16 %v263_v29, %v261_v25  ;;  %v266_v27 = vpack.c.bf16 %v262_v26, %v260_v8 }
 0x151   :  { %443 = vmatprep.mubr.bf16.mxu1 %v267_v28 }
 0x152   :  { %444 = vmatmul.mubr.bf16.vlgmr.msra.gmra.mrb[0].mxu1 %v266_v27 }
 0x221   :  { %v505_v33 = vpop.f32.mrb[0].mxu0 }
 0x222   :  { %v506_v22 = vpop.f32.mrb[1].mxu0 }
 0x223   :  { %v507_v32 = vadd.f32 %v506_v22, %v505_v33  ;;  %v508_v34 = vpop.f32.mrb[2].mxu0 }
 0x224   :  { %v509_v35 = vpop.f32.mrb[3].mxu0 }
 0x225   :  { %v438_v36 = vadd.f32 %v507_v32, %v472_v23  ;;  %v510_v37 = vadd.f32 %v509_v35, %v508_v34  ;;  %v511_v38 = vpop.f32.mrb[0].mxu1 }
 0x226   :  { %v512_v41 = vpop.f32.mrb[1].mxu1 }
 0x227   :  { %452 = vst [vmem:[#allocation2] sm:$0xff] %v438_v36  ;;  %v441_v39 = vadd.f32 %v510_v37, %v472_v23  ;;  %v513_v42 = vadd.f32 %v512_v41, %v511_v38  ;;  %v514_v45 = vpop.f32.mrb[2].mxu1 }
 0x228   :  { %v515_v46 = vpop.f32.mrb[3].mxu1 }
 0x229   :  { %453 = vst [vmem:[#allocation2 + $0x8] sm:$0xff] %v441_v39  ;;  %v446_v47 = vadd.f32 %v513_v42, %v472_v23  ;;  %v516_v40 = vadd.f32 %v515_v46, %v514_v45 }
 0x22b   :  { %454 = vst [vmem:[#allocation2 + $0x10] sm:$0xff] %v446_v47  ;;  %v449_v48 = vadd.f32 %v516_v40, %v472_v23 }
 0x22d   :  { %455 = vst [vmem:[#allocation2 + $0x18] sm:$0xff] %v449_v48 }
 0x22e   :  { %579 = shalt.err (!%p576_p4)
}
 0x22f   :  { %s580_s29 = scalar_lea.hbm %s851_s8, 512 }
 0x230   :  { %p581_p5 = scmp.ne.s32.totalorder %s851_s8, %s580_s29  ;;  %p584_p6 = scmp.lt.u32.totalorder %s580_s29, %s851_s8 }
 0x232   :  { %p586_p7 = pnand %p584_p6, %p581_p5 }
 0x234   :  { %589 = shalt.err (!%p586_p7)
}
 0x235   :  { %s593_s12 = smov 128   ;;  %s594_s13 = smov 8  }
 0x236   :  { %467 = dma.vmem_to_hbm [thread:$0]  %s462_s27, 512, %s851_s8, [#allocation3], %s593_s12, %s593_s12, %s594_s13  }
 0x237   :  { %590 = dma.done.wait [#allocation3], 512  }
 0x238   :  { %591 = vsyncadd [#allocation3], 4294966784 }
 0x239   :  { %471 = vsyncpa [#allocation3], 1 }

</bundles_post_ra>
